<compile_context>
chip_gen: v7x
topology: tpu7x:2x2x1
jax: 0.10.0
libtpu: 0.0.40
codegen_flags: <defaults>
</compile_context>

<pallas_src>
import functools

import jax
import jax.numpy as jnp
from jax.experimental import pallas as pl
from jax.experimental.pallas import tpu as pltpu


# ----------------------------------------------------------------------------
# fused conv(5x5, stride 1, pad 2) + bias + ReLU + maxpool(2, 2) kernel
# ----------------------------------------------------------------------------
def conv_pool_kernel(x_ref, w_ref, b_ref, sel_ref, o_ref, patches_ref, conv_ref,
                     *, cin, h, wp, k):
    """x_ref: (Cin, Hp*Wp + k-1) flat padded image, w_ref: (Cout, K*K*Cin),
    b_ref: (Cout, 1), sel_ref: (Lm, Hh*Wh), o_ref: (Cout, Hh*Wh)."""
    l = h * wp           # flat conv output length (padded-width layout)
    lm = l - wp - 1      # length after the 4 pooling shifts

    # ---- in-VMEM im2col: K*K shifted reads of the flat padded image ---------
    for kh in range(k):
        for kw in range(k):
            idx = kh * k + kw
            shift = kh * wp + kw
            patches_ref[pl.ds(idx * cin, cin), :] = (
                x_ref[:, pl.ds(shift, l)].astype(patches_ref.dtype))

    # ---- conv = one lane-dense MXU matmul, fused bias + ReLU -----------------
    acc = jnp.dot(w_ref[...], patches_ref[...],
                  preferred_element_type=jnp.float32)          # (Cout, L)
    conv_ref[...] = jnp.maximum(acc + b_ref[...], 0.0)

    # ---- fused 2x2 max-pool: 4 shifted reads of the conv scratch ------------
    m4 = jnp.maximum(
        jnp.maximum(conv_ref[:, pl.ds(0, lm)], conv_ref[:, pl.ds(1, lm)]),
        jnp.maximum(conv_ref[:, pl.ds(wp, lm)], conv_ref[:, pl.ds(wp + 1, lm)]))
    # compact the (2hh, 2wh) window maxima into a dense (Cout, Hh*Wh) block
    # via an exact 0/1 selection matmul (f32, so it is a pure gather).
    o_ref[...] = jnp.dot(m4, sel_ref[...],
                         preferred_element_type=jnp.float32).astype(o_ref.dtype)


def _pool_select_matrix(h, w, wp):
    """0/1 matrix picking flat index 2*hh*wp + 2*wh for every pooled position."""
    hh, wh = h // 2, w // 2
    lm = h * wp - wp - 1
    pos = (2 * jnp.arange(hh)[:, None] * wp + 2 * jnp.arange(wh)[None, :]).reshape(-1)
    return (jnp.arange(lm)[:, None] == pos[None, :]).astype(jnp.float32)


def conv_relu_pool(x_nchw, w_oihw, bias, *, ksize=5):
    """Conv2d(stride=1, pad=ksize//2) + ReLU + MaxPool2d(2,2), fused in Pallas.

    Returns (B, Cout, (H//2)*(W//2)) with C-major, (h,w)-minor ordering."""
    b, cin, h, w = x_nchw.shape
    cout = w_oihw.shape[0]
    pad = ksize // 2
    hp, wp = h + 2 * pad, w + 2 * pad
    hh, wh = h // 2, w // 2
    l = h * wp
    lm = l - wp - 1
    lx = hp * wp + (ksize - 1)   # small tail so every shifted read stays in bounds

    xpad = jnp.pad(x_nchw, ((0, 0), (0, 0), (pad, pad), (pad, pad)))
    xflat = jnp.pad(xpad.reshape(b, cin, hp * wp), ((0, 0), (0, 0), (0, ksize - 1)))
    xflat = xflat.astype(jnp.float32)

    # bf16 MXU operands when patch rows stay pair/tile aligned (conv2, Cin=16);
    # Cin=1 (conv1) keeps f32 to avoid odd-sublane packed partial stores.
    patch_dtype = jnp.bfloat16 if cin % 2 == 0 else jnp.float32
    w_km = (w_oihw.transpose(0, 2, 3, 1)      # (Cout, KH, KW, Cin): k-major, ci-minor
            .reshape(cout, ksize * ksize * cin).astype(patch_dtype))
    b_col = bias.reshape(cout, 1).astype(jnp.float32)
    sel = _pool_select_matrix(h, w, wp)

    kernel = functools.partial(conv_pool_kernel, cin=cin, h=h, wp=wp, k=ksize)
    return pl.pallas_call(
        kernel,
        out_shape=jax.ShapeDtypeStruct((b, cout, hh * wh), jnp.float32),
        grid=(b,),
        in_specs=[
            pl.BlockSpec((None, cin, lx), lambda i: (i, 0, 0)),
            pl.BlockSpec((cout, ksize * ksize * cin), lambda i: (0, 0)),
            pl.BlockSpec((cout, 1), lambda i: (0, 0)),
            pl.BlockSpec((lm, hh * wh), lambda i: (0, 0)),
        ],
        out_specs=pl.BlockSpec((None, cout, hh * wh), lambda i: (i, 0, 0)),
        scratch_shapes=[
            pltpu.VMEM((ksize * ksize * cin, l), patch_dtype),   # im2col patches
            pltpu.VMEM((cout, l), jnp.float32),                  # conv+relu result
        ],
        compiler_params=pltpu.CompilerParams(dimension_semantics=("parallel",)),
    )(xflat, w_km, b_col, sel)


# ----------------------------------------------------------------------------
# fused fc1 -> relu -> fc2 -> relu -> fc3 -> log_softmax head
# ----------------------------------------------------------------------------
def fc_head_kernel(x_ref, w1_ref, b1_ref, w2_ref, b2_ref, w3_ref, b3_ref, o_ref):
    h1 = jnp.dot(x_ref[...], w1_ref[...], preferred_element_type=jnp.float32) + b1_ref[...]
    h1 = jnp.maximum(h1, 0.0)
    h2 = jnp.dot(h1, w2_ref[...], preferred_element_type=jnp.float32) + b2_ref[...]
    h2 = jnp.maximum(h2, 0.0)
    logits = jnp.dot(h2, w3_ref[...], preferred_element_type=jnp.float32) + b3_ref[...]
    m = jnp.max(logits, axis=-1, keepdims=True)
    lse = jnp.log(jnp.sum(jnp.exp(logits - m), axis=-1, keepdims=True)) + m
    o_ref[...] = (logits - lse).astype(o_ref.dtype)


def fc_head(x, p):
    bsz, feat = x.shape
    n1, n2, n3 = p["fc1_b"].shape[0], p["fc2_b"].shape[0], p["fc3_b"].shape[0]
    tm = bsz if bsz <= 256 else 256           # batch tile (single block at small B)
    w1 = p["fc1_w"].T.astype(jnp.float32)     # (1568, 128)
    w2 = p["fc2_w"].T.astype(jnp.float32)     # (128, 32)
    w3 = p["fc3_w"].T.astype(jnp.float32)     # (32, 10)
    b1 = p["fc1_b"].reshape(1, n1).astype(jnp.float32)
    b2 = p["fc2_b"].reshape(1, n2).astype(jnp.float32)
    b3 = p["fc3_b"].reshape(1, n3).astype(jnp.float32)
    return pl.pallas_call(
        fc_head_kernel,
        out_shape=jax.ShapeDtypeStruct((bsz, n3), jnp.float32),
        grid=(pl.cdiv(bsz, tm),),
        in_specs=[
            pl.BlockSpec((tm, feat), lambda i: (i, 0)),
            pl.BlockSpec((feat, n1), lambda i: (0, 0)),
            pl.BlockSpec((1, n1), lambda i: (0, 0)),
            pl.BlockSpec((n1, n2), lambda i: (0, 0)),
            pl.BlockSpec((1, n2), lambda i: (0, 0)),
            pl.BlockSpec((n2, n3), lambda i: (0, 0)),
            pl.BlockSpec((1, n3), lambda i: (0, 0)),
        ],
        out_specs=pl.BlockSpec((tm, n3), lambda i: (i, 0)),
        compiler_params=pltpu.CompilerParams(dimension_semantics=("parallel",)),
    )(x.astype(jnp.float32), w1, b1, w2, b2, w3, b3)


# ----------------------------------------------------------------------------
# ConvNet forward (3 Pallas calls total) and pure-JAX reference
# ----------------------------------------------------------------------------
def convnet_forward(x, p):
    bsz = x.shape[0]
    y = conv_relu_pool(x, p["conv1_w"], p["conv1_b"])     # (B, 16, 14*14)
    y = y.reshape(bsz, 16, 14, 14)                        # metadata-only reshape
    y = conv_relu_pool(y, p["conv2_w"], p["conv2_b"])     # (B, 32, 7*7)
    y = y.reshape(bsz, 32 * 7 * 7)                        # C-major flatten == torch .view
    return fc_head(y, p)                                  # (B, 10) log-probs


def reference_forward(x, p):
    def conv(x, w, b):
        y = jax.lax.conv_general_dilated(
            x, w, window_strides=(1, 1), padding=((2, 2), (2, 2)),
            dimension_numbers=("NCHW", "OIHW", "NCHW"))
        return y + b[None, :, None, None]

    def pool(x):
        return jax.lax.reduce_window(
            x, -jnp.inf, jax.lax.max, (1, 1, 2, 2), (1, 1, 2, 2), "VALID")

    x = pool(jax.nn.relu(conv(x, p["conv1_w"], p["conv1_b"])))
    x = pool(jax.nn.relu(conv(x, p["conv2_w"], p["conv2_b"])))
    x = x.reshape(x.shape[0], -1)
    x = jax.nn.relu(x @ p["fc1_w"].T + p["fc1_b"])
    x = jax.nn.relu(x @ p["fc2_w"].T + p["fc2_b"])
    x = x @ p["fc3_w"].T + p["fc3_b"]
    return jax.nn.log_softmax(x, axis=1)


def init_params(key):
    ks = jax.random.split(key, 10)

    def w_init(k, shape, fan_in):
        return jax.random.normal(k, shape, jnp.float32) * (fan_in ** -0.5)

    def b_init(k, shape):
        return jax.random.normal(k, shape, jnp.float32) * 0.01

    return {
        "conv1_w": w_init(ks[0], (16, 1, 5, 5), 25),
        "conv1_b": b_init(ks[1], (16,)),
        "conv2_w": w_init(ks[2], (32, 16, 5, 5), 400),
        "conv2_b": b_init(ks[3], (32,)),
        "fc1_w": w_init(ks[4], (128, 1568), 1568),
        "fc1_b": b_init(ks[5], (128,)),
        "fc2_w": w_init(ks[6], (32, 128), 128),
        "fc2_b": b_init(ks[7], (32,)),
        "fc3_w": w_init(ks[8], (10, 32), 32),
        "fc3_b": b_init(ks[9], (10,)),
    }


if __name__ == "__main__":
    key = jax.random.PRNGKey(0)
    k_params, k_x = jax.random.split(key)
    params = init_params(k_params)
    # fc1 expects 32*7*7 = 1568 features => input must be (B, 1, 28, 28)
    x = jax.random.normal(k_x, (2, 1, 28, 28), jnp.float32)

    out = jax.jit(convnet_forward)(x, params)
    out = jax.block_until_ready(out)

    ref = reference_forward(x, params)
    if out.shape != (2, 10):
        raise RuntimeError(f"bad output shape {out.shape}")
    if not jnp.allclose(out, ref, atol=5e-2, rtol=5e-2):
        err = float(jnp.max(jnp.abs(out - ref)))
        raise RuntimeError(f"Pallas output does not match JAX reference (max err {err})")
    print("KERNEL_OK")
</pallas_src>

<mosaic_0001>
module attributes {stable_mosaic.version = 11 : i64} {
  func.func @conv_pool_kernel(%arg0: i32, %arg1: memref<1x1x1028xf32, #tpu.memory_space<vmem>>, %arg2: memref<16x25xf32, #tpu.memory_space<vmem>>, %arg3: memref<16x1xf32, #tpu.memory_space<vmem>>, %arg4: memref<863x196xf32, #tpu.memory_space<vmem>>, %arg5: memref<1x16x196xf32, #tpu.memory_space<vmem>>, %arg6: memref<25x896xf32, #tpu.memory_space<vmem>>, %arg7: memref<16x896xf32, #tpu.memory_space<vmem>>) attributes {dimension_semantics = [#tpu.dimension_semantics<parallel>], iteration_bounds = array<i64: 2>, scalar_prefetch = 0 : i64, scratch_operands = 2 : i64, tpu.core_type = #tpu.core_type<tc>, window_params = [{transform_indices = @transform_0, window_bounds = array<i64: 1, 1, 1028>}, {pipeline_mode = #tpu.pipeline_mode<synchronous>, transform_indices = @transform_1, window_bounds = array<i64: 16, 25>}, {pipeline_mode = #tpu.pipeline_mode<synchronous>, transform_indices = @transform_2, window_bounds = array<i64: 16, 1>}, {pipeline_mode = #tpu.pipeline_mode<synchronous>, transform_indices = @transform_3, window_bounds = array<i64: 863, 196>}, {transform_indices = @transform_4, window_bounds = array<i64: 1, 16, 196>}]} {
    %c0 = arith.constant 0 : index
    %c0_0 = arith.constant 0 : index
    %c0_1 = arith.constant 0 : index
    %0 = vector.load %arg1[%c0, %c0_0, %c0_1] : memref<1x1x1028xf32, #tpu.memory_space<vmem>>, vector<1x1x896xf32>
    %1 = vector.shape_cast %0 : vector<1x1x896xf32> to vector<1x896xf32>
    %c0_2 = arith.constant 0 : index
    %c0_3 = arith.constant 0 : index
    %2 = vector.load %arg6[%c0_2, %c0_3] : memref<25x896xf32, #tpu.memory_space<vmem>>, vector<1x896xf32>
    tpu.vector_store %arg6[%c0_2, %c0_3], %1 {strides = array<i32>} : memref<25x896xf32, #tpu.memory_space<vmem>>, vector<1x896xf32>,
    %c0_4 = arith.constant 0 : index
    %c0_5 = arith.constant 0 : index
    %c1 = arith.constant 1 : index
    %3 = vector.load %arg1[%c0_4, %c0_5, %c1] : memref<1x1x1028xf32, #tpu.memory_space<vmem>>, vector<1x1x896xf32>
    %4 = vector.shape_cast %3 : vector<1x1x896xf32> to vector<1x896xf32>
    %c1_6 = arith.constant 1 : index
    %c0_7 = arith.constant 0 : index
    %5 = vector.load %arg6[%c1_6, %c0_7] : memref<25x896xf32, #tpu.memory_space<vmem>>, vector<1x896xf32>
    tpu.vector_store %arg6[%c1_6, %c0_7], %4 {strides = array<i32>} : memref<25x896xf32, #tpu.memory_space<vmem>>, vector<1x896xf32>,
    %c0_8 = arith.constant 0 : index
    %c0_9 = arith.constant 0 : index
    %c2 = arith.constant 2 : index
    %6 = vector.load %arg1[%c0_8, %c0_9, %c2] : memref<1x1x1028xf32, #tpu.memory_space<vmem>>, vector<1x1x896xf32>
    %7 = vector.shape_cast %6 : vector<1x1x896xf32> to vector<1x896xf32>
    %c2_10 = arith.constant 2 : index
    %c0_11 = arith.constant 0 : index
    %8 = vector.load %arg6[%c2_10, %c0_11] : memref<25x896xf32, #tpu.memory_space<vmem>>, vector<1x896xf32>
    tpu.vector_store %arg6[%c2_10, %c0_11], %7 {strides = array<i32>} : memref<25x896xf32, #tpu.memory_space<vmem>>, vector<1x896xf32>,
    %c0_12 = arith.constant 0 : index
    %c0_13 = arith.constant 0 : index
    %c3 = arith.constant 3 : index
    %9 = vector.load %arg1[%c0_12, %c0_13, %c3] : memref<1x1x1028xf32, #tpu.memory_space<vmem>>, vector<1x1x896xf32>
    %10 = vector.shape_cast %9 : vector<1x1x896xf32> to vector<1x896xf32>
    %c3_14 = arith.constant 3 : index
    %c0_15 = arith.constant 0 : index
    %11 = vector.load %arg6[%c3_14, %c0_15] : memref<25x896xf32, #tpu.memory_space<vmem>>, vector<1x896xf32>
    tpu.vector_store %arg6[%c3_14, %c0_15], %10 {strides = array<i32>} : memref<25x896xf32, #tpu.memory_space<vmem>>, vector<1x896xf32>,
    %c0_16 = arith.constant 0 : index
    %c0_17 = arith.constant 0 : index
    %c4 = arith.constant 4 : index
    %12 = vector.load %arg1[%c0_16, %c0_17, %c4] : memref<1x1x1028xf32, #tpu.memory_space<vmem>>, vector<1x1x896xf32>
    %13 = vector.shape_cast %12 : vector<1x1x896xf32> to vector<1x896xf32>
    %c4_18 = arith.constant 4 : index
    %c0_19 = arith.constant 0 : index
    %14 = vector.load %arg6[%c4_18, %c0_19] : memref<25x896xf32, #tpu.memory_space<vmem>>, vector<1x896xf32>
    tpu.vector_store %arg6[%c4_18, %c0_19], %13 {strides = array<i32>} : memref<25x896xf32, #tpu.memory_space<vmem>>, vector<1x896xf32>,
    %c0_20 = arith.constant 0 : index
    %c0_21 = arith.constant 0 : index
    %c32 = arith.constant 32 : index
    %15 = vector.load %arg1[%c0_20, %c0_21, %c32] : memref<1x1x1028xf32, #tpu.memory_space<vmem>>, vector<1x1x896xf32>
    %16 = vector.shape_cast %15 : vector<1x1x896xf32> to vector<1x896xf32>
    %c5 = arith.constant 5 : index
    %c0_22 = arith.constant 0 : index
    %17 = vector.load %arg6[%c5, %c0_22] : memref<25x896xf32, #tpu.memory_space<vmem>>, vector<1x896xf32>
    tpu.vector_store %arg6[%c5, %c0_22], %16 {strides = array<i32>} : memref<25x896xf32, #tpu.memory_space<vmem>>, vector<1x896xf32>,
    %c0_23 = arith.constant 0 : index
    %c0_24 = arith.constant 0 : index
    %c33 = arith.constant 33 : index
    %18 = vector.load %arg1[%c0_23, %c0_24, %c33] : memref<1x1x1028xf32, #tpu.memory_space<vmem>>, vector<1x1x896xf32>
    %19 = vector.shape_cast %18 : vector<1x1x896xf32> to vector<1x896xf32>
    %c6 = arith.constant 6 : index
    %c0_25 = arith.constant 0 : index
    %20 = vector.load %arg6[%c6, %c0_25] : memref<25x896xf32, #tpu.memory_space<vmem>>, vector<1x896xf32>
    tpu.vector_store %arg6[%c6, %c0_25], %19 {strides = array<i32>} : memref<25x896xf32, #tpu.memory_space<vmem>>, vector<1x896xf32>,
    %c0_26 = arith.constant 0 : index
    %c0_27 = arith.constant 0 : index
    %c34 = arith.constant 34 : index
    %21 = vector.load %arg1[%c0_26, %c0_27, %c34] : memref<1x1x1028xf32, #tpu.memory_space<vmem>>, vector<1x1x896xf32>
    %22 = vector.shape_cast %21 : vector<1x1x896xf32> to vector<1x896xf32>
    %c7 = arith.constant 7 : index
    %c0_28 = arith.constant 0 : index
    %23 = vector.load %arg6[%c7, %c0_28] : memref<25x896xf32, #tpu.memory_space<vmem>>, vector<1x896xf32>
    tpu.vector_store %arg6[%c7, %c0_28], %22 {strides = array<i32>} : memref<25x896xf32, #tpu.memory_space<vmem>>, vector<1x896xf32>,
    %c0_29 = arith.constant 0 : index
    %c0_30 = arith.constant 0 : index
    %c35 = arith.constant 35 : index
    %24 = vector.load %arg1[%c0_29, %c0_30, %c35] : memref<1x1x1028xf32, #tpu.memory_space<vmem>>, vector<1x1x896xf32>
    %25 = vector.shape_cast %24 : vector<1x1x896xf32> to vector<1x896xf32>
    %c8 = arith.constant 8 : index
    %c0_31 = arith.constant 0 : index
    %26 = vector.load %arg6[%c8, %c0_31] : memref<25x896xf32, #tpu.memory_space<vmem>>, vector<1x896xf32>
    tpu.vector_store %arg6[%c8, %c0_31], %25 {strides = array<i32>} : memref<25x896xf32, #tpu.memory_space<vmem>>, vector<1x896xf32>,
    %c0_32 = arith.constant 0 : index
    %c0_33 = arith.constant 0 : index
    %c36 = arith.constant 36 : index
    %27 = vector.load %arg1[%c0_32, %c0_33, %c36] : memref<1x1x1028xf32, #tpu.memory_space<vmem>>, vector<1x1x896xf32>
    %28 = vector.shape_cast %27 : vector<1x1x896xf32> to vector<1x896xf32>
    %c9 = arith.constant 9 : index
    %c0_34 = arith.constant 0 : index
    %29 = vector.load %arg6[%c9, %c0_34] : memref<25x896xf32, #tpu.memory_space<vmem>>, vector<1x896xf32>
    tpu.vector_store %arg6[%c9, %c0_34], %28 {strides = array<i32>} : memref<25x896xf32, #tpu.memory_space<vmem>>, vector<1x896xf32>,
    %c0_35 = arith.constant 0 : index
    %c0_36 = arith.constant 0 : index
    %c64 = arith.constant 64 : index
    %30 = vector.load %arg1[%c0_35, %c0_36, %c64] : memref<1x1x1028xf32, #tpu.memory_space<vmem>>, vector<1x1x896xf32>
    %31 = vector.shape_cast %30 : vector<1x1x896xf32> to vector<1x896xf32>
    %c10 = arith.constant 10 : index
    %c0_37 = arith.constant 0 : index
    %32 = vector.load %arg6[%c10, %c0_37] : memref<25x896xf32, #tpu.memory_space<vmem>>, vector<1x896xf32>
    tpu.vector_store %arg6[%c10, %c0_37], %31 {strides = array<i32>} : memref<25x896xf32, #tpu.memory_space<vmem>>, vector<1x896xf32>,
    %c0_38 = arith.constant 0 : index
    %c0_39 = arith.constant 0 : index
    %c65 = arith.constant 65 : index
    %33 = vector.load %arg1[%c0_38, %c0_39, %c65] : memref<1x1x1028xf32, #tpu.memory_space<vmem>>, vector<1x1x896xf32>
    %34 = vector.shape_cast %33 : vector<1x1x896xf32> to vector<1x896xf32>
    %c11 = arith.constant 11 : index
    %c0_40 = arith.constant 0 : index
    %35 = vector.load %arg6[%c11, %c0_40] : memref<25x896xf32, #tpu.memory_space<vmem>>, vector<1x896xf32>
    tpu.vector_store %arg6[%c11, %c0_40], %34 {strides = array<i32>} : memref<25x896xf32, #tpu.memory_space<vmem>>, vector<1x896xf32>,
    %c0_41 = arith.constant 0 : index
    %c0_42 = arith.constant 0 : index
    %c66 = arith.constant 66 : index
    %36 = vector.load %arg1[%c0_41, %c0_42, %c66] : memref<1x1x1028xf32, #tpu.memory_space<vmem>>, vector<1x1x896xf32>
    %37 = vector.shape_cast %36 : vector<1x1x896xf32> to vector<1x896xf32>
    %c12 = arith.constant 12 : index
    %c0_43 = arith.constant 0 : index
    %38 = vector.load %arg6[%c12, %c0_43] : memref<25x896xf32, #tpu.memory_space<vmem>>, vector<1x896xf32>
    tpu.vector_store %arg6[%c12, %c0_43], %37 {strides = array<i32>} : memref<25x896xf32, #tpu.memory_space<vmem>>, vector<1x896xf32>,
    %c0_44 = arith.constant 0 : index
    %c0_45 = arith.constant 0 : index
    %c67 = arith.constant 67 : index
    %39 = vector.load %arg1[%c0_44, %c0_45, %c67] : memref<1x1x1028xf32, #tpu.memory_space<vmem>>, vector<1x1x896xf32>
    %40 = vector.shape_cast %39 : vector<1x1x896xf32> to vector<1x896xf32>
    %c13 = arith.constant 13 : index
    %c0_46 = arith.constant 0 : index
    %41 = vector.load %arg6[%c13, %c0_46] : memref<25x896xf32, #tpu.memory_space<vmem>>, vector<1x896xf32>
    tpu.vector_store %arg6[%c13, %c0_46], %40 {strides = array<i32>} : memref<25x896xf32, #tpu.memory_space<vmem>>, vector<1x896xf32>,
    %c0_47 = arith.constant 0 : index
    %c0_48 = arith.constant 0 : index
    %c68 = arith.constant 68 : index
    %42 = vector.load %arg1[%c0_47, %c0_48, %c68] : memref<1x1x1028xf32, #tpu.memory_space<vmem>>, vector<1x1x896xf32>
    %43 = vector.shape_cast %42 : vector<1x1x896xf32> to vector<1x896xf32>
    %c14 = arith.constant 14 : index
    %c0_49 = arith.constant 0 : index
    %44 = vector.load %arg6[%c14, %c0_49] : memref<25x896xf32, #tpu.memory_space<vmem>>, vector<1x896xf32>
    tpu.vector_store %arg6[%c14, %c0_49], %43 {strides = array<i32>} : memref<25x896xf32, #tpu.memory_space<vmem>>, vector<1x896xf32>,
    %c0_50 = arith.constant 0 : index
    %c0_51 = arith.constant 0 : index
    %c96 = arith.constant 96 : index
    %45 = vector.load %arg1[%c0_50, %c0_51, %c96] : memref<1x1x1028xf32, #tpu.memory_space<vmem>>, vector<1x1x896xf32>
    %46 = vector.shape_cast %45 : vector<1x1x896xf32> to vector<1x896xf32>
    %c15 = arith.constant 15 : index
    %c0_52 = arith.constant 0 : index
    %47 = vector.load %arg6[%c15, %c0_52] : memref<25x896xf32, #tpu.memory_space<vmem>>, vector<1x896xf32>
    tpu.vector_store %arg6[%c15, %c0_52], %46 {strides = array<i32>} : memref<25x896xf32, #tpu.memory_space<vmem>>, vector<1x896xf32>,
    %c0_53 = arith.constant 0 : index
    %c0_54 = arith.constant 0 : index
    %c97 = arith.constant 97 : index
    %48 = vector.load %arg1[%c0_53, %c0_54, %c97] : memref<1x1x1028xf32, #tpu.memory_space<vmem>>, vector<1x1x896xf32>
    %49 = vector.shape_cast %48 : vector<1x1x896xf32> to vector<1x896xf32>
    %c16 = arith.constant 16 : index
    %c0_55 = arith.constant 0 : index
    %50 = vector.load %arg6[%c16, %c0_55] : memref<25x896xf32, #tpu.memory_space<vmem>>, vector<1x896xf32>
    tpu.vector_store %arg6[%c16, %c0_55], %49 {strides = array<i32>} : memref<25x896xf32, #tpu.memory_space<vmem>>, vector<1x896xf32>,
    %c0_56 = arith.constant 0 : index
    %c0_57 = arith.constant 0 : index
    %c98 = arith.constant 98 : index
    %51 = vector.load %arg1[%c0_56, %c0_57, %c98] : memref<1x1x1028xf32, #tpu.memory_space<vmem>>, vector<1x1x896xf32>
    %52 = vector.shape_cast %51 : vector<1x1x896xf32> to vector<1x896xf32>
    %c17 = arith.constant 17 : index
    %c0_58 = arith.constant 0 : index
    %53 = vector.load %arg6[%c17, %c0_58] : memref<25x896xf32, #tpu.memory_space<vmem>>, vector<1x896xf32>
    tpu.vector_store %arg6[%c17, %c0_58], %52 {strides = array<i32>} : memref<25x896xf32, #tpu.memory_space<vmem>>, vector<1x896xf32>,
    %c0_59 = arith.constant 0 : index
    %c0_60 = arith.constant 0 : index
    %c99 = arith.constant 99 : index
    %54 = vector.load %arg1[%c0_59, %c0_60, %c99] : memref<1x1x1028xf32, #tpu.memory_space<vmem>>, vector<1x1x896xf32>
    %55 = vector.shape_cast %54 : vector<1x1x896xf32> to vector<1x896xf32>
    %c18 = arith.constant 18 : index
    %c0_61 = arith.constant 0 : index
    %56 = vector.load %arg6[%c18, %c0_61] : memref<25x896xf32, #tpu.memory_space<vmem>>, vector<1x896xf32>
    tpu.vector_store %arg6[%c18, %c0_61], %55 {strides = array<i32>} : memref<25x896xf32, #tpu.memory_space<vmem>>, vector<1x896xf32>,
    %c0_62 = arith.constant 0 : index
    %c0_63 = arith.constant 0 : index
    %c100 = arith.constant 100 : index
    %57 = vector.load %arg1[%c0_62, %c0_63, %c100] : memref<1x1x1028xf32, #tpu.memory_space<vmem>>, vector<1x1x896xf32>
    %58 = vector.shape_cast %57 : vector<1x1x896xf32> to vector<1x896xf32>
    %c19 = arith.constant 19 : index
    %c0_64 = arith.constant 0 : index
    %59 = vector.load %arg6[%c19, %c0_64] : memref<25x896xf32, #tpu.memory_space<vmem>>, vector<1x896xf32>
    tpu.vector_store %arg6[%c19, %c0_64], %58 {strides = array<i32>} : memref<25x896xf32, #tpu.memory_space<vmem>>, vector<1x896xf32>,
    %c0_65 = arith.constant 0 : index
    %c0_66 = arith.constant 0 : index
    %c128 = arith.constant 128 : index
    %60 = vector.load %arg1[%c0_65, %c0_66, %c128] : memref<1x1x1028xf32, #tpu.memory_space<vmem>>, vector<1x1x896xf32>
    %61 = vector.shape_cast %60 : vector<1x1x896xf32> to vector<1x896xf32>
    %c20 = arith.constant 20 : index
    %c0_67 = arith.constant 0 : index
    %62 = vector.load %arg6[%c20, %c0_67] : memref<25x896xf32, #tpu.memory_space<vmem>>, vector<1x896xf32>
    tpu.vector_store %arg6[%c20, %c0_67], %61 {strides = array<i32>} : memref<25x896xf32, #tpu.memory_space<vmem>>, vector<1x896xf32>,
    %c0_68 = arith.constant 0 : index
    %c0_69 = arith.constant 0 : index
    %c129 = arith.constant 129 : index
    %63 = vector.load %arg1[%c0_68, %c0_69, %c129] : memref<1x1x1028xf32, #tpu.memory_space<vmem>>, vector<1x1x896xf32>
    %64 = vector.shape_cast %63 : vector<1x1x896xf32> to vector<1x896xf32>
    %c21 = arith.constant 21 : index
    %c0_70 = arith.constant 0 : index
    %65 = vector.load %arg6[%c21, %c0_70] : memref<25x896xf32, #tpu.memory_space<vmem>>, vector<1x896xf32>
    tpu.vector_store %arg6[%c21, %c0_70], %64 {strides = array<i32>} : memref<25x896xf32, #tpu.memory_space<vmem>>, vector<1x896xf32>,
    %c0_71 = arith.constant 0 : index
    %c0_72 = arith.constant 0 : index
    %c130 = arith.constant 130 : index
    %66 = vector.load %arg1[%c0_71, %c0_72, %c130] : memref<1x1x1028xf32, #tpu.memory_space<vmem>>, vector<1x1x896xf32>
    %67 = vector.shape_cast %66 : vector<1x1x896xf32> to vector<1x896xf32>
    %c22 = arith.constant 22 : index
    %c0_73 = arith.constant 0 : index
    %68 = vector.load %arg6[%c22, %c0_73] : memref<25x896xf32, #tpu.memory_space<vmem>>, vector<1x896xf32>
    tpu.vector_store %arg6[%c22, %c0_73], %67 {strides = array<i32>} : memref<25x896xf32, #tpu.memory_space<vmem>>, vector<1x896xf32>,
    %c0_74 = arith.constant 0 : index
    %c0_75 = arith.constant 0 : index
    %c131 = arith.constant 131 : index
    %69 = vector.load %arg1[%c0_74, %c0_75, %c131] : memref<1x1x1028xf32, #tpu.memory_space<vmem>>, vector<1x1x896xf32>
    %70 = vector.shape_cast %69 : vector<1x1x896xf32> to vector<1x896xf32>
    %c23 = arith.constant 23 : index
    %c0_76 = arith.constant 0 : index
    %71 = vector.load %arg6[%c23, %c0_76] : memref<25x896xf32, #tpu.memory_space<vmem>>, vector<1x896xf32>
    tpu.vector_store %arg6[%c23, %c0_76], %70 {strides = array<i32>} : memref<25x896xf32, #tpu.memory_space<vmem>>, vector<1x896xf32>,
    %c0_77 = arith.constant 0 : index
    %c0_78 = arith.constant 0 : index
    %c132 = arith.constant 132 : index
    %72 = vector.load %arg1[%c0_77, %c0_78, %c132] : memref<1x1x1028xf32, #tpu.memory_space<vmem>>, vector<1x1x896xf32>
    %73 = vector.shape_cast %72 : vector<1x1x896xf32> to vector<1x896xf32>
    %c24 = arith.constant 24 : index
    %c0_79 = arith.constant 0 : index
    %74 = vector.load %arg6[%c24, %c0_79] : memref<25x896xf32, #tpu.memory_space<vmem>>, vector<1x896xf32>
    tpu.vector_store %arg6[%c24, %c0_79], %73 {strides = array<i32>} : memref<25x896xf32, #tpu.memory_space<vmem>>, vector<1x896xf32>,
    %c0_80 = arith.constant 0 : index
    %c0_81 = arith.constant 0 : index
    %75 = vector.load %arg2[%c0_80, %c0_81] : memref<16x25xf32, #tpu.memory_space<vmem>>, vector<16x25xf32>
    %c0_82 = arith.constant 0 : index
    %c0_83 = arith.constant 0 : index
    %76 = vector.load %arg6[%c0_82, %c0_83] : memref<25x896xf32, #tpu.memory_space<vmem>>, vector<25x896xf32>
    %cst = arith.constant dense<0.000000e+00> : vector<16x896xf32>
    %77 = tpu.matmul %75, %76, %cst {dimension_numbers = #tpu.dot_dimension_numbers<[1], [0], [0], [1], [0, 0, 1, 1], [], []>} : vector<16x25xf32>, vector<25x896xf32>, vector<16x896xf32> -> vector<16x896xf32>
    %c0_84 = arith.constant 0 : index
    %c0_85 = arith.constant 0 : index
    %78 = vector.load %arg3[%c0_84, %c0_85] : memref<16x1xf32, #tpu.memory_space<vmem>>, vector<16x1xf32>
    %79 = vector.broadcast %78 : vector<16x1xf32> to vector<16x896xf32>
    %80 = arith.addf %77, %79 : vector<16x896xf32>
    %cst_86 = arith.constant 0.000000e+00 : f32
    %81 = vector.broadcast %cst_86 : f32 to vector<16x896xf32>
    %82 = arith.maximumf %80, %81 : vector<16x896xf32>
    %c0_87 = arith.constant 0 : index
    %c0_88 = arith.constant 0 : index
    %83 = vector.load %arg7[%c0_87, %c0_88] : memref<16x896xf32, #tpu.memory_space<vmem>>, vector<16x896xf32>
    tpu.vector_store %arg7[%c0_87, %c0_88], %82 {strides = array<i32>} : memref<16x896xf32, #tpu.memory_space<vmem>>, vector<16x896xf32>,
    %c0_89 = arith.constant 0 : index
    %c0_90 = arith.constant 0 : index
    %84 = vector.load %arg7[%c0_89, %c0_90] : memref<16x896xf32, #tpu.memory_space<vmem>>, vector<16x863xf32>
    %c0_91 = arith.constant 0 : index
    %c1_92 = arith.constant 1 : index
    %85 = vector.load %arg7[%c0_91, %c1_92] : memref<16x896xf32, #tpu.memory_space<vmem>>, vector<16x863xf32>
    %86 = arith.maximumf %84, %85 : vector<16x863xf32>
    %c0_93 = arith.constant 0 : index
    %c32_94 = arith.constant 32 : index
    %87 = vector.load %arg7[%c0_93, %c32_94] : memref<16x896xf32, #tpu.memory_space<vmem>>, vector<16x863xf32>
    %c0_95 = arith.constant 0 : index
    %c33_96 = arith.constant 33 : index
    %88 = vector.load %arg7[%c0_95, %c33_96] : memref<16x896xf32, #tpu.memory_space<vmem>>, vector<16x863xf32>
    %89 = arith.maximumf %87, %88 : vector<16x863xf32>
    %90 = arith.maximumf %86, %89 : vector<16x863xf32>
    %c0_97 = arith.constant 0 : index
    %c0_98 = arith.constant 0 : index
    %91 = vector.load %arg4[%c0_97, %c0_98] : memref<863x196xf32, #tpu.memory_space<vmem>>, vector<863x196xf32>
    %cst_99 = arith.constant dense<0.000000e+00> : vector<16x196xf32>
    %92 = tpu.matmul %90, %91, %cst_99 {dimension_numbers = #tpu.dot_dimension_numbers<[1], [0], [0], [1], [0, 0, 1, 1], [], []>} : vector<16x863xf32>, vector<863x196xf32>, vector<16x196xf32> -> vector<16x196xf32>
    %c0_100 = arith.constant 0 : index
    %c0_101 = arith.constant 0 : index
    %c0_102 = arith.constant 0 : index
    %93 = vector.load %arg5[%c0_100, %c0_101, %c0_102] : memref<1x16x196xf32, #tpu.memory_space<vmem>>, vector<1x16x196xf32>
    %94 = vector.shape_cast %93 : vector<1x16x196xf32> to vector<16x196xf32>
    %95 = vector.shape_cast %92 : vector<16x196xf32> to vector<1x16x196xf32>
    tpu.vector_store %arg5[%c0_100, %c0_101, %c0_102], %95 {strides = array<i32>} : memref<1x16x196xf32, #tpu.memory_space<vmem>>, vector<1x16x196xf32>,
    return
  }
  func.func @transform_0(%arg0: i32) -> (i32, i32, i32) {
    %c0_i32 = arith.constant 0 : i32
    %c0_i32_0 = arith.constant 0 : i32
    %c0_i32_1 = arith.constant 0 : i32
    return %arg0, %c0_i32, %c0_i32_0 : i32, i32, i32
  }
  func.func @transform_1(%arg0: i32) -> (i32, i32) {
    %c0_i32 = arith.constant 0 : i32
    %c0_i32_0 = arith.constant 0 : i32
    %c0_i32_1 = arith.constant 0 : i32
    return %c0_i32, %c0_i32_0 : i32, i32
  }
  func.func @transform_2(%arg0: i32) -> (i32, i32) {
    %c0_i32 = arith.constant 0 : i32
    %c0_i32_0 = arith.constant 0 : i32
    %c0_i32_1 = arith.constant 0 : i32
    return %c0_i32, %c0_i32_0 : i32, i32
  }
  func.func @transform_3(%arg0: i32) -> (i32, i32) {
    %c0_i32 = arith.constant 0 : i32
    %c0_i32_0 = arith.constant 0 : i32
    %c0_i32_1 = arith.constant 0 : i32
    return %c0_i32, %c0_i32_0 : i32, i32
  }
  func.func @transform_4(%arg0: i32) -> (i32, i32, i32) {
    %c0_i32 = arith.constant 0 : i32
    %c0_i32_0 = arith.constant 0 : i32
    %c0_i32_1 = arith.constant 0 : i32
    return %arg0, %c0_i32, %c0_i32_0 : i32, i32, i32
  }
}

module attributes {stable_mosaic.version = 11 : i64} {
  func.func @conv_pool_kernel(%arg0: i32, %arg1: memref<1x16x328xf32, #tpu.memory_space<vmem>>, %arg2: memref<32x400xbf16, #tpu.memory_space<vmem>>, %arg3: memref<32x1xf32, #tpu.memory_space<vmem>>, %arg4: memref<233x49xf32, #tpu.memory_space<vmem>>, %arg5: memref<1x32x49xf32, #tpu.memory_space<vmem>>, %arg6: memref<400x252xbf16, #tpu.memory_space<vmem>>, %arg7: memref<32x252xf32, #tpu.memory_space<vmem>>) attributes {dimension_semantics = [#tpu.dimension_semantics<parallel>], iteration_bounds = array<i64: 2>, scalar_prefetch = 0 : i64, scratch_operands = 2 : i64, tpu.core_type = #tpu.core_type<tc>, window_params = [{transform_indices = @transform_0, window_bounds = array<i64: 1, 16, 328>}, {pipeline_mode = #tpu.pipeline_mode<synchronous>, transform_indices = @transform_1, window_bounds = array<i64: 32, 400>}, {pipeline_mode = #tpu.pipeline_mode<synchronous>, transform_indices = @transform_2, window_bounds = array<i64: 32, 1>}, {pipeline_mode = #tpu.pipeline_mode<synchronous>, transform_indices = @transform_3, window_bounds = array<i64: 233, 49>}, {transform_indices = @transform_4, window_bounds = array<i64: 1, 32, 49>}]} {
    %c0 = arith.constant 0 : index
    %c0_0 = arith.constant 0 : index
    %c0_1 = arith.constant 0 : index
    %0 = vector.load %arg1[%c0, %c0_0, %c0_1] : memref<1x16x328xf32, #tpu.memory_space<vmem>>, vector<1x16x252xf32>
    %1 = vector.shape_cast %0 : vector<1x16x252xf32> to vector<16x252xf32>
    %2 = arith.truncf %1 : vector<16x252xf32> to vector<16x252xbf16>
    %c0_2 = arith.constant 0 : index
    %c0_3 = arith.constant 0 : index
    %3 = vector.load %arg6[%c0_2, %c0_3] : memref<400x252xbf16, #tpu.memory_space<vmem>>, vector<16x252xbf16>
    tpu.vector_store %arg6[%c0_2, %c0_3], %2 {strides = array<i32>} : memref<400x252xbf16, #tpu.memory_space<vmem>>, vector<16x252xbf16>,
    %c0_4 = arith.constant 0 : index
    %c0_5 = arith.constant 0 : index
    %c1 = arith.constant 1 : index
    %4 = vector.load %arg1[%c0_4, %c0_5, %c1] : memref<1x16x328xf32, #tpu.memory_space<vmem>>, vector<1x16x252xf32>
    %5 = vector.shape_cast %4 : vector<1x16x252xf32> to vector<16x252xf32>
    %6 = arith.truncf %5 : vector<16x252xf32> to vector<16x252xbf16>
    %c16 = arith.constant 16 : index
    %c0_6 = arith.constant 0 : index
    %7 = vector.load %arg6[%c16, %c0_6] : memref<400x252xbf16, #tpu.memory_space<vmem>>, vector<16x252xbf16>
    tpu.vector_store %arg6[%c16, %c0_6], %6 {strides = array<i32>} : memref<400x252xbf16, #tpu.memory_space<vmem>>, vector<16x252xbf16>,
    %c0_7 = arith.constant 0 : index
    %c0_8 = arith.constant 0 : index
    %c2 = arith.constant 2 : index
    %8 = vector.load %arg1[%c0_7, %c0_8, %c2] : memref<1x16x328xf32, #tpu.memory_space<vmem>>, vector<1x16x252xf32>
    %9 = vector.shape_cast %8 : vector<1x16x252xf32> to vector<16x252xf32>
    %10 = arith.truncf %9 : vector<16x252xf32> to vector<16x252xbf16>
    %c32 = arith.constant 32 : index
    %c0_9 = arith.constant 0 : index
    %11 = vector.load %arg6[%c32, %c0_9] : memref<400x252xbf16, #tpu.memory_space<vmem>>, vector<16x252xbf16>
    tpu.vector_store %arg6[%c32, %c0_9], %10 {strides = array<i32>} : memref<400x252xbf16, #tpu.memory_space<vmem>>, vector<16x252xbf16>,
    %c0_10 = arith.constant 0 : index
    %c0_11 = arith.constant 0 : index
    %c3 = arith.constant 3 : index
    %12 = vector.load %arg1[%c0_10, %c0_11, %c3] : memref<1x16x328xf32, #tpu.memory_space<vmem>>, vector<1x16x252xf32>
    %13 = vector.shape_cast %12 : vector<1x16x252xf32> to vector<16x252xf32>
    %14 = arith.truncf %13 : vector<16x252xf32> to vector<16x252xbf16>
    %c48 = arith.constant 48 : index
    %c0_12 = arith.constant 0 : index
    %15 = vector.load %arg6[%c48, %c0_12] : memref<400x252xbf16, #tpu.memory_space<vmem>>, vector<16x252xbf16>
    tpu.vector_store %arg6[%c48, %c0_12], %14 {strides = array<i32>} : memref<400x252xbf16, #tpu.memory_space<vmem>>, vector<16x252xbf16>,
    %c0_13 = arith.constant 0 : index
    %c0_14 = arith.constant 0 : index
    %c4 = arith.constant 4 : index
    %16 = vector.load %arg1[%c0_13, %c0_14, %c4] : memref<1x16x328xf32, #tpu.memory_space<vmem>>, vector<1x16x252xf32>
    %17 = vector.shape_cast %16 : vector<1x16x252xf32> to vector<16x252xf32>
    %18 = arith.truncf %17 : vector<16x252xf32> to vector<16x252xbf16>
    %c64 = arith.constant 64 : index
    %c0_15 = arith.constant 0 : index
    %19 = vector.load %arg6[%c64, %c0_15] : memref<400x252xbf16, #tpu.memory_space<vmem>>, vector<16x252xbf16>
    tpu.vector_store %arg6[%c64, %c0_15], %18 {strides = array<i32>} : memref<400x252xbf16, #tpu.memory_space<vmem>>, vector<16x252xbf16>,
    %c0_16 = arith.constant 0 : index
    %c0_17 = arith.constant 0 : index
    %c18 = arith.constant 18 : index
    %20 = vector.load %arg1[%c0_16, %c0_17, %c18] : memref<1x16x328xf32, #tpu.memory_space<vmem>>, vector<1x16x252xf32>
    %21 = vector.shape_cast %20 : vector<1x16x252xf32> to vector<16x252xf32>
    %22 = arith.truncf %21 : vector<16x252xf32> to vector<16x252xbf16>
    %c80 = arith.constant 80 : index
    %c0_18 = arith.constant 0 : index
    %23 = vector.load %arg6[%c80, %c0_18] : memref<400x252xbf16, #tpu.memory_space<vmem>>, vector<16x252xbf16>
    tpu.vector_store %arg6[%c80, %c0_18], %22 {strides = array<i32>} : memref<400x252xbf16, #tpu.memory_space<vmem>>, vector<16x252xbf16>,
    %c0_19 = arith.constant 0 : index
    %c0_20 = arith.constant 0 : index
    %c19 = arith.constant 19 : index
    %24 = vector.load %arg1[%c0_19, %c0_20, %c19] : memref<1x16x328xf32, #tpu.memory_space<vmem>>, vector<1x16x252xf32>
    %25 = vector.shape_cast %24 : vector<1x16x252xf32> to vector<16x252xf32>
    %26 = arith.truncf %25 : vector<16x252xf32> to vector<16x252xbf16>
    %c96 = arith.constant 96 : index
    %c0_21 = arith.constant 0 : index
    %27 = vector.load %arg6[%c96, %c0_21] : memref<400x252xbf16, #tpu.memory_space<vmem>>, vector<16x252xbf16>
    tpu.vector_store %arg6[%c96, %c0_21], %26 {strides = array<i32>} : memref<400x252xbf16, #tpu.memory_space<vmem>>, vector<16x252xbf16>,
    %c0_22 = arith.constant 0 : index
    %c0_23 = arith.constant 0 : index
    %c20 = arith.constant 20 : index
    %28 = vector.load %arg1[%c0_22, %c0_23, %c20] : memref<1x16x328xf32, #tpu.memory_space<vmem>>, vector<1x16x252xf32>
    %29 = vector.shape_cast %28 : vector<1x16x252xf32> to vector<16x252xf32>
    %30 = arith.truncf %29 : vector<16x252xf32> to vector<16x252xbf16>
    %c112 = arith.constant 112 : index
    %c0_24 = arith.constant 0 : index
    %31 = vector.load %arg6[%c112, %c0_24] : memref<400x252xbf16, #tpu.memory_space<vmem>>, vector<16x252xbf16>
    tpu.vector_store %arg6[%c112, %c0_24], %30 {strides = array<i32>} : memref<400x252xbf16, #tpu.memory_space<vmem>>, vector<16x252xbf16>,
    %c0_25 = arith.constant 0 : index
    %c0_26 = arith.constant 0 : index
    %c21 = arith.constant 21 : index
    %32 = vector.load %arg1[%c0_25, %c0_26, %c21] : memref<1x16x328xf32, #tpu.memory_space<vmem>>, vector<1x16x252xf32>
    %33 = vector.shape_cast %32 : vector<1x16x252xf32> to vector<16x252xf32>
    %34 = arith.truncf %33 : vector<16x252xf32> to vector<16x252xbf16>
    %c128 = arith.constant 128 : index
    %c0_27 = arith.constant 0 : index
    %35 = vector.load %arg6[%c128, %c0_27] : memref<400x252xbf16, #tpu.memory_space<vmem>>, vector<16x252xbf16>
    tpu.vector_store %arg6[%c128, %c0_27], %34 {strides = array<i32>} : memref<400x252xbf16, #tpu.memory_space<vmem>>, vector<16x252xbf16>,
    %c0_28 = arith.constant 0 : index
    %c0_29 = arith.constant 0 : index
    %c22 = arith.constant 22 : index
    %36 = vector.load %arg1[%c0_28, %c0_29, %c22] : memref<1x16x328xf32, #tpu.memory_space<vmem>>, vector<1x16x252xf32>
    %37 = vector.shape_cast %36 : vector<1x16x252xf32> to vector<16x252xf32>
    %38 = arith.truncf %37 : vector<16x252xf32> to vector<16x252xbf16>
    %c144 = arith.constant 144 : index
    %c0_30 = arith.constant 0 : index
    %39 = vector.load %arg6[%c144, %c0_30] : memref<400x252xbf16, #tpu.memory_space<vmem>>, vector<16x252xbf16>
    tpu.vector_store %arg6[%c144, %c0_30], %38 {strides = array<i32>} : memref<400x252xbf16, #tpu.memory_space<vmem>>, vector<16x252xbf16>,
    %c0_31 = arith.constant 0 : index
    %c0_32 = arith.constant 0 : index
    %c36 = arith.constant 36 : index
    %40 = vector.load %arg1[%c0_31, %c0_32, %c36] : memref<1x16x328xf32, #tpu.memory_space<vmem>>, vector<1x16x252xf32>
    %41 = vector.shape_cast %40 : vector<1x16x252xf32> to vector<16x252xf32>
    %42 = arith.truncf %41 : vector<16x252xf32> to vector<16x252xbf16>
    %c160 = arith.constant 160 : index
    %c0_33 = arith.constant 0 : index
    %43 = vector.load %arg6[%c160, %c0_33] : memref<400x252xbf16, #tpu.memory_space<vmem>>, vector<16x252xbf16>
    tpu.vector_store %arg6[%c160, %c0_33], %42 {strides = array<i32>} : memref<400x252xbf16, #tpu.memory_space<vmem>>, vector<16x252xbf16>,
    %c0_34 = arith.constant 0 : index
    %c0_35 = arith.constant 0 : index
    %c37 = arith.constant 37 : index
    %44 = vector.load %arg1[%c0_34, %c0_35, %c37] : memref<1x16x328xf32, #tpu.memory_space<vmem>>, vector<1x16x252xf32>
    %45 = vector.shape_cast %44 : vector<1x16x252xf32> to vector<16x252xf32>
    %46 = arith.truncf %45 : vector<16x252xf32> to vector<16x252xbf16>
    %c176 = arith.constant 176 : index
    %c0_36 = arith.constant 0 : index
    %47 = vector.load %arg6[%c176, %c0_36] : memref<400x252xbf16, #tpu.memory_space<vmem>>, vector<16x252xbf16>
    tpu.vector_store %arg6[%c176, %c0_36], %46 {strides = array<i32>} : memref<400x252xbf16, #tpu.memory_space<vmem>>, vector<16x252xbf16>,
    %c0_37 = arith.constant 0 : index
    %c0_38 = arith.constant 0 : index
    %c38 = arith.constant 38 : index
    %48 = vector.load %arg1[%c0_37, %c0_38, %c38] : memref<1x16x328xf32, #tpu.memory_space<vmem>>, vector<1x16x252xf32>
    %49 = vector.shape_cast %48 : vector<1x16x252xf32> to vector<16x252xf32>
    %50 = arith.truncf %49 : vector<16x252xf32> to vector<16x252xbf16>
    %c192 = arith.constant 192 : index
    %c0_39 = arith.constant 0 : index
    %51 = vector.load %arg6[%c192, %c0_39] : memref<400x252xbf16, #tpu.memory_space<vmem>>, vector<16x252xbf16>
    tpu.vector_store %arg6[%c192, %c0_39], %50 {strides = array<i32>} : memref<400x252xbf16, #tpu.memory_space<vmem>>, vector<16x252xbf16>,
    %c0_40 = arith.constant 0 : index
    %c0_41 = arith.constant 0 : index
    %c39 = arith.constant 39 : index
    %52 = vector.load %arg1[%c0_40, %c0_41, %c39] : memref<1x16x328xf32, #tpu.memory_space<vmem>>, vector<1x16x252xf32>
    %53 = vector.shape_cast %52 : vector<1x16x252xf32> to vector<16x252xf32>
    %54 = arith.truncf %53 : vector<16x252xf32> to vector<16x252xbf16>
    %c208 = arith.constant 208 : index
    %c0_42 = arith.constant 0 : index
    %55 = vector.load %arg6[%c208, %c0_42] : memref<400x252xbf16, #tpu.memory_space<vmem>>, vector<16x252xbf16>
    tpu.vector_store %arg6[%c208, %c0_42], %54 {strides = array<i32>} : memref<400x252xbf16, #tpu.memory_space<vmem>>, vector<16x252xbf16>,
    %c0_43 = arith.constant 0 : index
    %c0_44 = arith.constant 0 : index
    %c40 = arith.constant 40 : index
    %56 = vector.load %arg1[%c0_43, %c0_44, %c40] : memref<1x16x328xf32, #tpu.memory_space<vmem>>, vector<1x16x252xf32>
    %57 = vector.shape_cast %56 : vector<1x16x252xf32> to vector<16x252xf32>
    %58 = arith.truncf %57 : vector<16x252xf32> to vector<16x252xbf16>
    %c224 = arith.constant 224 : index
    %c0_45 = arith.constant 0 : index
    %59 = vector.load %arg6[%c224, %c0_45] : memref<400x252xbf16, #tpu.memory_space<vmem>>, vector<16x252xbf16>
    tpu.vector_store %arg6[%c224, %c0_45], %58 {strides = array<i32>} : memref<400x252xbf16, #tpu.memory_space<vmem>>, vector<16x252xbf16>,
    %c0_46 = arith.constant 0 : index
    %c0_47 = arith.constant 0 : index
    %c54 = arith.constant 54 : index
    %60 = vector.load %arg1[%c0_46, %c0_47, %c54] : memref<1x16x328xf32, #tpu.memory_space<vmem>>, vector<1x16x252xf32>
    %61 = vector.shape_cast %60 : vector<1x16x252xf32> to vector<16x252xf32>
    %62 = arith.truncf %61 : vector<16x252xf32> to vector<16x252xbf16>
    %c240 = arith.constant 240 : index
    %c0_48 = arith.constant 0 : index
    %63 = vector.load %arg6[%c240, %c0_48] : memref<400x252xbf16, #tpu.memory_space<vmem>>, vector<16x252xbf16>
    tpu.vector_store %arg6[%c240, %c0_48], %62 {strides = array<i32>} : memref<400x252xbf16, #tpu.memory_space<vmem>>, vector<16x252xbf16>,
    %c0_49 = arith.constant 0 : index
    %c0_50 = arith.constant 0 : index
    %c55 = arith.constant 55 : index
    %64 = vector.load %arg1[%c0_49, %c0_50, %c55] : memref<1x16x328xf32, #tpu.memory_space<vmem>>, vector<1x16x252xf32>
    %65 = vector.shape_cast %64 : vector<1x16x252xf32> to vector<16x252xf32>
    %66 = arith.truncf %65 : vector<16x252xf32> to vector<16x252xbf16>
    %c256 = arith.constant 256 : index
    %c0_51 = arith.constant 0 : index
    %67 = vector.load %arg6[%c256, %c0_51] : memref<400x252xbf16, #tpu.memory_space<vmem>>, vector<16x252xbf16>
    tpu.vector_store %arg6[%c256, %c0_51], %66 {strides = array<i32>} : memref<400x252xbf16, #tpu.memory_space<vmem>>, vector<16x252xbf16>,
    %c0_52 = arith.constant 0 : index
    %c0_53 = arith.constant 0 : index
    %c56 = arith.constant 56 : index
    %68 = vector.load %arg1[%c0_52, %c0_53, %c56] : memref<1x16x328xf32, #tpu.memory_space<vmem>>, vector<1x16x252xf32>
    %69 = vector.shape_cast %68 : vector<1x16x252xf32> to vector<16x252xf32>
    %70 = arith.truncf %69 : vector<16x252xf32> to vector<16x252xbf16>
    %c272 = arith.constant 272 : index
    %c0_54 = arith.constant 0 : index
    %71 = vector.load %arg6[%c272, %c0_54] : memref<400x252xbf16, #tpu.memory_space<vmem>>, vector<16x252xbf16>
    tpu.vector_store %arg6[%c272, %c0_54], %70 {strides = array<i32>} : memref<400x252xbf16, #tpu.memory_space<vmem>>, vector<16x252xbf16>,
    %c0_55 = arith.constant 0 : index
    %c0_56 = arith.constant 0 : index
    %c57 = arith.constant 57 : index
    %72 = vector.load %arg1[%c0_55, %c0_56, %c57] : memref<1x16x328xf32, #tpu.memory_space<vmem>>, vector<1x16x252xf32>
    %73 = vector.shape_cast %72 : vector<1x16x252xf32> to vector<16x252xf32>
    %74 = arith.truncf %73 : vector<16x252xf32> to vector<16x252xbf16>
    %c288 = arith.constant 288 : index
    %c0_57 = arith.constant 0 : index
    %75 = vector.load %arg6[%c288, %c0_57] : memref<400x252xbf16, #tpu.memory_space<vmem>>, vector<16x252xbf16>
    tpu.vector_store %arg6[%c288, %c0_57], %74 {strides = array<i32>} : memref<400x252xbf16, #tpu.memory_space<vmem>>, vector<16x252xbf16>,
    %c0_58 = arith.constant 0 : index
    %c0_59 = arith.constant 0 : index
    %c58 = arith.constant 58 : index
    %76 = vector.load %arg1[%c0_58, %c0_59, %c58] : memref<1x16x328xf32, #tpu.memory_space<vmem>>, vector<1x16x252xf32>
    %77 = vector.shape_cast %76 : vector<1x16x252xf32> to vector<16x252xf32>
    %78 = arith.truncf %77 : vector<16x252xf32> to vector<16x252xbf16>
    %c304 = arith.constant 304 : index
    %c0_60 = arith.constant 0 : index
    %79 = vector.load %arg6[%c304, %c0_60] : memref<400x252xbf16, #tpu.memory_space<vmem>>, vector<16x252xbf16>
    tpu.vector_store %arg6[%c304, %c0_60], %78 {strides = array<i32>} : memref<400x252xbf16, #tpu.memory_space<vmem>>, vector<16x252xbf16>,
    %c0_61 = arith.constant 0 : index
    %c0_62 = arith.constant 0 : index
    %c72 = arith.constant 72 : index
    %80 = vector.load %arg1[%c0_61, %c0_62, %c72] : memref<1x16x328xf32, #tpu.memory_space<vmem>>, vector<1x16x252xf32>
    %81 = vector.shape_cast %80 : vector<1x16x252xf32> to vector<16x252xf32>
    %82 = arith.truncf %81 : vector<16x252xf32> to vector<16x252xbf16>
    %c320 = arith.constant 320 : index
    %c0_63 = arith.constant 0 : index
    %83 = vector.load %arg6[%c320, %c0_63] : memref<400x252xbf16, #tpu.memory_space<vmem>>, vector<16x252xbf16>
    tpu.vector_store %arg6[%c320, %c0_63], %82 {strides = array<i32>} : memref<400x252xbf16, #tpu.memory_space<vmem>>, vector<16x252xbf16>,
    %c0_64 = arith.constant 0 : index
    %c0_65 = arith.constant 0 : index
    %c73 = arith.constant 73 : index
    %84 = vector.load %arg1[%c0_64, %c0_65, %c73] : memref<1x16x328xf32, #tpu.memory_space<vmem>>, vector<1x16x252xf32>
    %85 = vector.shape_cast %84 : vector<1x16x252xf32> to vector<16x252xf32>
    %86 = arith.truncf %85 : vector<16x252xf32> to vector<16x252xbf16>
    %c336 = arith.constant 336 : index
    %c0_66 = arith.constant 0 : index
    %87 = vector.load %arg6[%c336, %c0_66] : memref<400x252xbf16, #tpu.memory_space<vmem>>, vector<16x252xbf16>
    tpu.vector_store %arg6[%c336, %c0_66], %86 {strides = array<i32>} : memref<400x252xbf16, #tpu.memory_space<vmem>>, vector<16x252xbf16>,
    %c0_67 = arith.constant 0 : index
    %c0_68 = arith.constant 0 : index
    %c74 = arith.constant 74 : index
    %88 = vector.load %arg1[%c0_67, %c0_68, %c74] : memref<1x16x328xf32, #tpu.memory_space<vmem>>, vector<1x16x252xf32>
    %89 = vector.shape_cast %88 : vector<1x16x252xf32> to vector<16x252xf32>
    %90 = arith.truncf %89 : vector<16x252xf32> to vector<16x252xbf16>
    %c352 = arith.constant 352 : index
    %c0_69 = arith.constant 0 : index
    %91 = vector.load %arg6[%c352, %c0_69] : memref<400x252xbf16, #tpu.memory_space<vmem>>, vector<16x252xbf16>
    tpu.vector_store %arg6[%c352, %c0_69], %90 {strides = array<i32>} : memref<400x252xbf16, #tpu.memory_space<vmem>>, vector<16x252xbf16>,
    %c0_70 = arith.constant 0 : index
    %c0_71 = arith.constant 0 : index
    %c75 = arith.constant 75 : index
    %92 = vector.load %arg1[%c0_70, %c0_71, %c75] : memref<1x16x328xf32, #tpu.memory_space<vmem>>, vector<1x16x252xf32>
    %93 = vector.shape_cast %92 : vector<1x16x252xf32> to vector<16x252xf32>
    %94 = arith.truncf %93 : vector<16x252xf32> to vector<16x252xbf16>
    %c368 = arith.constant 368 : index
    %c0_72 = arith.constant 0 : index
    %95 = vector.load %arg6[%c368, %c0_72] : memref<400x252xbf16, #tpu.memory_space<vmem>>, vector<16x252xbf16>
    tpu.vector_store %arg6[%c368, %c0_72], %94 {strides = array<i32>} : memref<400x252xbf16, #tpu.memory_space<vmem>>, vector<16x252xbf16>,
    %c0_73 = arith.constant 0 : index
    %c0_74 = arith.constant 0 : index
    %c76 = arith.constant 76 : index
    %96 = vector.load %arg1[%c0_73, %c0_74, %c76] : memref<1x16x328xf32, #tpu.memory_space<vmem>>, vector<1x16x252xf32>
    %97 = vector.shape_cast %96 : vector<1x16x252xf32> to vector<16x252xf32>
    %98 = arith.truncf %97 : vector<16x252xf32> to vector<16x252xbf16>
    %c384 = arith.constant 384 : index
    %c0_75 = arith.constant 0 : index
    %99 = vector.load %arg6[%c384, %c0_75] : memref<400x252xbf16, #tpu.memory_space<vmem>>, vector<16x252xbf16>
    tpu.vector_store %arg6[%c384, %c0_75], %98 {strides = array<i32>} : memref<400x252xbf16, #tpu.memory_space<vmem>>, vector<16x252xbf16>,
    %c0_76 = arith.constant 0 : index
    %c0_77 = arith.constant 0 : index
    %100 = vector.load %arg2[%c0_76, %c0_77] : memref<32x400xbf16, #tpu.memory_space<vmem>>, vector<32x400xbf16>
    %c0_78 = arith.constant 0 : index
    %c0_79 = arith.constant 0 : index
    %101 = vector.load %arg6[%c0_78, %c0_79] : memref<400x252xbf16, #tpu.memory_space<vmem>>, vector<400x252xbf16>
    %cst = arith.constant dense<0.000000e+00> : vector<32x252xf32>
    %102 = tpu.matmul %100, %101, %cst {dimension_numbers = #tpu.dot_dimension_numbers<[1], [0], [0], [1], [0, 0, 1, 1], [], []>} : vector<32x400xbf16>, vector<400x252xbf16>, vector<32x252xf32> -> vector<32x252xf32>
    %c0_80 = arith.constant 0 : index
    %c0_81 = arith.constant 0 : index
    %103 = vector.load %arg3[%c0_80, %c0_81] : memref<32x1xf32, #tpu.memory_space<vmem>>, vector<32x1xf32>
    %104 = vector.broadcast %103 : vector<32x1xf32> to vector<32x252xf32>
    %105 = arith.addf %102, %104 : vector<32x252xf32>
    %cst_82 = arith.constant 0.000000e+00 : f32
    %106 = vector.broadcast %cst_82 : f32 to vector<32x252xf32>
    %107 = arith.maximumf %105, %106 : vector<32x252xf32>
    %c0_83 = arith.constant 0 : index
    %c0_84 = arith.constant 0 : index
    %108 = vector.load %arg7[%c0_83, %c0_84] : memref<32x252xf32, #tpu.memory_space<vmem>>, vector<32x252xf32>
    tpu.vector_store %arg7[%c0_83, %c0_84], %107 {strides = array<i32>} : memref<32x252xf32, #tpu.memory_space<vmem>>, vector<32x252xf32>,
    %c0_85 = arith.constant 0 : index
    %c0_86 = arith.constant 0 : index
    %109 = vector.load %arg7[%c0_85, %c0_86] : memref<32x252xf32, #tpu.memory_space<vmem>>, vector<32x233xf32>
    %c0_87 = arith.constant 0 : index
    %c1_88 = arith.constant 1 : index
    %110 = vector.load %arg7[%c0_87, %c1_88] : memref<32x252xf32, #tpu.memory_space<vmem>>, vector<32x233xf32>
    %111 = arith.maximumf %109, %110 : vector<32x233xf32>
    %c0_89 = arith.constant 0 : index
    %c18_90 = arith.constant 18 : index
    %112 = vector.load %arg7[%c0_89, %c18_90] : memref<32x252xf32, #tpu.memory_space<vmem>>, vector<32x233xf32>
    %c0_91 = arith.constant 0 : index
    %c19_92 = arith.constant 19 : index
    %113 = vector.load %arg7[%c0_91, %c19_92] : memref<32x252xf32, #tpu.memory_space<vmem>>, vector<32x233xf32>
    %114 = arith.maximumf %112, %113 : vector<32x233xf32>
    %115 = arith.maximumf %111, %114 : vector<32x233xf32>
    %c0_93 = arith.constant 0 : index
    %c0_94 = arith.constant 0 : index
    %116 = vector.load %arg4[%c0_93, %c0_94] : memref<233x49xf32, #tpu.memory_space<vmem>>, vector<233x49xf32>
    %cst_95 = arith.constant dense<0.000000e+00> : vector<32x49xf32>
    %117 = tpu.matmul %115, %116, %cst_95 {dimension_numbers = #tpu.dot_dimension_numbers<[1], [0], [0], [1], [0, 0, 1, 1], [], []>} : vector<32x233xf32>, vector<233x49xf32>, vector<32x49xf32> -> vector<32x49xf32>
    %c0_96 = arith.constant 0 : index
    %c0_97 = arith.constant 0 : index
    %c0_98 = arith.constant 0 : index
    %118 = vector.load %arg5[%c0_96, %c0_97, %c0_98] : memref<1x32x49xf32, #tpu.memory_space<vmem>>, vector<1x32x49xf32>
    %119 = vector.shape_cast %118 : vector<1x32x49xf32> to vector<32x49xf32>
    %120 = vector.shape_cast %117 : vector<32x49xf32> to vector<1x32x49xf32>
    tpu.vector_store %arg5[%c0_96, %c0_97, %c0_98], %120 {strides = array<i32>} : memref<1x32x49xf32, #tpu.memory_space<vmem>>, vector<1x32x49xf32>,
    return
  }
  func.func @transform_0(%arg0: i32) -> (i32, i32, i32) {
    %c0_i32 = arith.constant 0 : i32
    %c0_i32_0 = arith.constant 0 : i32
    %c0_i32_1 = arith.constant 0 : i32
    return %arg0, %c0_i32, %c0_i32_0 : i32, i32, i32
  }
  func.func @transform_1(%arg0: i32) -> (i32, i32) {
    %c0_i32 = arith.constant 0 : i32
    %c0_i32_0 = arith.constant 0 : i32
    %c0_i32_1 = arith.constant 0 : i32
    return %c0_i32, %c0_i32_0 : i32, i32
  }
  func.func @transform_2(%arg0: i32) -> (i32, i32) {
    %c0_i32 = arith.constant 0 : i32
    %c0_i32_0 = arith.constant 0 : i32
    %c0_i32_1 = arith.constant 0 : i32
    return %c0_i32, %c0_i32_0 : i32, i32
  }
  func.func @transform_3(%arg0: i32) -> (i32, i32) {
    %c0_i32 = arith.constant 0 : i32
    %c0_i32_0 = arith.constant 0 : i32
    %c0_i32_1 = arith.constant 0 : i32
    return %c0_i32, %c0_i32_0 : i32, i32
  }
  func.func @transform_4(%arg0: i32) -> (i32, i32, i32) {
    %c0_i32 = arith.constant 0 : i32
    %c0_i32_0 = arith.constant 0 : i32
    %c0_i32_1 = arith.constant 0 : i32
    return %arg0, %c0_i32, %c0_i32_0 : i32, i32, i32
  }
}

module attributes {stable_mosaic.version = 11 : i64} {
  func.func @fc_head_kernel(%arg0: i32, %arg1: memref<2x1568xf32, #tpu.memory_space<vmem>>, %arg2: memref<1568x128xf32, #tpu.memory_space<vmem>>, %arg3: memref<1x128xf32, #tpu.memory_space<vmem>>, %arg4: memref<128x32xf32, #tpu.memory_space<vmem>>, %arg5: memref<1x32xf32, #tpu.memory_space<vmem>>, %arg6: memref<32x10xf32, #tpu.memory_space<vmem>>, %arg7: memref<1x10xf32, #tpu.memory_space<vmem>>, %arg8: memref<2x10xf32, #tpu.memory_space<vmem>>) attributes {dimension_semantics = [#tpu.dimension_semantics<parallel>], iteration_bounds = array<i64: 1>, scalar_prefetch = 0 : i64, scratch_operands = 0 : i64, tpu.core_type = #tpu.core_type<tc>, window_params = [{transform_indices = @transform_0, window_bounds = array<i64: 2, 1568>}, {pipeline_mode = #tpu.pipeline_mode<synchronous>, transform_indices = @transform_1, window_bounds = array<i64: 1568, 128>}, {pipeline_mode = #tpu.pipeline_mode<synchronous>, transform_indices = @transform_2, window_bounds = array<i64: 1, 128>}, {pipeline_mode = #tpu.pipeline_mode<synchronous>, transform_indices = @transform_3, window_bounds = array<i64: 128, 32>}, {pipeline_mode = #tpu.pipeline_mode<synchronous>, transform_indices = @transform_4, window_bounds = array<i64: 1, 32>}, {pipeline_mode = #tpu.pipeline_mode<synchronous>, transform_indices = @transform_5, window_bounds = array<i64: 32, 10>}, {pipeline_mode = #tpu.pipeline_mode<synchronous>, transform_indices = @transform_6, window_bounds = array<i64: 1, 10>}, {transform_indices = @transform_7, window_bounds = array<i64: 2, 10>}]} {
    %c0 = arith.constant 0 : index
    %c0_0 = arith.constant 0 : index
    %0 = vector.load %arg1[%c0, %c0_0] : memref<2x1568xf32, #tpu.memory_space<vmem>>, vector<2x1568xf32>
    %c0_1 = arith.constant 0 : index
    %c0_2 = arith.constant 0 : index
    %1 = vector.load %arg2[%c0_1, %c0_2] : memref<1568x128xf32, #tpu.memory_space<vmem>>, vector<1568x128xf32>
    %cst = arith.constant dense<0.000000e+00> : vector<2x128xf32>
    %2 = tpu.matmul %0, %1, %cst {dimension_numbers = #tpu.dot_dimension_numbers<[1], [0], [0], [1], [0, 0, 1, 1], [], []>} : vector<2x1568xf32>, vector<1568x128xf32>, vector<2x128xf32> -> vector<2x128xf32>
    %c0_3 = arith.constant 0 : index
    %c0_4 = arith.constant 0 : index
    %3 = vector.load %arg3[%c0_3, %c0_4] : memref<1x128xf32, #tpu.memory_space<vmem>>, vector<1x128xf32>
    %4 = vector.broadcast %3 : vector<1x128xf32> to vector<2x128xf32>
    %5 = arith.addf %2, %4 : vector<2x128xf32>
    %cst_5 = arith.constant 0.000000e+00 : f32
    %6 = vector.broadcast %cst_5 : f32 to vector<2x128xf32>
    %7 = arith.maximumf %5, %6 : vector<2x128xf32>
    %c0_6 = arith.constant 0 : index
    %c0_7 = arith.constant 0 : index
    %8 = vector.load %arg4[%c0_6, %c0_7] : memref<128x32xf32, #tpu.memory_space<vmem>>, vector<128x32xf32>
    %cst_8 = arith.constant dense<0.000000e+00> : vector<2x32xf32>
    %9 = tpu.matmul %7, %8, %cst_8 {dimension_numbers = #tpu.dot_dimension_numbers<[1], [0], [0], [1], [0, 0, 1, 1], [], []>} : vector<2x128xf32>, vector<128x32xf32>, vector<2x32xf32> -> vector<2x32xf32>
    %c0_9 = arith.constant 0 : index
    %c0_10 = arith.constant 0 : index
    %10 = vector.load %arg5[%c0_9, %c0_10] : memref<1x32xf32, #tpu.memory_space<vmem>>, vector<1x32xf32>
    %11 = vector.broadcast %10 : vector<1x32xf32> to vector<2x32xf32>
    %12 = arith.addf %9, %11 : vector<2x32xf32>
    %cst_11 = arith.constant 0.000000e+00 : f32
    %13 = vector.broadcast %cst_11 : f32 to vector<2x32xf32>
    %14 = arith.maximumf %12, %13 : vector<2x32xf32>
    %c0_12 = arith.constant 0 : index
    %c0_13 = arith.constant 0 : index
    %15 = vector.load %arg6[%c0_12, %c0_13] : memref<32x10xf32, #tpu.memory_space<vmem>>, vector<32x10xf32>
    %cst_14 = arith.constant dense<0.000000e+00> : vector<2x10xf32>
    %16 = tpu.matmul %14, %15, %cst_14 {dimension_numbers = #tpu.dot_dimension_numbers<[1], [0], [0], [1], [0, 0, 1, 1], [], []>} : vector<2x32xf32>, vector<32x10xf32>, vector<2x10xf32> -> vector<2x10xf32>
    %c0_15 = arith.constant 0 : index
    %c0_16 = arith.constant 0 : index
    %17 = vector.load %arg7[%c0_15, %c0_16] : memref<1x10xf32, #tpu.memory_space<vmem>>, vector<1x10xf32>
    %18 = vector.broadcast %17 : vector<1x10xf32> to vector<2x10xf32>
    %19 = arith.addf %16, %18 : vector<2x10xf32>
    %cst_17 = arith.constant dense<0xFF800000> : vector<2xf32>
    %20 = vector.multi_reduction <maximumf>, %19, %cst_17 [1] : vector<2x10xf32> to vector<2xf32>
    %21 = vector.shape_cast %20 : vector<2xf32> to vector<2x1xf32>
    %22 = vector.broadcast %21 : vector<2x1xf32> to vector<2x10xf32>
    %23 = arith.subf %19, %22 : vector<2x10xf32>
    %24 = math.exp %23 : vector<2x10xf32>
    %cst_18 = arith.constant dense<0.000000e+00> : vector<2xf32>
    %25 = vector.multi_reduction <add>, %24, %cst_18 [1] : vector<2x10xf32> to vector<2xf32>
    %26 = vector.shape_cast %25 : vector<2xf32> to vector<2x1xf32>
    %27 = math.log %26 : vector<2x1xf32>
    %28 = arith.addf %27, %21 : vector<2x1xf32>
    %29 = vector.broadcast %28 : vector<2x1xf32> to vector<2x10xf32>
    %30 = arith.subf %19, %29 : vector<2x10xf32>
    %c0_19 = arith.constant 0 : index
    %c0_20 = arith.constant 0 : index
    %31 = vector.load %arg8[%c0_19, %c0_20] : memref<2x10xf32, #tpu.memory_space<vmem>>, vector<2x10xf32>
    tpu.vector_store %arg8[%c0_19, %c0_20], %30 {strides = array<i32>} : memref<2x10xf32, #tpu.memory_space<vmem>>, vector<2x10xf32>,
    return
  }
  func.func @transform_0(%arg0: i32) -> (i32, i32) {
    %c0_i32 = arith.constant 0 : i32
    %c0_i32_0 = arith.constant 0 : i32
    return %arg0, %c0_i32 : i32, i32
  }
  func.func @transform_1(%arg0: i32) -> (i32, i32) {
    %c0_i32 = arith.constant 0 : i32
    %c0_i32_0 = arith.constant 0 : i32
    %c0_i32_1 = arith.constant 0 : i32
    return %c0_i32, %c0_i32_0 : i32, i32
  }
  func.func @transform_2(%arg0: i32) -> (i32, i32) {
    %c0_i32 = arith.constant 0 : i32
    %c0_i32_0 = arith.constant 0 : i32
    %c0_i32_1 = arith.constant 0 : i32
    return %c0_i32, %c0_i32_0 : i32, i32
  }
  func.func @transform_3(%arg0: i32) -> (i32, i32) {
    %c0_i32 = arith.constant 0 : i32
    %c0_i32_0 = arith.constant 0 : i32
    %c0_i32_1 = arith.constant 0 : i32
    return %c0_i32, %c0_i32_0 : i32, i32
  }
  func.func @transform_4(%arg0: i32) -> (i32, i32) {
    %c0_i32 = arith.constant 0 : i32
    %c0_i32_0 = arith.constant 0 : i32
    %c0_i32_1 = arith.constant 0 : i32
    return %c0_i32, %c0_i32_0 : i32, i32
  }
  func.func @transform_5(%arg0: i32) -> (i32, i32) {
    %c0_i32 = arith.constant 0 : i32
    %c0_i32_0 = arith.constant 0 : i32
    %c0_i32_1 = arith.constant 0 : i32
    return %c0_i32, %c0_i32_0 : i32, i32
  }
  func.func @transform_6(%arg0: i32) -> (i32, i32) {
    %c0_i32 = arith.constant 0 : i32
    %c0_i32_0 = arith.constant 0 : i32
    %c0_i32_1 = arith.constant 0 : i32
    return %c0_i32, %c0_i32_0 : i32, i32
  }
  func.func @transform_7(%arg0: i32) -> (i32, i32) {
    %c0_i32 = arith.constant 0 : i32
    %c0_i32_0 = arith.constant 0 : i32
    return %arg0, %c0_i32 : i32, i32
  }
}

</mosaic_0001>

<bundles_post_ra>
// kernel: convnet_forward.3
= control target key start
LH: loop header
LB: loop body
LE: loop exit
PB: predicated region body
PF: predicated region fallthrough
CT: control target
= control target key end

     0   :  { %s2089_s15 = smov 0   ;;  %s3177_s0 = inlined_call_operand.vmem [shape: f32[2,1,1028], index: 0, kind: input, shape index: {}]   ;;  %s3178_s1 = inlined_call_operand.vmem [shape: f32[16,25], index: 1, kind: input, shape index: {}]   ;;  %s3179_s2 = inlined_call_operand.vmem [shape: f32[16,1], index: 2, kind: input, shape index: {}]   ;;  %s3180_s3 = inlined_call_operand.vmem [shape: f32[863,196], index: 3, kind: input, shape index: {}]   ;;  %s3181_s4 = inlined_call_operand.vmem [shape: f32[2,16,196], index: 4, kind: output, shape index: {}]  }
   0x1 LB: > { %s1635_s16 = sadd.s32 4294967295, %s2040_s15   ;;  %p1639_p0 = scmp.ge.s32.totalorder %s2040_s15, 1  ;;  %s2040_s15 = sphi %s2089_s15, %s14_s15  }
   0x2   : > { %p161_p1 = scmp.lt.s32.totalorder %s2040_s15, 3 }
   0x4   : > { %p162_p2 = pnand %p1639_p0, %p161_p1 }
   0x5   : > { %p186_p3 = scmp.lt.s32.totalorder (!%p162_p2), %s1635_s16, 1  ;;  %v196_v0 = vlaneseq (!%p162_p2)  ;;  %s2042_s21 = smov (!%p162_p2), 125   ;;  %v2061_v4 = vmov (!%p162_p2), 0.0   ;;  %v485_v5 = vld [vmem:[%s3179_s2] sm:$0xff] (!%p162_p2)  ;;  %v486_v6 = vld [vmem:[%s3179_s2 + $0x8] sm:$0xff] (!%p162_p2)  ;;  %v2062_v7 = vmov (!%p162_p2), 0  }
   0x6   : > { %165 = sbr.rel (%p162_p2) target bundleno = 952 (0x3b8), region = 36  ;;  %s2043_s22 = smov (!%p162_p2), 127   ;;  %590 = vmatprep.mubr.f32.mxu0 (!%p162_p2), %v2061_v4  ;;  %1982 = vset.pattern.permute.xlu1 (!%p162_p2), %v2062_v7  ;;  %vm229_vm1 = vcmask (!%p162_p2), 1022976   ;;  %vm207_vm2 = vcmask (!%p162_p2), 1039360   ;;  %vm240_vm3 = vcmask (!%p162_p2), 1014784   ;;  %vm218_vm4 = vcmask (!%p162_p2), 1031168  }
   0x7   : > { %vm2103_vm0 = vcmp.lt.s32.totalorder (!%p162_p2), %v196_v0, 896  ;;  %s2044_s23 = smov (!%p162_p2), 124   ;;  %s2045_s24 = smov (!%p162_p2), 126   ;;  %1983 = vset.pattern.permute.xlu0 (!%p162_p2), %v2062_v7  ;;  %vm262_vm5 = vcmask (!%p162_p2), 777216   ;;  %vm251_vm6 = vcmask (!%p162_p2), 785408   ;;  %vm284_vm7 = vcmask (!%p162_p2), 760832  }
   0x8   : > { %s2046_s25 = smov (!%p162_p2), 95   ;;  %s2047_s26 = smov (!%p162_p2), 96   ;;  %vm273_vm8 = vcmask (!%p162_p2), 769024   ;;  %vm306_vm9 = vcmask (!%p162_p2), 523264   ;;  %vm295_vm10 = vcmask (!%p162_p2), 752640   ;;  %vm328_vm11 = vcmask (!%p162_p2), 506880  }
   0x9   : > { %s2048_s27 = smov (!%p162_p2), 93   ;;  %s2049_s28 = smov (!%p162_p2), 94   ;;  %vm317_vm12 = vcmask (!%p162_p2), 515072   ;;  %vm350_vm13 = vcmask (!%p162_p2), 490496   ;;  %vm339_vm14 = vcmask (!%p162_p2), 498688   ;;  %vm372_vm15 = vcmask (!%p162_p2), 252928  }
   0xa   : > { %s2050_s29 = smov (!%p162_p2), 64   ;;  %s2051_s30 = smov (!%p162_p2), 92  }
   0xb   : > { %s2052_s5 = smov (!%p162_p2), 62   ;;  %s2053_s6 = smov (!%p162_p2), 63  }
   0xc   : > { %s2054_s7 = smov (!%p162_p2), 60   ;;  %s2055_s8 = smov (!%p162_p2), 61  }
   0xd   : > { %s3187_s16 = smov (!%p186_p3, %s1635_s16), 1  ;;  %s2056_s9 = smov 31  }
   0xe   : > { %s1951_s17 = smul.u32 9, %s3187_s16  ;;  %s2057_s10 = smov 32  }
   0xf   : > { %s2058_s11 = smov 29   ;;  %s2059_s12 = smov 30  }
  0x10   : > { %s189_s20 = scalar_lea.vmem %s3177_s0, %s1951_s17  ;;  %s2060_s13 = smov 28  }
  0x11   : > { %v224_v1 = vld [vmem:[%s189_s20] sm:$0xff] }
  0x12   : > { %v415_v2 = vld [vmem:[%s189_s20 + $0x1] sm:$0xff]  ;;  %226 = vrot.lane.b32.xlu1 %v224_v1, %s2042_s21  ;;  %204 = vrot.lane.b32.xlu0 %v224_v1, %s2043_s22  ;;  %200 = vst.msk [vmem:[#allocation2] ss:$8 sm:$0xf] %vm2103_vm0, %v224_v1 }
  0x13   : > { %201 = vst.msk [vmem:[#allocation2] ss:$8 sm:$0x70] %vm2103_vm0, %v224_v1  ;;  %413 = vst.msk [vmem:[#allocation2 + $0x74] ss:$8 sm:$0xf] %vm2103_vm0, %v415_v2 }
  0x14   : > { %414 = vst.msk [vmem:[#allocation2 + $0x74] ss:$8 sm:$0x70] %vm2103_vm0, %v415_v2 }
  0x16   : > { %237 = vrot.lane.b32.xlu1 %v224_v1, %s2044_s23  ;;  %215 = vrot.lane.b32.xlu0 %v224_v1, %s2045_s24 }
  0x1a   : > { %259 = vrot.lane.b32.xlu1 %v224_v1, %s2046_s25  ;;  %248 = vrot.lane.b32.xlu0 %v224_v1, %s2047_s26 }
  0x1e   : > { %281 = vrot.lane.b32.xlu1 %v224_v1, %s2048_s27  ;;  %270 = vrot.lane.b32.xlu0 %v224_v1, %s2049_s28 }
  0x22   : > { %303 = vrot.lane.b32.xlu1 %v224_v1, %s2050_s29  ;;  %292 = vrot.lane.b32.xlu0 %v224_v1, %s2051_s30 }
  0x26   : > { %325 = vrot.lane.b32.xlu1 %v224_v1, %s2052_s5  ;;  %314 = vrot.lane.b32.xlu0 %v224_v1, %s2053_s6 }
  0x2a   : > { %347 = vrot.lane.b32.xlu1 %v224_v1, %s2054_s7  ;;  %336 = vrot.lane.b32.xlu0 %v224_v1, %s2055_s8 }
  0x2e   : > { %369 = vrot.lane.b32.xlu1 %v224_v1, %s2056_s9  ;;  %358 = vrot.lane.b32.xlu0 %v224_v1, %s2057_s10  ;;  %s1663_s10 = sshll.u32 %s3187_s16, 5 }
  0x32   : > { %391 = vrot.lane.b32.xlu1 %v224_v1, %s2058_s11  ;;  %380 = vrot.lane.b32.xlu0 %v224_v1, %s2059_s12 }
  0x36   : > { %417 = vrot.lane.b32.xlu1 %v415_v2, %s2043_s22  ;;  %402 = vrot.lane.b32.xlu0 %v224_v1, %s2060_s13  ;;  %s194_s13 = scalar_lea.vmem %s3181_s4, %s1663_s10 }
  0x3a   : > { %437 = vrot.lane.b32.xlu1 %v415_v2, %s2042_s21  ;;  %427 = vrot.lane.b32.xlu0 %v415_v2, %s2045_s24 }
  0x3e   : > { %447 = vrot.lane.b32.xlu0 %v415_v2, %s2044_s23  ;;  %489 = vperm.xlu1 %1982, %v485_v5  }
  0x42   : > { %494 = vperm.xlu0 %1983, %v486_v6  }
  0x84   : > { %v227_v8 = vpop.permute.xlu1 %226  ;;  %v205_v9 = vpop.permute.xlu0 %204 }
  0x85   : > { %v228_v10 = vrot.slane %v227_v8, 1  ;;  %v206_v11 = vrot.slane %v205_v9, 1 }
  0x87   : > { %v230_v12 = vsel %vm229_vm1, %v227_v8, %v228_v10  ;;  %v208_v13 = vsel %vm207_vm2, %v205_v9, %v206_v11 }
  0x88   : > { %233 = vst.msk [vmem:[#allocation2 + $0x3] ss:$8 sm:$0xf] %vm2103_vm0, %v230_v12  ;;  %234 = vst.msk [vmem:[#allocation2 + $0x3] ss:$8 sm:$0x70] %vm2103_vm0, %v230_v12  ;;  %v238_v14 = vpop.permute.xlu1 %237  ;;  %v216_v15 = vpop.permute.xlu0 %215 }
  0x89   : > { %211 = vst.msk [vmem:[#allocation2 + $0x1] ss:$8 sm:$0xf] %vm2103_vm0, %v208_v13  ;;  %212 = vst.msk [vmem:[#allocation2 + $0x1] ss:$8 sm:$0x70] %vm2103_vm0, %v208_v13 }
  0x8a   : > { %v239_v16 = vrot.slane %v238_v14, 1  ;;  %v217_v17 = vrot.slane %v216_v15, 1 }
  0x8c   : > { %v241_v18 = vsel %vm240_vm3, %v238_v14, %v239_v16  ;;  %v219_v19 = vsel %vm218_vm4, %v216_v15, %v217_v17  ;;  %v260_v20 = vpop.permute.xlu1 %259  ;;  %v249_v21 = vpop.permute.xlu0 %248 }
  0x8d   : > { %244 = vst.msk [vmem:[#allocation2 + $0x4] ss:$8 sm:$0xf] %vm2103_vm0, %v241_v18  ;;  %245 = vst.msk [vmem:[#allocation2 + $0x4] ss:$8 sm:$0x70] %vm2103_vm0, %v241_v18 }
  0x8e   : > { %222 = vst.msk [vmem:[#allocation2 + $0x2] ss:$8 sm:$0xf] %vm2103_vm0, %v219_v19  ;;  %223 = vst.msk [vmem:[#allocation2 + $0x2] ss:$8 sm:$0x70] %vm2103_vm0, %v219_v19 }
  0x8f   : > { %v261_v22 = vrot.slane %v260_v20, 1  ;;  %v250_v23 = vrot.slane %v249_v21, 1 }
  0x90   : > { %v282_v26 = vpop.permute.xlu1 %281  ;;  %v271_v27 = vpop.permute.xlu0 %270 }
  0x91   : > { %v263_v24 = vsel %vm262_vm5, %v260_v20, %v261_v22  ;;  %v252_v25 = vsel %vm251_vm6, %v249_v21, %v250_v23  ;;  %v283_v28 = vrot.slane %v282_v26, 1  ;;  %v272_v29 = vrot.slane %v271_v27, 1 }
  0x92   : > { %266 = vst.msk [vmem:[#allocation2 + $0x6] ss:$8 sm:$0xf] %vm2103_vm0, %v263_v24  ;;  %267 = vst.msk [vmem:[#allocation2 + $0x6] ss:$8 sm:$0x70] %vm2103_vm0, %v263_v24 }
  0x93   : > { %255 = vst.msk [vmem:[#allocation2 + $0x5] ss:$8 sm:$0xf] %vm2103_vm0, %v252_v25  ;;  %256 = vst.msk [vmem:[#allocation2 + $0x5] ss:$8 sm:$0x70] %vm2103_vm0, %v252_v25  ;;  %v285_v30 = vsel %vm284_vm7, %v282_v26, %v283_v28  ;;  %v274_v31 = vsel %vm273_vm8, %v271_v27, %v272_v29 }
  0x94   : > { %288 = vst.msk [vmem:[#allocation2 + $0x38] ss:$8 sm:$0xf] %vm2103_vm0, %v285_v30  ;;  %289 = vst.msk [vmem:[#allocation2 + $0x38] ss:$8 sm:$0x70] %vm2103_vm0, %v285_v30  ;;  %v304_v32 = vpop.permute.xlu1 %303  ;;  %v293_v33 = vpop.permute.xlu0 %292 }
  0x95   : > { %277 = vst.msk [vmem:[#allocation2 + $0x7] ss:$8 sm:$0xf] %vm2103_vm0, %v274_v31  ;;  %278 = vst.msk [vmem:[#allocation2 + $0x7] ss:$8 sm:$0x70] %vm2103_vm0, %v274_v31 }
  0x96   : > { %v305_v34 = vrot.slane %v304_v32, 1  ;;  %v294_v35 = vrot.slane %v293_v33, 1  ;;  %vm361_vm7 = vcmask 261120   ;;  %vm394_vm8 = vcmask 236544   ;;  %v455_v31 = vld [vmem:[%s3178_s1] sm:$0xff] }
  0x98   : > { %v307_v36 = vsel %vm306_vm9, %v304_v32, %v305_v34  ;;  %v296_v37 = vsel %vm295_vm10, %v293_v33, %v294_v35  ;;  %v326_v38 = vpop.permute.xlu1 %325  ;;  %v315_v39 = vpop.permute.xlu0 %314  ;;  %vm383_vm9 = vcmask 244736   ;;  %vm405_vm10 = vcmask 228352  }
  0x99   : > { %310 = vst.msk [vmem:[#allocation2 + $0x3a] ss:$8 sm:$0xf] %vm2103_vm0, %v307_v36  ;;  %311 = vst.msk [vmem:[#allocation2 + $0x3a] ss:$8 sm:$0x70] %vm2103_vm0, %v307_v36 }
  0x9a   : > { %299 = vst.msk [vmem:[#allocation2 + $0x39] ss:$8 sm:$0xf] %vm2103_vm0, %v296_v37  ;;  %300 = vst.msk [vmem:[#allocation2 + $0x39] ss:$8 sm:$0x70] %vm2103_vm0, %v296_v37 }
  0x9b   : > { %v327_v40 = vrot.slane %v326_v38, 1  ;;  %v316_v41 = vrot.slane %v315_v39, 1 }
  0x9c   : > { %v348_v44 = vpop.permute.xlu1 %347  ;;  %v337_v45 = vpop.permute.xlu0 %336  ;;  %v458_v2 = vld [vmem:[#allocation2 + $0x8] sm:$0xff]  ;;  %v457_v8 = vld [vmem:[#allocation2] sm:$0xff]  ;;  %v460_v29 = vld [vmem:[#allocation2 + $0x18] sm:$0xff] }
  0x9d   : > { %v329_v42 = vsel %vm328_vm11, %v326_v38, %v327_v40  ;;  %v318_v43 = vsel %vm317_vm12, %v315_v39, %v316_v41  ;;  %v349_v46 = vrot.slane %v348_v44, 1  ;;  %v338_v47 = vrot.slane %v337_v45, 1  ;;  %v459_v33 = vld [vmem:[#allocation2 + $0x10] sm:$0xff]  ;;  %v456_v38 = vld [vmem:[%s3178_s1 + $0x8] sm:$0xff] }
  0x9e   : > { %332 = vst.msk [vmem:[#allocation2 + $0x3c] ss:$8 sm:$0xf] %vm2103_vm0, %v329_v42  ;;  %333 = vst.msk [vmem:[#allocation2 + $0x3c] ss:$8 sm:$0x70] %vm2103_vm0, %v329_v42 }
  0x9f   : > { %321 = vst.msk [vmem:[#allocation2 + $0x3b] ss:$8 sm:$0xf] %vm2103_vm0, %v318_v43  ;;  %322 = vst.msk [vmem:[#allocation2 + $0x3b] ss:$8 sm:$0x70] %vm2103_vm0, %v318_v43  ;;  %v351_v48 = vsel %vm350_vm13, %v348_v44, %v349_v46  ;;  %v340_v49 = vsel %vm339_vm14, %v337_v45, %v338_v47 }
  0xa0   : > { %354 = vst.msk [vmem:[#allocation2 + $0x3e] ss:$8 sm:$0xf] %vm2103_vm0, %v351_v48  ;;  %355 = vst.msk [vmem:[#allocation2 + $0x3e] ss:$8 sm:$0x70] %vm2103_vm0, %v351_v48  ;;  %v370_v50 = vpop.permute.xlu1 %369  ;;  %v359_v51 = vpop.permute.xlu0 %358 }
  0xa1   : > { %343 = vst.msk [vmem:[#allocation2 + $0x3d] ss:$8 sm:$0xf] %vm2103_vm0, %v340_v49  ;;  %344 = vst.msk [vmem:[#allocation2 + $0x3d] ss:$8 sm:$0x70] %vm2103_vm0, %v340_v49 }
  0xa2   : > { %v371_v52 = vrot.slane %v370_v50, 1  ;;  %v360_v53 = vrot.slane %v359_v51, 1  ;;  %v462_v42 = vld [vmem:[#allocation2 + $0x28] sm:$0xff]  ;;  %v461_v46 = vld [vmem:[#allocation2 + $0x20] sm:$0xff] }
  0xa4   : > { %v373_v54 = vsel %vm372_vm15, %v370_v50, %v371_v52  ;;  %v362_v55 = vsel %vm361_vm7, %v359_v51, %v360_v53  ;;  %v392_v56 = vpop.permute.xlu1 %391  ;;  %v381_v57 = vpop.permute.xlu0 %380 }
  0xa5   : > { %376 = vst.msk [vmem:[#allocation2 + $0x70] ss:$8 sm:$0xf] %vm2103_vm0, %v373_v54  ;;  %377 = vst.msk [vmem:[#allocation2 + $0x70] ss:$8 sm:$0x70] %vm2103_vm0, %v373_v54 }
  0xa6   : > { %365 = vst.msk [vmem:[#allocation2 + $0x3f] ss:$8 sm:$0xf] %vm2103_vm0, %v362_v55  ;;  %366 = vst.msk [vmem:[#allocation2 + $0x3f] ss:$8 sm:$0x70] %vm2103_vm0, %v362_v55 }
  0xa7   : > { %v393_v58 = vrot.slane %v392_v56, 1  ;;  %v382_v59 = vrot.slane %v381_v57, 1  ;;  %v463_v54 = vld [vmem:[#allocation2 + $0x30] sm:$0xff] }
  0xa8   : > { %v418_v62 = vpop.permute.xlu1 %417  ;;  %v403_v63 = vpop.permute.xlu0 %402 }
  0xa9   : > { %v395_v60 = vsel %vm394_vm8, %v392_v56, %v393_v58  ;;  %v384_v61 = vsel %vm383_vm9, %v381_v57, %v382_v59  ;;  %v419_v0 = vrot.slane %v418_v62, 1  ;;  %v404_v1 = vrot.slane %v403_v63, 1 }
  0xaa   : > { %398 = vst.msk [vmem:[#allocation2 + $0x72] ss:$8 sm:$0xf] %vm2103_vm0, %v395_v60  ;;  %399 = vst.msk [vmem:[#allocation2 + $0x72] ss:$8 sm:$0x70] %vm2103_vm0, %v395_v60 }
  0xab   : > { %387 = vst.msk [vmem:[#allocation2 + $0x71] ss:$8 sm:$0xf] %vm2103_vm0, %v384_v61  ;;  %388 = vst.msk [vmem:[#allocation2 + $0x71] ss:$8 sm:$0x70] %vm2103_vm0, %v384_v61  ;;  %v420_v5 = vsel %vm207_vm2, %v418_v62, %v419_v0  ;;  %v406_v6 = vsel %vm405_vm10, %v403_v63, %v404_v1 }
  0xac   : > { %423 = vst.msk [vmem:[#allocation2 + $0x75] ss:$8 sm:$0xf] %vm2103_vm0, %v420_v5  ;;  %424 = vst.msk [vmem:[#allocation2 + $0x75] ss:$8 sm:$0x70] %vm2103_vm0, %v420_v5  ;;  %v438_v10 = vpop.permute.xlu1 %437  ;;  %v428_v11 = vpop.permute.xlu0 %427 }
  0xad   : > { %v465_v7 = vld [vmem:[#allocation2 + $0x40] sm:$0xff]  ;;  %v464_v9 = vld [vmem:[#allocation2 + $0x38] sm:$0xff]  ;;  %409 = vst.msk [vmem:[#allocation2 + $0x73] ss:$8 sm:$0xf] %vm2103_vm0, %v406_v6  ;;  %v439_v14 = vrot.slane %v438_v10, 1 }
  0xae   : > { %410 = vst.msk [vmem:[#allocation2 + $0x73] ss:$8 sm:$0x70] %vm2103_vm0, %v406_v6  ;;  %v1681_v12 = vpack.c.bf16 %v465_v7, %v458_v2  ;;  %v1683_v13 = vpack.c.bf16 %v464_v9, %v457_v8  ;;  %v429_v15 = vrot.slane %v428_v11, 1  ;;  %v467_v23 = vld [vmem:[#allocation2 + $0x50] sm:$0xff]  ;;  %v466_v30 = vld [vmem:[#allocation2 + $0x48] sm:$0xff] }
  0xaf   : > { %v440_v16 = vsel %vm229_vm1, %v438_v10, %v439_v14  ;;  %vm504_vm1 = vcmask 1040384   ;;  %v1691_v3 = vpack.c.bf16 %v467_v23, %v460_v29  ;;  %v1693_v34 = vpack.c.bf16 %v466_v30, %v459_v33  ;;  %v469_v39 = vld [vmem:[#allocation2 + $0x60] sm:$0xff]  ;;  %v468_v44 = vld [vmem:[#allocation2 + $0x58] sm:$0xff]  ;;  %v470_v51 = vld [vmem:[#allocation2 + $0x68] sm:$0xff] }
  0xb0   : > { %1682 = vmatprep.subr.bf16.mxu0 %v1681_v12  ;;  %v430_v17 = vsel %vm218_vm4, %v428_v11, %v429_v15  ;;  %443 = vst.msk [vmem:[#allocation2 + $0x77] ss:$8 sm:$0xf] %vm2103_vm0, %v440_v16  ;;  %444 = vst.msk [vmem:[#allocation2 + $0x77] ss:$8 sm:$0x70] %vm2103_vm0, %v440_v16  ;;  %v448_v18 = vpop.permute.xlu0 %447  ;;  %v1701_v43 = vpack.c.bf16 %v469_v39, %v462_v42  ;;  %v1703_v47 = vpack.c.bf16 %v468_v44, %v461_v46 }
  0xb1   : > { %1684 = vmatpush1.bf16.msra.mxu0 %v1683_v13  ;;  %433 = vst.msk [vmem:[#allocation2 + $0x76] ss:$8 sm:$0xf] %vm2103_vm0, %v430_v17  ;;  %434 = vst.msk [vmem:[#allocation2 + $0x76] ss:$8 sm:$0x70] %vm2103_vm0, %v430_v17  ;;  %v1711_v55 = vpack.c.bf16 %v470_v51, %v463_v54 }
  0xb2   : > { %v449_v19 = vrot.slane %v448_v18, 1  ;;  %vm2063_vm4 = vmmov 1   ;;  %v1039_v46 = vld [vmem:[%s3180_s3 + $0x8] sm:$0xff] }
  0xb3   : > { %vm2234_vm11 = vmpackc.low %vm504_vm1, %vm2063_vm4  ;;  %v1043_v51 = vld [vmem:[%s3180_s3 + $0x28] sm:$0xff] }
  0xb4   : > { %v450_v20 = vsel %vm240_vm3, %v448_v18, %v449_v19 }
  0xb5   : > { %453 = vst.msk [vmem:[#allocation2 + $0xa8] ss:$8 sm:$0xf] %vm2103_vm0, %v450_v20  ;;  %454 = vst.msk [vmem:[#allocation2 + $0xa8] ss:$8 sm:$0x70] %vm2103_vm0, %v450_v20 }
  0xb6   : > { %vm497_vm0 = vcmask 203776  }
  0xb8   : > { %v472_v21 = vld [vmem:[#allocation2 + $0x78] sm:$0xff]  ;;  %v471_v25 = vld [vmem:[#allocation2 + $0x70] sm:$0xff]  ;;  %v474_v35 = vld [vmem:[#allocation2 + $0x88] sm:$0xff] }
  0xb9   : > { %v473_v40 = vld [vmem:[#allocation2 + $0x80] sm:$0xff]  ;;  %v476_v48 = vld [vmem:[#allocation2 + $0x98] sm:$0xff]  ;;  %v475_v52 = vld [vmem:[#allocation2 + $0x90] sm:$0xff] }
  0xba   : > { %v477_v57 = vld [vmem:[#allocation2 + $0xa0] sm:$0xff] }
  0xbc   : > { %v479_v24 = vld [vmem:[#allocation2 + $0xb0] sm:$0x1]  ;;  %v478_v26 = vld [vmem:[#allocation2 + $0xa8] sm:$0x1]  ;;  %v481_v32 = vld [vmem:[#allocation2 + $0xc0] sm:$0x1] }
  0xbd   : > { %v1685_v27 = vpack.c.bf16 %v479_v24, %v472_v21  ;;  %v1688_v28 = vpack.c.bf16 %v478_v26, %v471_v25  ;;  %v1695_v36 = vpack.c.bf16 %v481_v32, %v474_v35  ;;  %v480_v37 = vld [vmem:[#allocation2 + $0xb8] sm:$0x1]  ;;  %v483_v45 = vld [vmem:[#allocation2 + $0xd0] sm:$0x1]  ;;  %v482_v50 = vld [vmem:[#allocation2 + $0xc8] sm:$0x1]  ;;  %v490_v61 = vpop.permute.xlu1 %489 }
  0xbe   : > { %v1698_v41 = vpack.c.bf16 %v480_v37, %v473_v40  ;;  %v1705_v49 = vpack.c.bf16 %v483_v45, %v476_v48  ;;  %v1708_v53 = vpack.c.bf16 %v482_v50, %v475_v52  ;;  %v484_v56 = vld [vmem:[#allocation2 + $0xd8] sm:$0x1]  ;;  %v1038_v48 = vld [vmem:[%s3180_s3] sm:$0xff]  ;;  %v1040_v50 = vld [vmem:[%s3180_s3 + $0x10] sm:$0xff] }
  0xbf   : > { %1687 = vmatprep.subr.msk.bf16.mxu0 %vm2234_vm11, %v1685_v27  ;;  %v1715_v58 = vpack.c.bf16 %v484_v56, %v477_v57  ;;  %v1045_v52 = vld [vmem:[%s3180_s3 + $0x38] sm:$0xff]  ;;  %v1044_v56 = vld [vmem:[%s3180_s3 + $0x30] sm:$0xff]  ;;  %v1047_v57 = vld [vmem:[%s3180_s3 + $0x48] sm:$0xff] }
  0xc0   : > { %1690 = vmatpush1.bf16.msk.msra.mxu0 %vm2234_vm11, %v1688_v28  ;;  %v1725_v54 = vpack.c.bf16 %v1045_v52, %v1043_v51  ;;  %v1174_v51 = vld [vmem:[%s3180_s3 + $0x440] sm:$0xff]  ;;  %v1176_v52 = vld [vmem:[%s3180_s3 + $0x450] sm:$0xff] }
  0xc1   : > { %1692 = vmatprep.subr.bf16.mxu0 %v1691_v3  ;;  %v495_v16 = vpop.permute.xlu0 %494 }
  0xc3   : > { %1644 = vmatmul.mubr.msk.f32.vlgmr.msra.gmra.mrb[0].mxu0 %vm497_vm0, %v455_v31 }
  0xc4   : > { %1694 = vmatpush1.bf16.msra.mxu0 %v1693_v34  ;;  %596 = vmatprep.mubr.f32.mxu0 %v2061_v4 }
  0xc5   : > { %1697 = vmatprep.subr.msk.bf16.mxu0 %vm2234_vm11, %v1695_v36 }
  0xc7   : > { %1645 = vmatmul.mubr.msk.f32.gmra.mrb[2].mxu0 %vm497_vm0, %v456_v38 }
  0xc8   : > { %1700 = vmatpush1.bf16.msk.msra.mxu0 %vm2234_vm11, %v1698_v41  ;;  %667 = vmatprep.mubr.f32.mxu0 %v2061_v4 }
  0xc9   : > { %1702 = vmatprep.subr.bf16.mxu0 %v1701_v43 }
  0xcb   : > { %1648 = vmatmul.mubr.msk.f32.vlgmr.msra.gmra.mrb[4].mxu0 %vm497_vm0, %v455_v31 }
  0xcc   : > { %1704 = vmatpush1.bf16.msra.mxu0 %v1703_v47  ;;  %673 = vmatprep.mubr.f32.mxu0 %v2061_v4  ;;  %v1041_v47 = vld [vmem:[%s3180_s3 + $0x18] sm:$0xff] }
  0xcd   : > { %1707 = vmatprep.subr.msk.bf16.mxu0 %vm2234_vm11, %v1705_v49  ;;  %v1721_v49 = vpack.c.bf16 %v1041_v47, %v1039_v46  ;;  %v1055_v46 = vld [vmem:[%s3180_s3 + $0x88] sm:$0xff] }
  0xce   : > { %v1175_v47 = vld [vmem:[%s3180_s3 + $0x448] sm:$0xff] }
  0xcf   : > { %1649 = vmatmul.mubr.msk.f32.gmra.mrb[6].mxu0 %vm497_vm0, %v456_v38  ;;  %1722 = vmatprep.subr.bf16.mxu1 %v1721_v49  ;;  %v1057_v49 = vld [vmem:[%s3180_s3 + $0x98] sm:$0xff] }
  0xd0   : > { %1710 = vmatpush1.bf16.msk.msra.mxu0 %vm2234_vm11, %v1708_v53  ;;  %744 = vmatprep.mubr.f32.mxu0 %v2061_v4  ;;  %v1723_v53 = vpack.c.bf16 %v1040_v50, %v1038_v48  ;;  %v1177_v48 = vld [vmem:[%s3180_s3 + $0x458] sm:$0xff] }
  0xd1   : > { %1712 = vmatprep.subr.bf16.mxu0 %v1711_v55  ;;  %v1857_v50 = vpack.c.bf16 %v1177_v48, %v1175_v47 }
  0xd2   : > { %1724 = vmatpush1.bf16.msra.mxu1 %v1723_v53 }
  0xd3   : > { %1652 = vmatmul.mubr.msk.f32.vlgmr.msra.gmra.mrb[8].mxu0 %vm497_vm0, %v455_v31  ;;  %1726 = vmatprep.subr.bf16.mxu1 %v1725_v54  ;;  %v1054_v54 = vld [vmem:[%s3180_s3 + $0x80] sm:$0xff] }
  0xd4   : > { %1714 = vmatpush3.bf16.msra.mxu0 %v1711_v55  ;;  %750 = vmatprep.mubr.f32.mxu0 %v2061_v4  ;;  %v1042_v55 = vld [vmem:[%s3180_s3 + $0x20] sm:$0xff] }
  0xd5   : > { %1717 = vmatprep.subr.msk.bf16.mxu0 %vm2234_vm11, %v1715_v58 }
  0xd7   : > { %1653 = vmatmul.mubr.msk.f32.gmra.mrb[10].mxu0 %vm497_vm0, %v456_v38 }
  0xd8   : > { %1720 = vmatpush3.bf16.msk.msra.mxu0 %vm2234_vm11, %v1715_v58  ;;  %1678 = vmatprep.mubr.msk.f32.mxu0 %vm497_vm0, %v455_v31  ;;  %v1049_v58 = vld [vmem:[%s3180_s3 + $0x58] sm:$0xff] }
  0xdb   : > { %1679 = vmatmul.mubr.msk.f32.vlgmr.msra.gmra.mrb[12].mxu0 %vm497_vm0, %v456_v38 }
 0x196   : > { %v592_v59 = vpop.f32.mrb[0].mxu0 }
 0x197   : > { %v594_v60 = vpop.f32.mrb[1].mxu0  ;;  %v2281_v9 = vadd.f32 %v592_v59, %v490_v61  ;;  %v1727_v59 = vpack.c.bf16 %v1044_v56, %v1042_v55  ;;  %v1859_v55 = vpack.c.bf16 %v1176_v52, %v1174_v51  ;;  %v1179_v56 = vld [vmem:[%s3180_s3 + $0x468] sm:$0xff]  ;;  %v1186_v51 = vld [vmem:[%s3180_s3 + $0x4a0] sm:$0xff]  ;;  %v1188_v52 = vld [vmem:[%s3180_s3 + $0x4b0] sm:$0xff] }
 0x198   : > { %v2273_v0 = vadd.f32 %v594_v60, %v490_v61  ;;  %v1167_v60 = vld [vmem:[%s3180_s3 + $0x408] sm:$0xff] }
 0x199   : > { %v832_v14 = vmax.f32 %v2281_v9, 0.0  ;;  %1728 = vmatpush1.bf16.msra.mxu1 %v1727_v59  ;;  %v1056_v59 = vld [vmem:[%s3180_s3 + $0x90] sm:$0xff]  ;;  %v1229_v9 = vld [vmem:[%s3180_s3 + $0x5f8] sm:$0xff] }
 0x19a   : > { %v598_v62 = vpop.f32.mrb[2].mxu0  ;;  %v833_v7 = vmax.f32 %v2273_v0, 0.0  ;;  %v1226_v0 = vld [vmem:[%s3180_s3 + $0x5e0] sm:$0xff] }
 0x19b   : > { %v600_v63 = vpop.f32.mrb[3].mxu0  ;;  %v2331_v41 = vadd.f32 %v598_v62, %v495_v16  ;;  %v1166_v62 = vld [vmem:[%s3180_s3 + $0x400] sm:$0xff] }
 0x19c   : > { %v2302_v23 = vadd.f32 %v600_v63, %v495_v16  ;;  %v1729_v63 = vpack.c.bf16 %v1049_v58, %v1047_v57  ;;  %v1181_v57 = vld [vmem:[%s3180_s3 + $0x478] sm:$0xff]  ;;  %v1737_v58 = vpack.c.bf16 %v1057_v49, %v1055_v46  ;;  %v1064_v46 = vld [vmem:[%s3180_s3 + $0xd0] sm:$0xff]  ;;  %v1067_v49 = vld [vmem:[%s3180_s3 + $0xe8] sm:$0xff] }
 0x19d   : > { %v839_v44 = vmax.f32 %v2331_v41, 0.0  ;;  %v1102_v41 = vld [vmem:[%s3180_s3 + $0x200] sm:$0xff] }
 0x19e   : > { %v669_v1 = vpop.f32.mrb[4].mxu0  ;;  %v840_v30 = vmax.f32 %v2302_v23, 0.0  ;;  %1730 = vmatprep.subr.bf16.mxu1 %v1729_v63  ;;  %v1059_v63 = vld [vmem:[%s3180_s3 + $0xa8] sm:$0xff] }
 0x19f   : > { %v2275_v2 = vadd.f32 %v669_v1, %v490_v61  ;;  %v671_v5 = vpop.f32.mrb[5].mxu0  ;;  %v1046_v1 = vld [vmem:[%s3180_s3 + $0x40] sm:$0xff] }
 0x1a0   : > { %v2277_v6 = vadd.f32 %v671_v5, %v490_v61  ;;  %v1048_v5 = vld [vmem:[%s3180_s3 + $0x50] sm:$0xff] }
 0x1a1   : > { %v834_v8 = vmax.f32 %v2275_v2, 0.0  ;;  %v1228_v2 = vld [vmem:[%s3180_s3 + $0x5f0] sm:$0xff] }
 0x1a2   : > { %v675_v10 = vpop.f32.mrb[6].mxu0  ;;  %v835_v12 = vmax.f32 %v2277_v6, 0.0 }
 0x1a3   : > { %v1984_v11 = vpack.i.bf16 %v834_v8, %v833_v7  ;;  %v677_v13 = vpop.f32.mrb[7].mxu0  ;;  %v2296_v20 = vadd.f32 %v675_v10, %v495_v16 }
 0x1a4   : > { %v1989_v17 = vpack.i.bf16 %v832_v14, %v835_v12  ;;  %v2306_v28 = vadd.f32 %v677_v13, %v495_v16 }
 0x1a5   : > { %1985 = vrot.lane.b32.xlu1 %v1984_v11, %s2043_s22  ;;  %v841_v27 = vmax.f32 %v2296_v20, 0.0  ;;  %v1168_v11 = vld [vmem:[%s3180_s3 + $0x410] sm:$0xff] }
 0x1a6   : > { %v746_v15 = vpop.f32.mrb[8].mxu0  ;;  %v842_v35 = vmax.f32 %v2306_v28, 0.0  ;;  %v1851_v13 = vpack.c.bf16 %v1168_v11, %v1166_v62  ;;  %v1180_v62 = vld [vmem:[%s3180_s3 + $0x470] sm:$0xff]  ;;  %v1739_v11 = vpack.c.bf16 %v1056_v59, %v1054_v54  ;;  %v1191_v54 = vld [vmem:[%s3180_s3 + $0x4c8] sm:$0xff]  ;;  %v1871_v59 = vpack.c.bf16 %v1188_v52, %v1186_v51  ;;  %v1198_v52 = vld [vmem:[%s3180_s3 + $0x500] sm:$0xff] }
 0x1a7   : > { %v2294_v18 = vadd.f32 %v746_v15, %v490_v61  ;;  %v748_v19 = vpop.f32.mrb[9].mxu0  ;;  %v1999_v34 = vpack.i.bf16 %v841_v27, %v840_v30  ;;  %v1051_v15 = vld [vmem:[%s3180_s3 + $0x68] sm:$0xff] }
 0x1a8   : > { %v2298_v21 = vadd.f32 %v748_v19, %v490_v61  ;;  %v1173_v19 = vld [vmem:[%s3180_s3 + $0x438] sm:$0xff] }
 0x1a9   : > { %v836_v22 = vmax.f32 %v2294_v18, 0.0  ;;  %1990 = vrot.lane.b32.xlu1 %v1989_v17, %s2043_s22  ;;  %v1171_v17 = vld [vmem:[%s3180_s3 + $0x428] sm:$0xff] }
 0x1aa   : > { %v837_v24 = vmax.f32 %v2298_v21, 0.0  ;;  %v752_v25 = vpop.f32.mrb[10].mxu0 }
 0x1ab   : > { %v754_v26 = vpop.f32.mrb[11].mxu0  ;;  %v2326_v38 = vadd.f32 %v752_v25, %v495_v16  ;;  %v1170_v25 = vld [vmem:[%s3180_s3 + $0x420] sm:$0xff] }
 0x1ac   : > { %v1994_v29 = vpack.i.bf16 %v836_v22, %v837_v24  ;;  %v2312_v3 = vadd.f32 %v754_v26, %v495_v16  ;;  %v1172_v26 = vld [vmem:[%s3180_s3 + $0x430] sm:$0xff] }
 0x1ad   : > { %v843_v43 = vmax.f32 %v2326_v38, 0.0 }
 0x1ae   : > { %v1680_v31 = vpop.f32.mrb[12].mxu0  ;;  %1995 = vrot.lane.b32.xlu0 %v1994_v29, %s2043_s22  ;;  %v844_v36 = vmax.f32 %v2312_v3, 0.0  ;;  %v1731_v29 = vpack.c.bf16 %v1048_v5, %v1046_v1  ;;  %v1061_v1 = vld [vmem:[%s3180_s3 + $0xb8] sm:$0xff]  ;;  %v1183_v5 = vld [vmem:[%s3180_s3 + $0x488] sm:$0xff] }
 0x1af   : > { %v2316_v32 = vadd.f32 %v1680_v31, %v495_v16  ;;  %v823_v33 = vpop.f32.mrb[13].mxu0  ;;  %v2009_v45 = vpack.i.bf16 %v843_v43, %v839_v44  ;;  %v1053_v16 = vld [vmem:[%s3180_s3 + $0x78] sm:$0xff]  ;;  %v1050_v31 = vld [vmem:[%s3180_s3 + $0x60] sm:$0xff] }
 0x1b0   : > { %v2324_v37 = vadd.f32 %v823_v33, %v490_v61  ;;  %v2004_v42 = vpack.i.bf16 %v844_v36, %v842_v35  ;;  %v1169_v61 = vld [vmem:[%s3180_s3 + $0x418] sm:$0xff]  ;;  %v1052_v33 = vld [vmem:[%s3180_s3 + $0x70] sm:$0xff]  ;;  %1732 = vmatpush1.bf16.msra.mxu1 %v1731_v29 }
 0x1b1   : > { %v845_v39 = vmax.f32 %v2316_v32, 0.0  ;;  %v1849_v10 = vpack.c.bf16 %v1169_v61, %v1167_v60  ;;  %v1735_v53 = vpack.c.bf16 %v1052_v33, %v1050_v31  ;;  %v1861_v60 = vpack.c.bf16 %v1181_v57, %v1179_v56  ;;  %v1178_v61 = vld [vmem:[%s3180_s3 + $0x460] sm:$0xff]  ;;  %v1184_v29 = vld [vmem:[%s3180_s3 + $0x490] sm:$0xff]  ;;  %v1065_v31 = vld [vmem:[%s3180_s3 + $0xd8] sm:$0xff] }
 0x1b2   : > { %v838_v40 = vmax.f32 %v2324_v37, 0.0  ;;  %2000 = vrot.lane.b32.xlu0 %v1999_v34, %s2043_s22  ;;  %v1853_v34 = vpack.c.bf16 %v1173_v19, %v1171_v17  ;;  %v1741_v17 = vpack.c.bf16 %v1061_v1, %v1059_v63  ;;  %v1063_v19 = vld [vmem:[%s3180_s3 + $0xc8] sm:$0xff]  ;;  %v1066_v57 = vld [vmem:[%s3180_s3 + $0xe0] sm:$0xff]  ;;  %v1192_v1 = vld [vmem:[%s3180_s3 + $0x4d0] sm:$0xff] }
 0x1b3   : > { %1850 = vmatprep.subr.bf16.mxu0 %v1849_v10  ;;  %v1185_v10 = vld [vmem:[%s3180_s3 + $0x498] sm:$0xff]  ;;  %v1187_v33 = vld [vmem:[%s3180_s3 + $0x4a8] sm:$0xff]  ;;  %v1745_v48 = vpack.c.bf16 %v1065_v31, %v1063_v19  ;;  %v1190_v63 = vld [vmem:[%s3180_s3 + $0x4c0] sm:$0xff] }
 0x1b4   : > { %900 = vrot.lane.b32.xlu1 %v838_v40, %s2043_s22  ;;  %1852 = vmatpush1.bf16.msra.mxu0 %v1851_v13  ;;  %v1058_v13 = vld [vmem:[%s3180_s3 + $0xa0] sm:$0xff]  ;;  %v1196_v31 = vld [vmem:[%s3180_s3 + $0x4f0] sm:$0xff] }
 0x1b5   : > { %1854 = vmatprep.subr.bf16.mxu0 %v1853_v34  ;;  %v1189_v34 = vld [vmem:[%s3180_s3 + $0x4b8] sm:$0xff] }
 0x1b6   : > { %914 = vrot.lane.b32.xlu0 %v845_v39, %s2043_s22 }
 0x1b8   : > { %2005 = vrot.lane.b32.xlu1 %v2004_v42, %s2043_s22  ;;  %v1855_v42 = vpack.c.bf16 %v1172_v26, %v1170_v25  ;;  %v1865_v25 = vpack.c.bf16 %v1185_v10, %v1183_v5  ;;  %v1182_v26 = vld [vmem:[%s3180_s3 + $0x480] sm:$0xff]  ;;  %v1073_v5 = vld [vmem:[%s3180_s3 + $0x118] sm:$0xff]  ;;  %v1195_v10 = vld [vmem:[%s3180_s3 + $0x4e8] sm:$0xff] }
 0x1b9   : > { %v1867_v47 = vpack.c.bf16 %v1184_v29, %v1182_v26  ;;  %v1194_v29 = vld [vmem:[%s3180_s3 + $0x4e0] sm:$0xff] }
 0x1ba   : > { %1856 = vmatpush1.bf16.msra.mxu0 %v1855_v42 }
 0x1bb   : > { %1858 = vmatprep.subr.bf16.mxu0 %v1857_v50  ;;  %v1869_v50 = vpack.c.bf16 %v1189_v34, %v1187_v33  ;;  %v1077_v33 = vld [vmem:[%s3180_s3 + $0x138] sm:$0xff]  ;;  %v1199_v34 = vld [vmem:[%s3180_s3 + $0x508] sm:$0xff] }
 0x1bc   : > { %2010 = vrot.lane.b32.xlu1 %v2009_v45, %s2043_s22  ;;  %v1733_v45 = vpack.c.bf16 %v1053_v16, %v1051_v15  ;;  %v1060_v15 = vld [vmem:[%s3180_s3 + $0xb0] sm:$0xff]  ;;  %v1863_v16 = vpack.c.bf16 %v1180_v62, %v1178_v61  ;;  %v1071_v61 = vld [vmem:[%s3180_s3 + $0x108] sm:$0xff] }
 0x1bd   : > { %v1743_v42 = vpack.c.bf16 %v1060_v15, %v1058_v13  ;;  %v1070_v15 = vld [vmem:[%s3180_s3 + $0x100] sm:$0xff]  ;;  %v1753_v19 = vpack.c.bf16 %v1073_v5, %v1071_v61  ;;  %v1204_v5 = vld [vmem:[%s3180_s3 + $0x530] sm:$0xff] }
 0x1be   : > { %1734 = vmatprep.subr.bf16.mxu1 %v1733_v45  ;;  %1860 = vmatpush1.bf16.msra.mxu0 %v1859_v55  ;;  %v1062_v45 = vld [vmem:[%s3180_s3 + $0xc0] sm:$0xff]  ;;  %v1193_v55 = vld [vmem:[%s3180_s3 + $0x4d8] sm:$0xff] }
 0x1bf   : > { %1736 = vmatpush1.bf16.msra.mxu1 %v1735_v53  ;;  %1862 = vmatprep.subr.bf16.mxu0 %v1861_v60  ;;  %v1069_v53 = vld [vmem:[%s3180_s3 + $0xf8] sm:$0xff]  ;;  %v1747_v56 = vpack.c.bf16 %v1064_v46, %v1062_v45  ;;  %v1873_v62 = vpack.c.bf16 %v1193_v55, %v1191_v54  ;;  %v1074_v46 = vld [vmem:[%s3180_s3 + $0x120] sm:$0xff]  ;;  %v1203_v55 = vld [vmem:[%s3180_s3 + $0x528] sm:$0xff] }
 0x1c0   : > { %1738 = vmatprep.subr.bf16.mxu1 %v1737_v58  ;;  %v1068_v58 = vld [vmem:[%s3180_s3 + $0xf0] sm:$0xff]  ;;  %v1749_v60 = vpack.c.bf16 %v1069_v53, %v1067_v49  ;;  %v1081_v54 = vld [vmem:[%s3180_s3 + $0x158] sm:$0xff] }
 0x1c1   : > { %v1751_v13 = vpack.c.bf16 %v1068_v58, %v1066_v57  ;;  %v1200_v53 = vld [vmem:[%s3180_s3 + $0x510] sm:$0xff]  ;;  %v1078_v58 = vld [vmem:[%s3180_s3 + $0x140] sm:$0xff] }
 0x1c2   : > { %1864 = vmatpush1.bf16.msra.mxu0 %v1863_v16  ;;  %v1072_v16 = vld [vmem:[%s3180_s3 + $0x110] sm:$0xff] }
 0x1c3   : > { %1740 = vmatpush1.bf16.msra.mxu1 %v1739_v11  ;;  %1866 = vmatprep.subr.bf16.mxu0 %v1865_v25  ;;  %v1197_v11 = vld [vmem:[%s3180_s3 + $0x4f8] sm:$0xff]  ;;  %v1075_v25 = vld [vmem:[%s3180_s3 + $0x128] sm:$0xff]  ;;  %v1755_v45 = vpack.c.bf16 %v1072_v16, %v1070_v15  ;;  %v1082_v16 = vld [vmem:[%s3180_s3 + $0x160] sm:$0xff] }
 0x1c4   : > { %1742 = vmatprep.subr.bf16.mxu1 %v1741_v17  ;;  %v1875_v17 = vpack.c.bf16 %v1192_v1, %v1190_v63  ;;  %v1877_v26 = vpack.c.bf16 %v1197_v11, %v1195_v10  ;;  %v1757_v49 = vpack.c.bf16 %v1077_v33, %v1075_v25  ;;  %v1202_v1 = vld [vmem:[%s3180_s3 + $0x520] sm:$0xff]  ;;  %v1085_v10 = vld [vmem:[%s3180_s3 + $0x178] sm:$0xff]  ;;  %v1207_v11 = vld [vmem:[%s3180_s3 + $0x548] sm:$0xff] }
 0x1c5   : > { %v1208_v33 = vld [vmem:[%s3180_s3 + $0x550] sm:$0xff] }
 0x1c6   : > { %1868 = vmatpush1.bf16.msra.mxu0 %v1867_v47  ;;  %v1076_v47 = vld [vmem:[%s3180_s3 + $0x130] sm:$0xff] }
 0x1c7   : > { %1744 = vmatpush1.bf16.msra.mxu1 %v1743_v42  ;;  %1870 = vmatprep.subr.bf16.mxu0 %v1869_v50  ;;  %v1201_v42 = vld [vmem:[%s3180_s3 + $0x518] sm:$0xff]  ;;  %v1079_v50 = vld [vmem:[%s3180_s3 + $0x148] sm:$0xff]  ;;  %v1759_v57 = vpack.c.bf16 %v1076_v47, %v1074_v46  ;;  %v1086_v47 = vld [vmem:[%s3180_s3 + $0x180] sm:$0xff] }
 0x1c8   : > { %1746 = vmatprep.subr.bf16.mxu1 %v1745_v48  ;;  %v1879_v48 = vpack.c.bf16 %v1196_v31, %v1194_v29  ;;  %v1881_v51 = vpack.c.bf16 %v1201_v42, %v1199_v34  ;;  %v1761_v61 = vpack.c.bf16 %v1081_v54, %v1079_v50  ;;  %v1206_v31 = vld [vmem:[%s3180_s3 + $0x540] sm:$0xff]  ;;  %v1089_v34 = vld [vmem:[%s3180_s3 + $0x198] sm:$0xff]  ;;  %v1211_v42 = vld [vmem:[%s3180_s3 + $0x568] sm:$0xff] }
 0x1c9   : > { %v1088_v50 = vld [vmem:[%s3180_s3 + $0x190] sm:$0xff]  ;;  %v1091_v54 = vld [vmem:[%s3180_s3 + $0x1a8] sm:$0xff] }
 0x1ca   : > { %1872 = vmatpush1.bf16.msra.mxu0 %v1871_v59  ;;  %v1080_v59 = vld [vmem:[%s3180_s3 + $0x150] sm:$0xff] }
 0x1cb   : > { %1748 = vmatpush1.bf16.msra.mxu1 %v1747_v56  ;;  %1874 = vmatprep.subr.bf16.mxu0 %v1873_v62  ;;  %v1205_v56 = vld [vmem:[%s3180_s3 + $0x538] sm:$0xff]  ;;  %v1083_v62 = vld [vmem:[%s3180_s3 + $0x168] sm:$0xff]  ;;  %v1763_v15 = vpack.c.bf16 %v1080_v59, %v1078_v58  ;;  %v1090_v59 = vld [vmem:[%s3180_s3 + $0x1a0] sm:$0xff] }
 0x1cc   : > { %1750 = vmatprep.subr.bf16.mxu1 %v1749_v60  ;;  %v1883_v60 = vpack.c.bf16 %v1200_v53, %v1198_v52  ;;  %v1885_v63 = vpack.c.bf16 %v1205_v56, %v1203_v55  ;;  %v1765_v25 = vpack.c.bf16 %v1085_v10, %v1083_v62  ;;  %v1210_v52 = vld [vmem:[%s3180_s3 + $0x560] sm:$0xff]  ;;  %v1212_v53 = vld [vmem:[%s3180_s3 + $0x570] sm:$0xff]  ;;  %v1093_v55 = vld [vmem:[%s3180_s3 + $0x1b8] sm:$0xff]  ;;  %v1771_v56 = vpack.c.bf16 %v1088_v50, %v1086_v47 }
 0x1cd   : > { %v1773_v58 = vpack.c.bf16 %v1093_v55, %v1091_v54  ;;  %v1097_v62 = vld [vmem:[%s3180_s3 + $0x1d8] sm:$0xff]  ;;  %v1096_v10 = vld [vmem:[%s3180_s3 + $0x1d0] sm:$0xff] }
 0x1ce   : > { %1876 = vmatpush1.bf16.msra.mxu0 %v1875_v17  ;;  %v1084_v17 = vld [vmem:[%s3180_s3 + $0x170] sm:$0xff]  ;;  %v1105_v55 = vld [vmem:[%s3180_s3 + $0x218] sm:$0xff] }
 0x1cf   : > { %1752 = vmatpush1.bf16.msra.mxu1 %v1751_v13  ;;  %1878 = vmatprep.subr.bf16.mxu0 %v1877_v26  ;;  %v1209_v13 = vld [vmem:[%s3180_s3 + $0x558] sm:$0xff]  ;;  %v1087_v26 = vld [vmem:[%s3180_s3 + $0x188] sm:$0xff]  ;;  %v1767_v46 = vpack.c.bf16 %v1084_v17, %v1082_v16  ;;  %v1214_v16 = vld [vmem:[%s3180_s3 + $0x580] sm:$0xff] }
 0x1d0   : > { %1754 = vmatprep.subr.bf16.mxu1 %v1753_v19  ;;  %v1887_v19 = vpack.c.bf16 %v1204_v5, %v1202_v1  ;;  %v1889_v29 = vpack.c.bf16 %v1209_v13, %v1207_v11  ;;  %v1094_v5 = vld [vmem:[%s3180_s3 + $0x1c0] sm:$0xff]  ;;  %v1215_v11 = vld [vmem:[%s3180_s3 + $0x588] sm:$0xff]  ;;  %v1216_v17 = vld [vmem:[%s3180_s3 + $0x590] sm:$0xff] }
 0x1d1   : > { %v1779_v13 = vpack.c.bf16 %v1096_v10, %v1094_v5 }
 0x1d2   : > { %1880 = vmatpush1.bf16.msra.mxu0 %v1879_v48  ;;  %v1891_v48 = vpack.c.bf16 %v1208_v33, %v1206_v31  ;;  %v1098_v31 = vld [vmem:[%s3180_s3 + $0x1e0] sm:$0xff] }
 0x1d3   : > { %1756 = vmatpush1.bf16.msra.mxu1 %v1755_v45  ;;  %1882 = vmatprep.subr.bf16.mxu0 %v1881_v51  ;;  %v1213_v45 = vld [vmem:[%s3180_s3 + $0x578] sm:$0xff] }
 0x1d4   : > { %1758 = vmatprep.subr.bf16.mxu1 %v1757_v49  ;;  %v1769_v49 = vpack.c.bf16 %v1089_v34, %v1087_v26  ;;  %v1893_v51 = vpack.c.bf16 %v1213_v45, %v1211_v42  ;;  %v1099_v26 = vld [vmem:[%s3180_s3 + $0x1e8] sm:$0xff]  ;;  %v1100_v42 = vld [vmem:[%s3180_s3 + $0x1f0] sm:$0xff] }
 0x1d5   : > { %v1219_v45 = vld [vmem:[%s3180_s3 + $0x5a8] sm:$0xff] }
 0x1d6   : > { %1884 = vmatpush1.bf16.msra.mxu0 %v1883_v60  ;;  %v1092_v60 = vld [vmem:[%s3180_s3 + $0x1b0] sm:$0xff] }
 0x1d7   : > { %1760 = vmatpush1.bf16.msra.mxu1 %v1759_v57  ;;  %1886 = vmatprep.subr.bf16.mxu0 %v1885_v63  ;;  %v1895_v57 = vpack.c.bf16 %v1212_v53, %v1210_v52  ;;  %v1775_v63 = vpack.c.bf16 %v1092_v60, %v1090_v59  ;;  %v1220_v52 = vld [vmem:[%s3180_s3 + $0x5b0] sm:$0xff]  ;;  %v1103_v53 = vld [vmem:[%s3180_s3 + $0x208] sm:$0xff] }
 0x1d8   : > { %1762 = vmatprep.subr.bf16.mxu1 %v1761_v61  ;;  %v1095_v61 = vld [vmem:[%s3180_s3 + $0x1c8] sm:$0xff] }
 0x1d9   : > { %v1777_v1 = vpack.c.bf16 %v1097_v62, %v1095_v61  ;;  %v1225_v62 = vld [vmem:[%s3180_s3 + $0x5d8] sm:$0xff] }
 0x1da   : > { %1888 = vmatpush1.bf16.msra.mxu0 %v1887_v19 }
 0x1db   : > { %1764 = vmatpush1.bf16.msra.mxu1 %v1763_v15  ;;  %1890 = vmatprep.subr.bf16.mxu0 %v1889_v29  ;;  %v1217_v15 = vld [vmem:[%s3180_s3 + $0x598] sm:$0xff] }
 0x1dc   : > { %1766 = vmatprep.subr.bf16.mxu1 %v1765_v25  ;;  %v1897_v19 = vpack.c.bf16 %v1217_v15, %v1215_v11  ;;  %v1899_v25 = vpack.c.bf16 %v1216_v17, %v1214_v16  ;;  %v1101_v29 = vld [vmem:[%s3180_s3 + $0x1f8] sm:$0xff] }
 0x1dd   : > { %v1781_v34 = vpack.c.bf16 %v1101_v29, %v1099_v26  ;;  %v1911_v29 = vpack.c.bf16 %v1228_v2, %v1226_v0  ;;  %v1111_v0 = vld [vmem:[%s3180_s3 + $0x248] sm:$0xff] }
 0x1de   : > { %1892 = vmatpush1.bf16.msra.mxu0 %v1891_v48 }
 0x1df   : > { %1768 = vmatpush1.bf16.msra.mxu1 %v1767_v46  ;;  %1894 = vmatprep.subr.bf16.mxu0 %v1893_v51  ;;  %v1221_v46 = vld [vmem:[%s3180_s3 + $0x5b8] sm:$0xff]  ;;  %v1218_v51 = vld [vmem:[%s3180_s3 + $0x5a0] sm:$0xff] }
 0x1e0   : > { %1770 = vmatprep.subr.bf16.mxu1 %v1769_v49  ;;  %v1783_v49 = vpack.c.bf16 %v1100_v42, %v1098_v31  ;;  %v1901_v50 = vpack.c.bf16 %v1221_v46, %v1219_v45  ;;  %v1903_v54 = vpack.c.bf16 %v1220_v52, %v1218_v51  ;;  %v1231_v31 = vld [vmem:[%s3180_s3 + $0x608] sm:$0xff] }
 0x1e2   : > { %1896 = vmatpush1.bf16.msra.mxu0 %v1895_v57 }
 0x1e3   : > { %1772 = vmatpush1.bf16.msra.mxu1 %v1771_v56  ;;  %1898 = vmatprep.subr.bf16.mxu0 %v1897_v19  ;;  %v1785_v56 = vpack.c.bf16 %v1105_v55, %v1103_v53  ;;  %v1227_v19 = vld [vmem:[%s3180_s3 + $0x5e8] sm:$0xff] }
 0x1e4   : > { %1774 = vmatprep.subr.bf16.mxu1 %v1773_v58  ;;  %v1223_v58 = vld [vmem:[%s3180_s3 + $0x5c8] sm:$0xff]  ;;  %v1909_v26 = vpack.c.bf16 %v1229_v9, %v1227_v19  ;;  %v1108_v9 = vld [vmem:[%s3180_s3 + $0x230] sm:$0xff] }
 0x1e5   : > { %v1905_v5 = vpack.c.bf16 %v1225_v62, %v1223_v58 }
 0x1e6   : > { %1900 = vmatpush1.bf16.msra.mxu0 %v1899_v25 }
 0x1e7   : > { %1776 = vmatpush1.bf16.msra.mxu1 %v1775_v63  ;;  %1902 = vmatprep.subr.bf16.mxu0 %v1901_v50  ;;  %v1222_v63 = vld [vmem:[%s3180_s3 + $0x5c0] sm:$0xff] }
 0x1e8   : > { %1778 = vmatprep.subr.bf16.mxu1 %v1777_v1  ;;  %v1224_v1 = vld [vmem:[%s3180_s3 + $0x5d0] sm:$0xff] }
 0x1e9   : > { %v1907_v10 = vpack.c.bf16 %v1224_v1, %v1222_v63 }
 0x1ea   : > { %1904 = vmatpush1.bf16.msra.mxu0 %v1903_v54 }
 0x1eb   : > { %1780 = vmatpush1.bf16.msra.mxu1 %v1779_v13  ;;  %1906 = vmatprep.subr.bf16.mxu0 %v1905_v5 }
 0x1ec   : > { %1782 = vmatprep.subr.bf16.mxu1 %v1781_v34 }
 0x1ee   : > { %1908 = vmatpush1.bf16.msra.mxu0 %v1907_v10 }
 0x1ef   : > { %1784 = vmatpush1.bf16.msra.mxu1 %v1783_v49  ;;  %1910 = vmatprep.subr.bf16.mxu0 %v1909_v26  ;;  %v1230_v26 = vld [vmem:[%s3180_s3 + $0x600] sm:$0xff] }
 0x1f0   : > { %1786 = vmatprep.subr.bf16.mxu1 %v1785_v56 }
 0x1f2   : > { %1912 = vmatpush1.bf16.msra.mxu0 %v1911_v29 }
 0x217   : > { %v1986_v33 = vpop.permute.xlu1 %1985 }
 0x218   : > { %v1988_v47 = vunpack.i.h.bf16 %v1986_v33  ;;  %v1987_v48 = vunpack.i.l.bf16 %v1986_v33  ;;  %v1233_v33 = vld [vmem:[%s3180_s3 + $0x618] sm:$0xff] }
 0x219   : > { %v1913_v42 = vpack.c.bf16 %v1233_v33, %v1231_v31  ;;  %v1232_v33 = vld [vmem:[%s3180_s3 + $0x610] sm:$0xff] }
 0x21a   : > { %v917_v59 = vsel %vm207_vm2, %v1987_v48, %v1988_v47 }
 0x21b   : > { %v2717_v57 = vpop.permute.xlu1 %1990  ;;  %v2744_v16 = vmax.f32 %v833_v7, %v917_v59  ;;  %1914 = vmatprep.subr.bf16.mxu0 %v1913_v42  ;;  %v1117_v42 = vld [vmem:[%s3180_s3 + $0x278] sm:$0xff] }
 0x21c   : > { %v1993_v60 = vunpack.i.h.bf16 %v2717_v57  ;;  %v1992_v61 = vunpack.i.l.bf16 %v2717_v57 }
 0x21e   : > { %v918_v11 = vsel %vm207_vm2, %v1988_v47, %v1992_v61  ;;  %v916_v13 = vsel %vm207_vm2, %v1993_v60, %v1987_v48 }
 0x21f   : > { %v2740_v15 = vmax.f32 %v832_v14, %v916_v13  ;;  %v2748_v17 = vmax.f32 %v834_v8, %v918_v11 }
 0x220   : > { %v1996_v25 = vpop.permute.xlu0 %1995 }
 0x221   : > { %v1998_v7 = vunpack.i.h.bf16 %v1996_v25  ;;  %v1997_v8 = vunpack.i.l.bf16 %v1996_v25  ;;  %970 = vrot.lane.b32.xlu1 %v2740_v15, %s2047_s26  ;;  %v2014_v14 = vpack.i.bf16 %v2748_v17, %v2744_v16  ;;  %v1106_v25 = vld [vmem:[%s3180_s3 + $0x220] sm:$0xff] }
 0x223   : > { %2015 = vrot.lane.b32.xlu0 %v2014_v14, %s2047_s26  ;;  %v920_v45 = vsel %vm207_vm2, %v1998_v7, %v1997_v8  ;;  %v919_v5 = vsel %vm207_vm2, %v1992_v61, %v1998_v7  ;;  %v1112_v14 = vld [vmem:[%s3180_s3 + $0x250] sm:$0xff] }
 0x224   : > { %v2001_v34 = vpop.permute.xlu0 %2000  ;;  %v2785_v52 = vmax.f32 %v836_v22, %v920_v45  ;;  %v2834_v32 = vmax.f32 %v835_v12, %v919_v5 }
 0x225   : > { %v2003_v47 = vunpack.i.h.bf16 %v2001_v34  ;;  %v2002_v48 = vunpack.i.l.bf16 %v2001_v34  ;;  %v1115_v34 = vld [vmem:[%s3180_s3 + $0x268] sm:$0xff] }
 0x226   : > { %v901_v46 = vpop.permute.xlu1 %900 }
 0x227   : > { %v921_v49 = vsel %vm207_vm2, %v1997_v8, %v901_v46  ;;  %v2777_v50 = vmax.f32 %v838_v40, %v901_v46  ;;  %v923_v55 = vsel %vm207_vm2, %v2002_v48, %v2003_v47  ;;  %v1110_v8 = vld [vmem:[%s3180_s3 + $0x240] sm:$0xff]  ;;  %v1235_v46 = vld [vmem:[%s3180_s3 + $0x628] sm:$0xff] }
 0x228   : > { %v2781_v51 = vmax.f32 %v837_v24, %v921_v49  ;;  %v915_v24 = vpop.permute.xlu0 %914  ;;  %v2796_v18 = vmax.f32 %v840_v30, %v923_v55  ;;  %v1795_v49 = vpack.c.bf16 %v1112_v14, %v1110_v8  ;;  %v1245_v8 = vld [vmem:[%s3180_s3 + $0x678] sm:$0xff]  ;;  %v1242_v14 = vld [vmem:[%s3180_s3 + $0x660] sm:$0xff] }
 0x229   : > { %982 = vrot.lane.b32.xlu1 %v2777_v50, %s2047_s26 }
 0x22a   : > { %v2006_v53 = vpop.permute.xlu1 %2005  ;;  %v2019_v54 = vpack.i.bf16 %v2785_v52, %v2781_v51 }
 0x22b   : > { %v2008_v37 = vunpack.i.h.bf16 %v2006_v53  ;;  %v2007_v40 = vunpack.i.l.bf16 %v2006_v53 }
 0x22c   : > { %2020 = vrot.lane.b32.xlu0 %v2019_v54, %s2047_s26 }
 0x22d   : > { %v924_v21 = vsel %vm207_vm2, %v2003_v47, %v2007_v40  ;;  %v927_v58 = vsel %vm207_vm2, %v2008_v37, %v915_v24  ;;  %v1237_v47 = vld [vmem:[%s3180_s3 + $0x638] sm:$0xff] }
 0x22e   : > { %v2011_v56 = vpop.permute.xlu1 %2010  ;;  %v2800_v22 = vmax.f32 %v841_v27, %v924_v21  ;;  %v2813_v20 = vmax.f32 %v844_v36, %v927_v58  ;;  %v2817_v27 = vmax.f32 %v845_v39, %v915_v24  ;;  %v1114_v21 = vld [vmem:[%s3180_s3 + $0x260] sm:$0xff]  ;;  %v1116_v24 = vld [vmem:[%s3180_s3 + $0x270] sm:$0xff] }
 0x22f   : > { %v2012_v59 = vunpack.i.l.bf16 %v2011_v56  ;;  %v2013_v62 = vunpack.i.h.bf16 %v2011_v56  ;;  %v1917_v56 = vpack.c.bf16 %v1237_v47, %v1235_v46  ;;  %v1234_v58 = vld [vmem:[%s3180_s3 + $0x620] sm:$0xff]  ;;  %v1799_v5 = vpack.c.bf16 %v1116_v24, %v1114_v21  ;;  %v1129_v46 = vld [vmem:[%s3180_s3 + $0x2d8] sm:$0xff] }
 0x230   : > { %v2024_v60 = vpack.i.bf16 %v2800_v22, %v2796_v18 }
 0x231   : > { %v922_v63 = vsel %vm207_vm2, %v2012_v59, %v2002_v48  ;;  %v926_v1 = vsel %vm207_vm2, %v2013_v62, %v2008_v37  ;;  %v925_v36 = vsel %vm207_vm2, %v2007_v40, %v2013_v62  ;;  %v1915_v37 = vpack.c.bf16 %v1232_v33, %v1230_v26  ;;  %v1239_v62 = vld [vmem:[%s3180_s3 + $0x648] sm:$0xff]  ;;  %v1244_v26 = vld [vmem:[%s3180_s3 + $0x670] sm:$0xff] }
 0x232   : > { %2025 = vrot.lane.b32.xlu0 %v2024_v60, %s2047_s26  ;;  %v2809_v23 = vmax.f32 %v839_v44, %v922_v63  ;;  %v2830_v3 = vmax.f32 %v843_v43, %v926_v1  ;;  %v2843_v39 = vmax.f32 %v842_v35, %v925_v36  ;;  %v1104_v43 = vld [vmem:[%s3180_s3 + $0x210] sm:$0xff]  ;;  %v1107_v35 = vld [vmem:[%s3180_s3 + $0x228] sm:$0xff]  ;;  %v1109_v44 = vld [vmem:[%s3180_s3 + $0x238] sm:$0xff]  ;;  %v1797_v40 = vpack.c.bf16 %v1117_v42, %v1115_v34 }
 0x233   : > { %v1787_v13 = vpack.c.bf16 %v1104_v43, %v1102_v41  ;;  %v1789_v19 = vpack.c.bf16 %v1109_v44, %v1107_v35  ;;  %v1121_v60 = vld [vmem:[%s3180_s3 + $0x298] sm:$0xff]  ;;  %v1120_v41 = vld [vmem:[%s3180_s3 + $0x290] sm:$0xff]  ;;  %v1238_v44 = vld [vmem:[%s3180_s3 + $0x640] sm:$0xff]  ;;  %vm1260_vm2 = vcmask 1046528  }
 0x234   : > { %v2029_v30 = vpack.i.bf16 %v2809_v23, %v2813_v20  ;;  %v1241_v63 = vld [vmem:[%s3180_s3 + $0x658] sm:$0xff]  ;;  %v1127_v42 = vld [vmem:[%s3180_s3 + $0x2c8] sm:$0xff]  ;;  %vm1934_vm3 = vmpackc.low %vm1260_vm2, %vm2063_vm4 }
 0x235   : > { %v1921_v35 = vpack.c.bf16 %v1241_v63, %v1239_v62  ;;  %v1251_v62 = vld [vmem:[%s3180_s3 + $0x6a8] sm:$0xff]  ;;  %v1253_v63 = vld [vmem:[%s3180_s3 + $0x6b8] sm:$0x7f] }
 0x236   : > { %2030 = vrot.lane.b32.xlu1 %v2029_v30, %s2047_s26  ;;  %996 = vrot.lane.b32.xlu0 %v2817_v27, %s2047_s26 }
 0x23a   : > { %992 = vrot.lane.b32.xlu1 %v2830_v3, %s2047_s26  ;;  %976 = vrot.lane.b32.xlu0 %v2834_v32, %s2047_s26 }
 0x23e   : > { %990 = vrot.lane.b32.xlu1 %v2843_v39, %s2047_s26 }
 0x293   : > { %v971_v28 = vpop.permute.xlu1 %970 }
 0x295   : > { %v2847_v38 = vpop.permute.xlu0 %2015 }
 0x296   : > { %v2018_v6 = vunpack.i.h.bf16 %v2847_v38  ;;  %v2017_v12 = vunpack.i.l.bf16 %v2847_v38 }
 0x298   : > { %v999_v57 = vsel %vm251_vm6, %v2017_v12, %v2018_v6  ;;  %v998_v61 = vsel %vm251_vm6, %v971_v28, %v2017_v12  ;;  %v1118_v12 = vld [vmem:[%s3180_s3 + $0x280] sm:$0xff] }
 0x299   : > { %v1025_v10 = vmax.f32 %v2744_v16, %v999_v57  ;;  %v1024_v11 = vmax.f32 %v2740_v15, %v998_v61  ;;  %v1113_v16 = vld [vmem:[%s3180_s3 + $0x258] sm:$0xff]  ;;  %v1791_v15 = vpack.c.bf16 %v1108_v9, %v1106_v25  ;;  %v1240_v57 = vld [vmem:[%s3180_s3 + $0x650] sm:$0xff] }
 0x29a   : > { %v1793_v7 = vpack.c.bf16 %v1113_v16, %v1111_v0  ;;  %v1803_v0 = vpack.c.bf16 %v1120_v41, %v1118_v12  ;;  %v1122_v16 = vld [vmem:[%s3180_s3 + $0x2a0] sm:$0xff]  ;;  %v1132_v41 = vld [vmem:[%s3180_s3 + $0x2f0] sm:$0xff] }
 0x29b   : > { %1331 = vmatprep.mubr.f32.mxu1 %v1025_v10  ;;  %v2903_v45 = vpop.permute.xlu1 %982  ;;  %v1130_v12 = vld [vmem:[%s3180_s3 + $0x2e0] sm:$0xff] }
 0x29c   : > { %1332 = vmatmul.mubr.f32.vlgmr.msra.gmra.mrb[0].mxu1 %v1024_v11 }
 0x29d   : > { %1788 = vmatpush1.bf16.msra.mxu1 %v1787_v13  ;;  %v1123_v13 = vld [vmem:[%s3180_s3 + $0x2a8] sm:$0xff] }
 0x29e   : > { %v2881_v2 = vpop.permute.xlu0 %2020  ;;  %1790 = vmatprep.subr.bf16.mxu1 %v1789_v19  ;;  %v1125_v19 = vld [vmem:[%s3180_s3 + $0x2b8] sm:$0xff] }
 0x29f   : > { %v2023_v29 = vunpack.i.h.bf16 %v2881_v2  ;;  %v2022_v31 = vunpack.i.l.bf16 %v2881_v2  ;;  %v1805_v34 = vpack.c.bf16 %v1125_v19, %v1123_v13  ;;  %v1128_v2 = vld [vmem:[%s3180_s3 + $0x2d0] sm:$0xff]  ;;  %v1134_v19 = vld [vmem:[%s3180_s3 + $0x300] sm:$0xff] }
 0x2a1   : > { %v1002_v48 = vsel %vm251_vm6, %v2023_v29, %v2022_v31  ;;  %1792 = vmatpush1.bf16.msra.mxu1 %v1791_v15  ;;  %v1003_v53 = vsel %vm251_vm6, %v2022_v31, %v2903_v45  ;;  %v1243_v15 = vld [vmem:[%s3180_s3 + $0x668] sm:$0xff] }
 0x2a2   : > { %v1028_v54 = vmax.f32 %v2785_v52, %v1002_v48  ;;  %1794 = vmatprep.subr.bf16.mxu1 %v1793_v7  ;;  %v1029_v55 = vmax.f32 %v2781_v51, %v1003_v53  ;;  %v1236_v52 = vld [vmem:[%s3180_s3 + $0x630] sm:$0xff]  ;;  %v1119_v51 = vld [vmem:[%s3180_s3 + $0x288] sm:$0xff]  ;;  %v1923_v7 = vpack.c.bf16 %v1240_v57, %v1238_v44  ;;  %v1925_v21 = vpack.c.bf16 %v1245_v8, %v1243_v15  ;;  %v1137_v57 = vld [vmem:[%s3180_s3 + $0x318] sm:$0xff] }
 0x2a3   : > { %v1919_v36 = vpack.c.bf16 %v1236_v52, %v1234_v58  ;;  %v1801_v28 = vpack.c.bf16 %v1121_v60, %v1119_v51  ;;  %v1809_v58 = vpack.c.bf16 %v1129_v46, %v1127_v42  ;;  %v1126_v52 = vld [vmem:[%s3180_s3 + $0x2c0] sm:$0xff]  ;;  %v1131_v51 = vld [vmem:[%s3180_s3 + $0x2e8] sm:$0xff]  ;;  %v1133_v60 = vld [vmem:[%s3180_s3 + $0x2f8] sm:$0xff]  ;;  %v1030_v8 = vmax.f32 %v2777_v50, %v2903_v45 }
 0x2a4   : > { %v2933_v59 = vpop.permute.xlu0 %2025  ;;  %1485 = vmatprep.mubr.f32.mxu0 %v1029_v55  ;;  %v1247_v55 = vld [vmem:[%s3180_s3 + $0x688] sm:$0xff]  ;;  %v1138_v15 = vld [vmem:[%s3180_s3 + $0x320] sm:$0xff]  ;;  %v1144_v45 = vld [vmem:[%s3180_s3 + $0x350] sm:$0xff] }
 0x2a5   : > { %v2028_v30 = vunpack.i.h.bf16 %v2933_v59  ;;  %v2027_v1 = vunpack.i.l.bf16 %v2933_v59  ;;  %1796 = vmatpush1.bf16.msra.mxu1 %v1795_v49  ;;  %1486 = vmatmul.mubr.f32.vlgmr.msra.gmra.mrb[14].mxu0 %v1028_v54  ;;  %v1135_v44 = vld [vmem:[%s3180_s3 + $0x308] sm:$0xff]  ;;  %v1142_v50 = vld [vmem:[%s3180_s3 + $0x340] sm:$0xff] }
 0x2a6   : > { %1916 = vmatpush1.bf16.msra.mxu0 %v1915_v37  ;;  %1798 = vmatprep.subr.bf16.mxu1 %v1797_v40  ;;  %v1249_v37 = vld [vmem:[%s3180_s3 + $0x698] sm:$0xff]  ;;  %v1817_v13 = vpack.c.bf16 %v1137_v57, %v1135_v44  ;;  %v1147_v42 = vld [vmem:[%s3180_s3 + $0x368] sm:$0xff]  ;;  %v1827_v46 = vpack.c.bf16 %v1144_v45, %v1142_v50 }
 0x2a7   : > { %1918 = vmatprep.subr.bf16.mxu0 %v1917_v56  ;;  %v1005_v43 = vsel %vm251_vm6, %v2027_v1, %v2028_v30 }
 0x2a8   : > { %v2031_v61 = vpop.permute.xlu1 %2030  ;;  %v2961_v10 = vpop.permute.xlu0 %996  ;;  %v1032_v11 = vmax.f32 %v2796_v18, %v1005_v43  ;;  %v1124_v18 = vld [vmem:[%s3180_s3 + $0x2b0] sm:$0xff]  ;;  %v1250_v43 = vld [vmem:[%s3180_s3 + $0x6a0] sm:$0xff] }
 0x2a9   : > { %v2033_v25 = vunpack.i.h.bf16 %v2031_v61  ;;  %v2032_v9 = vunpack.i.l.bf16 %v2031_v61  ;;  %1800 = vmatpush1.bf16.msra.mxu1 %v1799_v5  ;;  %v1807_v54 = vpack.c.bf16 %v1124_v18, %v1122_v16  ;;  %v1815_v61 = vpack.c.bf16 %v1132_v41, %v1130_v12  ;;  %v1164_v12 = vld [vmem:[%s3180_s3 + $0x3f0] sm:$0xff] }
 0x2aa   : > { %1920 = vmatpush1.bf16.msra.mxu0 %v1919_v36  ;;  %1337 = vmatprep.mubr.f32.mxu1 %v1032_v11  ;;  %v1813_v36 = vpack.c.bf16 %v1133_v60, %v1131_v51  ;;  %v1158_v51 = vld [vmem:[%s3180_s3 + $0x3c0] sm:$0xff]  ;;  %v1160_v60 = vld [vmem:[%s3180_s3 + $0x3d0] sm:$0xff] }
 0x2ab   : > { %v1009_v31 = vsel %vm251_vm6, %v2032_v9, %v2961_v10  ;;  %1802 = vmatprep.subr.bf16.mxu1 %v1801_v28  ;;  %1922 = vmatprep.subr.bf16.mxu0 %v1921_v35  ;;  %v1004_v33 = vsel %vm251_vm6, %v2033_v25, %v2027_v1  ;;  %v1811_v1 = vpack.c.bf16 %v1128_v2, %v1126_v52  ;;  %v1252_v35 = vld [vmem:[%s3180_s3 + $0x6b0] sm:$0x7f]  ;;  %v1159_v2 = vld [vmem:[%s3180_s3 + $0x3c8] sm:$0xff] }
 0x2ac   : > { %v1036_v47 = vmax.f32 %v2813_v20, %v1009_v31  ;;  %v2998_v48 = vpop.permute.xlu1 %992  ;;  %v3000_v49 = vpop.permute.xlu0 %976  ;;  %v1031_v53 = vmax.f32 %v2809_v23, %v1004_v33  ;;  %v1927_v23 = vpack.c.bf16 %v1244_v26, %v1242_v14  ;;  %v1933_v28 = vpack.c.bf16 %v1253_v63, %v1251_v62  ;;  %v1136_v25 = vld [vmem:[%s3180_s3 + $0x310] sm:$0xff]  ;;  %v1143_v14 = vld [vmem:[%s3180_s3 + $0x348] sm:$0xff]  ;;  %v1145_v26 = vld [vmem:[%s3180_s3 + $0x358] sm:$0xff] }
 0x2ad   : > { %v1008_v40 = vsel %vm251_vm6, %v2998_v48, %v2032_v9  ;;  %v1001_v20 = vsel %vm251_vm6, %v3000_v49, %v2023_v29  ;;  %1804 = vmatpush1.bf16.msra.mxu1 %v1803_v0  ;;  %v1246_v29 = vld [vmem:[%s3180_s3 + $0x680] sm:$0xff]  ;;  %v1936_v11 = vpack.c.bf16 %v1252_v35, %v1250_v43  ;;  %v1139_v9 = vld [vmem:[%s3180_s3 + $0x328] sm:$0xff]  ;;  %v1141_v0 = vld [vmem:[%s3180_s3 + $0x338] sm:$0xff]  ;;  %v1819_v16 = vpack.c.bf16 %v1136_v25, %v1134_v19 }
 0x2ae   : > { %v1035_v24 = vmax.f32 %v2830_v3, %v1008_v40  ;;  %v1027_v56 = vmax.f32 %v2834_v32, %v1001_v20  ;;  %1924 = vmatpush1.bf16.msra.mxu0 %v1923_v7  ;;  %1338 = vmatmul.mubr.f32.gmra.mrb[2].mxu1 %v1031_v53  ;;  %v1929_v3 = vpack.c.bf16 %v1249_v37, %v1247_v55  ;;  %v1248_v32 = vld [vmem:[%s3180_s3 + $0x690] sm:$0xff]  ;;  %v1146_v53 = vld [vmem:[%s3180_s3 + $0x360] sm:$0xff]  ;;  %v1163_v62 = vld [vmem:[%s3180_s3 + $0x3e8] sm:$0xff] }
 0x2af   : > { %1491 = vmatprep.mubr.f32.mxu0 %v1036_v47  ;;  %1806 = vmatprep.subr.bf16.mxu1 %v1805_v34  ;;  %v1931_v5 = vpack.c.bf16 %v1248_v32, %v1246_v29  ;;  %v1821_v18 = vpack.c.bf16 %v1141_v0, %v1139_v9  ;;  %v1140_v7 = vld [vmem:[%s3180_s3 + $0x330] sm:$0xff]  ;;  %v1825_v33 = vpack.c.bf16 %v1145_v26, %v1143_v14  ;;  %v1150_v40 = vld [vmem:[%s3180_s3 + $0x380] sm:$0xff]  ;;  %v1161_v29 = vld [vmem:[%s3180_s3 + $0x3d8] sm:$0xff] }
 0x2b0   : > { %1408 = vmatprep.mubr.f32.mxu1 %v1027_v56  ;;  %1492 = vmatmul.mubr.f32.gmra.mrb[16].mxu0 %v1035_v24  ;;  %v1823_v31 = vpack.c.bf16 %v1140_v7, %v1138_v15  ;;  %v1037_v34 = vmax.f32 %v2817_v27, %v2961_v10  ;;  %v1148_v27 = vld [vmem:[%s3180_s3 + $0x370] sm:$0xff]  ;;  %v1151_v10 = vld [vmem:[%s3180_s3 + $0x388] sm:$0xff]  ;;  %v1841_v32 = vpack.c.bf16 %v1161_v29, %v1159_v2  ;;  %v1165_v63 = vld [vmem:[%s3180_s3 + $0x3f8] sm:$0xff]  ;;  %v991_v41 = vpop.permute.xlu1 %990 }
 0x2b1   : > { %1808 = vmatpush1.bf16.msra.mxu1 %v1807_v54  ;;  %1926 = vmatprep.subr.bf16.mxu0 %v1925_v21  ;;  %v1153_v54 = vld [vmem:[%s3180_s3 + $0x398] sm:$0xff]  ;;  %v1831_v55 = vpack.c.bf16 %v1148_v27, %v1146_v53  ;;  %v1152_v20 = vld [vmem:[%s3180_s3 + $0x390] sm:$0xff]  ;;  %v1155_v21 = vld [vmem:[%s3180_s3 + $0x3a8] sm:$0xff]  ;;  %v1007_v35 = vsel %vm251_vm6, %v991_v41, %v2998_v48  ;;  %v1006_v57 = vsel %vm251_vm6, %v2028_v30, %v991_v41 }
 0x2b2   : > { %1928 = vmatpush1.bf16.msra.mxu0 %v1927_v23  ;;  %1810 = vmatprep.subr.bf16.mxu1 %v1809_v58  ;;  %v1833_v37 = vpack.c.bf16 %v1153_v54, %v1151_v10  ;;  %v1157_v23 = vld [vmem:[%s3180_s3 + $0x3b8] sm:$0xff]  ;;  %v1835_v24 = vpack.c.bf16 %v1152_v20, %v1150_v40  ;;  %v1154_v58 = vld [vmem:[%s3180_s3 + $0x3a0] sm:$0xff]  ;;  %v1156_v52 = vld [vmem:[%s3180_s3 + $0x3b0] sm:$0xff] }
 0x2b3   : > { %1930 = vmatprep.subr.bf16.mxu0 %v1929_v3  ;;  %1562 = vmatprep.mubr.f32.mxu0 %v2061_v4  ;;  %v1837_v56 = vpack.c.bf16 %v1157_v23, %v1155_v21  ;;  %v1839_v3 = vpack.c.bf16 %v1156_v52, %v1154_v58 }
 0x2b5   : > { %1812 = vmatpush1.bf16.msra.mxu1 %v1811_v1  ;;  %v1843_v1 = vpack.c.bf16 %v1160_v60, %v1158_v51 }
 0x2b6   : > { %1932 = vmatpush1.bf16.msra.mxu0 %v1931_v5  ;;  %1814 = vmatprep.subr.bf16.mxu1 %v1813_v36  ;;  %v1845_v5 = vpack.c.bf16 %v1165_v63, %v1163_v62  ;;  %v1162_v36 = vld [vmem:[%s3180_s3 + $0x3e0] sm:$0xff] }
 0x2b7   : > { %1935 = vmatprep.subr.msk.bf16.mxu0 %vm1934_vm3, %v1933_v28  ;;  %v1847_v43 = vpack.c.bf16 %v1164_v12, %v1162_v36  ;;  %v1000_v28 = vsel %vm251_vm6, %v2018_v6, %v3000_v49 }
 0x2b8   : > { %v1026_v44 = vmax.f32 %v2748_v17, %v1000_v28 }
 0x2b9   : > { %1816 = vmatpush1.bf16.msra.mxu1 %v1815_v61  ;;  %v1034_v61 = vmax.f32 %v2843_v39, %v1007_v35 }
 0x2ba   : > { %1938 = vmatpush1.bf16.msk.msra.mxu0 %vm1934_vm3, %v1936_v11  ;;  %1818 = vmatprep.subr.bf16.mxu1 %v1817_v13  ;;  %v1033_v11 = vmax.f32 %v2800_v22, %v1006_v57 }
 0x2bd   : > { %1820 = vmatpush1.bf16.msra.mxu1 %v1819_v16  ;;  %1659 = vmatmul.mubr.msk.f32.vlgmr.msra.gmra.mrb[14].mxu0 %vm262_vm5, %v1030_v8 }
 0x2be   : > { %1822 = vmatprep.subr.bf16.mxu1 %v1821_v18  ;;  %1568 = vmatprep.mubr.f32.mxu0 %v2061_v4  ;;  %v1149_v4 = vld [vmem:[%s3180_s3 + $0x378] sm:$0xff] }
 0x2bf   : > { %v1829_v47 = vpack.c.bf16 %v1149_v4, %v1147_v42 }
 0x2c1   : > { %1824 = vmatpush1.bf16.msra.mxu1 %v1823_v31  ;;  %1660 = vmatmul.mubr.msk.f32.gmra.mrb[16].mxu0 %vm262_vm5, %v1037_v34  ;;  %vm1576_vm5 = vcmask 556032  }
 0x2c2   : > { %1826 = vmatprep.subr.bf16.mxu1 %v1825_v33 }
 0x2c5   : > { %1828 = vmatpush1.bf16.msra.mxu1 %v1827_v46 }
 0x2c6   : > { %1830 = vmatprep.subr.bf16.mxu1 %v1829_v47 }
 0x2c9   : > { %1832 = vmatpush1.bf16.msra.mxu1 %v1831_v55 }
 0x2ca   : > { %1834 = vmatprep.subr.bf16.mxu1 %v1833_v37 }
 0x2cd   : > { %1836 = vmatpush1.bf16.msra.mxu1 %v1835_v24 }
 0x2ce   : > { %1838 = vmatprep.subr.bf16.mxu1 %v1837_v56 }
 0x2d1   : > { %1840 = vmatpush1.bf16.msra.mxu1 %v1839_v3 }
 0x2d2   : > { %1842 = vmatprep.subr.bf16.mxu1 %v1841_v32 }
 0x2d5   : > { %1844 = vmatpush1.bf16.msra.mxu1 %v1843_v1 }
 0x2d6   : > { %1846 = vmatprep.subr.bf16.mxu1 %v1845_v5 }
 0x2d9   : > { %1848 = vmatpush1.bf16.msra.mxu1 %v1847_v43 }
 0x2dc   : > { %1409 = vmatmul.mubr.f32.vlgmr.msra.gmra.mrb[0].mxu1 %v1026_v44 }
 0x2dd   : > { %1414 = vmatprep.mubr.f32.mxu1 %v1034_v61 }
 0x2e0   : > { %1415 = vmatmul.mubr.f32.gmra.mrb[2].mxu1 %v1033_v11 }
 0x390   : > { %v1564_v38 = vpop.f32.mrb[14].mxu0 }
 0x391   : > { %v1566_v13 = vpop.f32.mrb[15].mxu0 }
 0x394   : > { %v1570_v6 = vpop.f32.mrb[16].mxu0 }
 0x395   : > { %v1572_v49 = vpop.f32.mrb[17].mxu0 }
 0x3af   : > { %v1410_v17 = vpop.f32.mrb[0].mxu1 }
 0x3b0   : > { %v1939_v59 = vadd.f32 %v1564_v38, %v1410_v17  ;;  %v1412_v48 = vpop.f32.mrb[1].mxu1 }
 0x3b1   : > { %v1940_v30 = vadd.f32 %v1566_v13, %v1412_v48 }
 0x3b2   : > { %1575 = vst [vmem:[%s194_s13] sm:$0xff] %v1939_v59 }
 0x3b3   : > { %1577 = vst.msk [vmem:[%s194_s13 + $0x8] sm:$0xff] %vm1576_vm5, %v1940_v30  ;;  %v1416_v39 = vpop.f32.mrb[2].mxu1 }
 0x3b4   : > { %v1941_v19 = vadd.f32 %v1570_v6, %v1416_v39  ;;  %v1418_v22 = vpop.f32.mrb[3].mxu1 }
 0x3b5   : > { %v1942_v25 = vadd.f32 %v1572_v49, %v1418_v22 }
 0x3b6   : > { %1578 = vst [vmem:[%s194_s13 + $0x10] sm:$0xff] %v1941_v19 }
 0x3b7   : > { %1579 = vst.msk [vmem:[%s194_s13 + $0x18] sm:$0xff] %vm1576_vm5, %v1942_v25 }
 0x3b8 PF: > { %s14_s15 = sadd.s32 1, %s2040_s15  }
 0x3b9   : > { %p11_p4 = scmp.ge.s32.totalorder %s14_s15, 4  }
 0x3bb   :  { %13 = sbr.rel (!%p11_p4) target bundleno = 1 (0x1), region = 90 }

// kernel: convnet_forward.4
= control target key start
LH: loop header
LB: loop body
LE: loop exit
PB: predicated region body
PF: predicated region fallthrough
CT: control target
= control target key end

     0   :  { %s1517_s15 = smov 0   ;;  %s1869_s0 = inlined_call_operand.vmem [shape: f32[2,16,328], index: 0, kind: input, shape index: {}]   ;;  %s1870_s1 = inlined_call_operand.vmem [shape: bf16[32,400], index: 1, kind: input, shape index: {}]   ;;  %s1871_s2 = inlined_call_operand.vmem [shape: f32[32,1], index: 2, kind: input, shape index: {}]   ;;  %s1872_s3 = inlined_call_operand.vmem [shape: f32[233,49], index: 3, kind: input, shape index: {}]   ;;  %s1873_s4 = inlined_call_operand.vmem [shape: f32[2,32,49], index: 4, kind: output, shape index: {}]  }
   0x1 LB: > { %s1319_s16 = sadd.s32 4294967295, %s1463_s15   ;;  %p1323_p0 = scmp.ge.s32.totalorder %s1463_s15, 1  ;;  %s1463_s15 = sphi %s1517_s15, %s14_s15  }
   0x2   : > { %p162_p1 = scmp.lt.s32.totalorder %s1463_s15, 3 }
   0x4   : > { %p163_p2 = pnand %p1323_p0, %p162_p1 }
   0x5   : > { %p188_p3 = scmp.lt.s32.totalorder (!%p163_p2), %s1319_s16, 1  ;;  %vm206_vm0 = vcmask (!%p163_p2), 1014784   ;;  %s1465_s21 = smov (!%p163_p2), 126   ;;  %vm238_vm1 = vcmask (!%p163_p2), 1031168   ;;  %vm220_vm2 = vcmask (!%p163_p2), 1039360   ;;  %vm256_vm3 = vcmask (!%p163_p2), 1022976  }
   0x6   : > { %166 = sbr.rel (%p163_p2) target bundleno = 966 (0x3c6), region = 36  ;;  %s1466_s22 = smov (!%p163_p2), 127   ;;  %v1447_v16 = vld [vmem:[%s1870_s1 + $0x4] ss:$16 sps:$4 sm:$0xff] (!%p163_p2)   ;;  %vm298_vm4 = vcmask (!%p163_p2), 900096   ;;  %vm900_vm5 = vcmask (!%p163_p2), 130048  }
   0x7   : > { %s1467_s23 = smov (!%p163_p2), 125   ;;  %s1468_s24 = smov (!%p163_p2), 124   ;;  %939 = vmatprep.mubr.bf16.mxu0 (!%p163_p2), %v1447_v16  ;;  %v1450_v25 = vld [vmem:[%s1870_s1 + $0xc] ss:$16 sps:$4 sm:$0xff] (!%p163_p2)   ;;  %vm323_vm6 = vcmask (!%p163_p2), 891904   ;;  %vm348_vm7 = vcmask (!%p163_p2), 883712  }
   0x8   : > { %s1469_s25 = smov (!%p163_p2), 110   ;;  %s1470_s26 = smov (!%p163_p2), 109   ;;  %1335 = vmatprep.mubr.msk.bf16.mxu1 (!%p163_p2), %vm900_vm5, %v1450_v25  ;;  %v838_v39 = vld [vmem:[%s1871_s2] sm:$0xff] (!%p163_p2)  ;;  %v1489_v40 = vmov (!%p163_p2), 0   ;;  %v839_v41 = vld [vmem:[%s1871_s2 + $0x8] sm:$0xff] (!%p163_p2)  ;;  %v841_v45 = vld [vmem:[%s1871_s2 + $0x18] sm:$0xff] (!%p163_p2) }
   0x9   : > { %s1471_s27 = smov (!%p163_p2), 108   ;;  %s1472_s28 = smov (!%p163_p2), 73   ;;  %1443 = vset.pattern.permute.xlu0 (!%p163_p2), %v1489_v40  ;;  %1444 = vset.pattern.permute.xlu1 (!%p163_p2), %v1489_v40  ;;  %v840_v46 = vld [vmem:[%s1871_s2 + $0x10] sm:$0xff] (!%p163_p2)  ;;  %vm573_vm8 = vcmask (!%p163_p2), 596992   ;;  %vm373_vm9 = vcmask (!%p163_p2), 875520   ;;  %vm598_vm10 = vcmask (!%p163_p2), 588800  }
   0xa   : > { %s1473_s29 = smov (!%p163_p2), 107   ;;  %s1474_s30 = smov (!%p163_p2), 72   ;;  %vm398_vm11 = vcmask (!%p163_p2), 867328   ;;  %vm623_vm12 = vcmask (!%p163_p2), 580608   ;;  %vm423_vm13 = vcmask (!%p163_p2), 752640   ;;  %vm648_vm14 = vcmask (!%p163_p2), 572416  }
   0xb   : > { %s1475_s5 = smov (!%p163_p2), 106   ;;  %s1476_s6 = smov (!%p163_p2), 71   ;;  %vm448_vm15 = vcmask (!%p163_p2), 744448  }
   0xc   : > { %s1477_s7 = smov (!%p163_p2), 92   ;;  %s1478_s8 = smov (!%p163_p2), 70  }
   0xd   : > { %s1875_s16 = smov (!%p188_p3, %s1319_s16), 1  ;;  %s1479_s9 = smov 91  }
   0xe   : > { %s1407_s17 = smul.u32 48, %s1875_s16  ;;  %s1480_s10 = smov 56  }
   0xf   : > { %s1481_s11 = smov 90   ;;  %s1482_s12 = smov 55  }
  0x10   : > { %s192_s20 = scalar_lea.vmem %s1869_s0, %s1407_s17  ;;  %s1483_s13 = smov 89  }
  0x11   : > { %v226_v0 = vld [vmem:[%s192_s20] sm:$0xff]  ;;  %v228_v1 = vld [vmem:[%s192_s20 + $0x18] sm:$0xff]  ;;  %v227_v2 = vld [vmem:[%s192_s20 + $0x8] sm:$0xff]  ;;  %s1484_s14 = smov 54   ;;  %s1485_s17 = smov 88  }
  0x12   : > { %v1531_v3 = vpack.c.bf16 %v228_v1, %v226_v0  ;;  %v229_v4 = vld [vmem:[%s192_s20 + $0x20] sm:$0xff]  ;;  %v282_v7 = vld [vmem:[%s192_s20 + $0x10] sm:$0xff]  ;;  %v285_v8 = vld [vmem:[%s192_s20 + $0x28] sm:$0xff]  ;;  %s1486_s18 = smov 53  }
  0x13   : > { %v1533_v5 = vpack.c.bf16 %v229_v4, %v227_v2  ;;  %v1548_v9 = vpack.c.bf16 %v285_v8, %v282_v7 }
  0x14   : > { %234 = vrot.lane.b32.xlu1 %v1531_v3, %s1465_s21  ;;  %216 = vrot.lane.b32.xlu0 %v1531_v3, %s1466_s22 }
  0x15   : > { %207 = vst.msk [vmem:[#allocation2 + $0x8] sm:$0xff] %vm206_vm0, %v1533_v5 }
  0x18   : > { %236 = vrot.lane.b32.xlu1 %v1533_v5, %s1465_s21  ;;  %218 = vrot.lane.b32.xlu0 %v1533_v5, %s1466_s22  ;;  %s1487_s21 = smov 74  }
  0x1c   : > { %254 = vrot.lane.b32.xlu1 %v1533_v5, %s1467_s23  ;;  %252 = vrot.lane.b32.xlu0 %v1531_v3, %s1467_s23  ;;  %v789_v6 = vld [vmem:[#allocation2 + $0x8] sm:$0xff]  ;;  %s1488_s23 = smov 52  }
  0x1d   : > { %907 = vmatprep.subr.bf16.mxu0 %v789_v6 }
  0x1e   : > { %908 = vmatpush1.bf16.msra.mxu0 %v1531_v3 }
  0x20   : > { %272 = vrot.lane.b32.xlu1 %v1533_v5, %s1468_s24  ;;  %270 = vrot.lane.b32.xlu0 %v1531_v3, %s1468_s24 }
  0x24   : > { %296 = vrot.lane.b32.xlu1 %v1548_v9, %s1469_s25  ;;  %294 = vrot.lane.b32.xlu0 %v1533_v5, %s1469_s25 }
  0x28   : > { %319 = vrot.lane.b32.xlu1 %v1533_v5, %s1470_s26  ;;  %292 = vrot.lane.b32.xlu0 %v1531_v3, %s1469_s25 }
  0x2c   : > { %317 = vrot.lane.b32.xlu1 %v1531_v3, %s1470_s26  ;;  %321 = vrot.lane.b32.xlu0 %v1548_v9, %s1470_s26 }
  0x30   : > { %346 = vrot.lane.b32.xlu1 %v1548_v9, %s1471_s27  ;;  %344 = vrot.lane.b32.xlu0 %v1533_v5, %s1471_s27 }
  0x34   : > { %569 = vrot.lane.b32.xlu1 %v1533_v5, %s1472_s28  ;;  %342 = vrot.lane.b32.xlu0 %v1531_v3, %s1471_s27 }
  0x38   : > { %567 = vrot.lane.b32.xlu1 %v1531_v3, %s1472_s28  ;;  %571 = vrot.lane.b32.xlu0 %v1548_v9, %s1472_s28 }
  0x3c   : > { %371 = vrot.lane.b32.xlu1 %v1548_v9, %s1473_s29  ;;  %369 = vrot.lane.b32.xlu0 %v1533_v5, %s1473_s29 }
  0x40   : > { %594 = vrot.lane.b32.xlu1 %v1533_v5, %s1474_s30  ;;  %367 = vrot.lane.b32.xlu0 %v1531_v3, %s1473_s29 }
  0x44   : > { %592 = vrot.lane.b32.xlu1 %v1531_v3, %s1474_s30  ;;  %596 = vrot.lane.b32.xlu0 %v1548_v9, %s1474_s30 }
  0x48   : > { %396 = vrot.lane.b32.xlu1 %v1548_v9, %s1475_s5  ;;  %394 = vrot.lane.b32.xlu0 %v1533_v5, %s1475_s5 }
  0x4c   : > { %619 = vrot.lane.b32.xlu1 %v1533_v5, %s1476_s6  ;;  %392 = vrot.lane.b32.xlu0 %v1531_v3, %s1475_s5 }
  0x50   : > { %617 = vrot.lane.b32.xlu1 %v1531_v3, %s1476_s6  ;;  %621 = vrot.lane.b32.xlu0 %v1548_v9, %s1476_s6 }
  0x54   : > { %421 = vrot.lane.b32.xlu1 %v1548_v9, %s1477_s7  ;;  %419 = vrot.lane.b32.xlu0 %v1533_v5, %s1477_s7 }
  0x58   : > { %644 = vrot.lane.b32.xlu1 %v1533_v5, %s1478_s8  ;;  %417 = vrot.lane.b32.xlu0 %v1531_v3, %s1477_s7 }
  0x5c   : > { %642 = vrot.lane.b32.xlu1 %v1531_v3, %s1478_s8  ;;  %646 = vrot.lane.b32.xlu0 %v1548_v9, %s1478_s8 }
  0x60   : > { %446 = vrot.lane.b32.xlu1 %v1548_v9, %s1479_s9  ;;  %444 = vrot.lane.b32.xlu0 %v1533_v5, %s1479_s9 }
  0x64   : > { %669 = vrot.lane.b32.xlu1 %v1533_v5, %s1480_s10  ;;  %442 = vrot.lane.b32.xlu0 %v1531_v3, %s1479_s9 }
  0x68   : > { %667 = vrot.lane.b32.xlu1 %v1531_v3, %s1480_s10  ;;  %671 = vrot.lane.b32.xlu0 %v1548_v9, %s1480_s10 }
  0x6c   : > { %471 = vrot.lane.b32.xlu1 %v1548_v9, %s1481_s11  ;;  %469 = vrot.lane.b32.xlu0 %v1533_v5, %s1481_s11 }
  0x70   : > { %694 = vrot.lane.b32.xlu1 %v1533_v5, %s1482_s12  ;;  %467 = vrot.lane.b32.xlu0 %v1531_v3, %s1481_s11 }
  0x74   : > { %692 = vrot.lane.b32.xlu1 %v1531_v3, %s1482_s12  ;;  %696 = vrot.lane.b32.xlu0 %v1548_v9, %s1482_s12 }
  0x78   : > { %496 = vrot.lane.b32.xlu1 %v1548_v9, %s1483_s13  ;;  %494 = vrot.lane.b32.xlu0 %v1533_v5, %s1483_s13 }
  0x7c   : > { %719 = vrot.lane.b32.xlu1 %v1533_v5, %s1484_s14  ;;  %492 = vrot.lane.b32.xlu0 %v1531_v3, %s1483_s13 }
  0x80   : > { %717 = vrot.lane.b32.xlu1 %v1531_v3, %s1484_s14  ;;  %721 = vrot.lane.b32.xlu0 %v1548_v9, %s1484_s14 }
  0x84   : > { %521 = vrot.lane.b32.xlu1 %v1548_v9, %s1485_s17  ;;  %519 = vrot.lane.b32.xlu0 %v1533_v5, %s1485_s17 }
  0x86   : > { %v235_v10 = vpop.permute.xlu1 %234  ;;  %v217_v11 = vpop.permute.xlu0 %216 }
  0x88   : > { %744 = vrot.lane.b32.xlu1 %v1533_v5, %s1486_s18  ;;  %517 = vrot.lane.b32.xlu0 %v1531_v3, %s1485_s17 }
  0x8a   : > { %v237_v12 = vpop.permute.xlu1 %236  ;;  %v219_v13 = vpop.permute.xlu0 %218 }
  0x8b   : > { %v239_v14 = vsel %vm238_vm1, %v235_v10, %v237_v12  ;;  %243 = vst.msk [vmem:[#allocation2 + $0x28] sm:$0xff] %vm206_vm0, %v237_v12  ;;  %v221_v15 = vsel %vm220_vm2, %v217_v11, %v219_v13  ;;  %225 = vst.msk [vmem:[#allocation2 + $0x18] sm:$0xff] %vm206_vm0, %v219_v13  ;;  %vm673_vm1 = vcmask 457728  }
  0x8c   : > { %742 = vrot.lane.b32.xlu1 %v1531_v3, %s1486_s18  ;;  %746 = vrot.lane.b32.xlu0 %v1548_v9, %s1486_s18 }
  0x8e   : > { %v255_v17 = vpop.permute.xlu1 %254  ;;  %v253_v18 = vpop.permute.xlu0 %252 }
  0x8f   : > { %261 = vst.msk [vmem:[#allocation2 + $0x38] sm:$0xff] %vm206_vm0, %v255_v17  ;;  %v257_v19 = vsel %vm256_vm3, %v253_v18, %v255_v17  ;;  %vm473_vm3 = vcmask 736256  }
  0x90   : > { %546 = vrot.lane.b32.xlu1 %v1548_v9, %s1487_s21  ;;  %544 = vrot.lane.b32.xlu0 %v1533_v5, %s1487_s21 }
  0x92   : > { %v273_v20 = vpop.permute.xlu1 %272  ;;  %v271_v21 = vpop.permute.xlu0 %270  ;;  %v791_v22 = vld [vmem:[#allocation2 + $0x18] sm:$0xff]  ;;  %v793_v24 = vld [vmem:[#allocation2 + $0x28] sm:$0xff] }
  0x93   : > { %279 = vst.msk [vmem:[#allocation2 + $0x48] sm:$0xff] %vm206_vm0, %v273_v20  ;;  %v275_v23 = vsel %vm206_vm0, %v271_v21, %v273_v20  ;;  %909 = vmatprep.subr.bf16.mxu0 %v791_v22 }
  0x94   : > { %769 = vrot.lane.b32.xlu1 %v1533_v5, %s1488_s23  ;;  %542 = vrot.lane.b32.xlu0 %v1531_v3, %s1487_s21 }
  0x95   : > { %910 = vmatpush1.bf16.msra.mxu0 %v221_v15 }
  0x96   : > { %911 = vmatprep.subr.bf16.mxu0 %v793_v24  ;;  %v297_v26 = vpop.permute.xlu1 %296  ;;  %v295_v27 = vpop.permute.xlu0 %294  ;;  %v795_v29 = vld [vmem:[#allocation2 + $0x38] sm:$0xff] }
  0x97   : > { %v300_v28 = vsel %vm298_vm4, %v295_v27, %v297_v26 }
  0x98   : > { %304 = vst.msk [vmem:[#allocation2 + $0x58] sm:$0xff] %vm206_vm0, %v300_v28  ;;  %767 = vrot.lane.b32.xlu1 %v1531_v3, %s1488_s23  ;;  %771 = vrot.lane.b32.xlu0 %v1548_v9, %s1488_s23 }
  0x99   : > { %912 = vmatpush1.bf16.msra.mxu0 %v239_v14 }
  0x9a   : > { %913 = vmatprep.subr.bf16.mxu0 %v795_v29  ;;  %v320_v30 = vpop.permute.xlu1 %319  ;;  %v293_v31 = vpop.permute.xlu0 %292  ;;  %v797_v33 = vld [vmem:[#allocation2 + $0x48] sm:$0xff] }
  0x9b   : > { %v299_v32 = vsel %vm298_vm4, %v293_v31, %v295_v27 }
  0x9c   : > { %844 = vperm.xlu0 %1443, %v838_v39   ;;  %849 = vperm.xlu1 %1444, %v839_v41  }
  0x9d   : > { %914 = vmatpush1.bf16.msra.mxu0 %v257_v19 }
  0x9e   : > { %915 = vmatprep.subr.bf16.mxu0 %v797_v33  ;;  %v318_v34 = vpop.permute.xlu1 %317  ;;  %v322_v35 = vpop.permute.xlu0 %321 }
  0x9f   : > { %v324_v36 = vsel %vm323_vm6, %v318_v34, %v320_v30  ;;  %v325_v37 = vsel %vm323_vm6, %v320_v30, %v322_v35  ;;  %v799_v38 = vld [vmem:[#allocation2 + $0x58] sm:$0xff]  ;;  %vm698_vm6 = vcmask 449536  }
  0xa0   : > { %329 = vst.msk [vmem:[#allocation2 + $0x68] sm:$0xff] %vm206_vm0, %v325_v37  ;;  %859 = vperm.xlu0 %1443, %v841_v45   ;;  %854 = vperm.xlu1 %1444, %v840_v46  }
  0xa1   : > { %916 = vmatpush1.bf16.msra.mxu0 %v275_v23 }
  0xa2   : > { %917 = vmatprep.subr.bf16.mxu0 %v799_v38  ;;  %v347_v42 = vpop.permute.xlu1 %346  ;;  %v345_v43 = vpop.permute.xlu0 %344 }
  0xa3   : > { %v350_v44 = vsel %vm348_vm7, %v345_v43, %v347_v42 }
  0xa4   : > { %354 = vst.msk [vmem:[#allocation2 + $0x78] sm:$0xff] %vm206_vm0, %v350_v44 }
  0xa5   : > { %918 = vmatpush1.bf16.msra.mxu0 %v299_v32 }
  0xa6   : > { %v570_v47 = vpop.permute.xlu1 %569  ;;  %v343_v48 = vpop.permute.xlu0 %342 }
  0xa7   : > { %v349_v49 = vsel %vm348_vm7, %v343_v48, %v345_v43  ;;  %v801_v50 = vld [vmem:[#allocation2 + $0x68] sm:$0xff]  ;;  %vm498_vm7 = vcmask 728064  }
  0xa8   : > { %919 = vmatprep.subr.bf16.mxu0 %v801_v50 }
  0xa9   : > { %920 = vmatpush1.bf16.msra.mxu0 %v324_v36 }
  0xaa   : > { %v568_v51 = vpop.permute.xlu1 %567  ;;  %v572_v52 = vpop.permute.xlu0 %571 }
  0xab   : > { %v574_v53 = vsel %vm573_vm8, %v568_v51, %v570_v47  ;;  %v575_v54 = vsel %vm573_vm8, %v570_v47, %v572_v52  ;;  %v803_v55 = vld [vmem:[#allocation2 + $0x78] sm:$0xff]  ;;  %vm723_vm8 = vcmask 441344  }
  0xac   : > { %579 = vst.msk [vmem:[#allocation2 + $0x108] sm:$0xff] %vm206_vm0, %v575_v54  ;;  %921 = vmatprep.subr.bf16.mxu0 %v803_v55 }
  0xad   : > { %922 = vmatpush1.bf16.msra.mxu0 %v349_v49 }
  0xae   : > { %v372_v56 = vpop.permute.xlu1 %371  ;;  %v370_v57 = vpop.permute.xlu0 %369 }
  0xaf   : > { %v375_v58 = vsel %vm373_vm9, %v370_v57, %v372_v56 }
  0xb0   : > { %379 = vst.msk [vmem:[#allocation2 + $0x88] sm:$0xff] %vm206_vm0, %v375_v58 }
  0xb2   : > { %v595_v59 = vpop.permute.xlu1 %594  ;;  %v368_v60 = vpop.permute.xlu0 %367 }
  0xb3   : > { %v374_v61 = vsel %vm373_vm9, %v368_v60, %v370_v57  ;;  %v821_v62 = vld [vmem:[#allocation2 + $0x108] sm:$0xff]  ;;  %vm523_vm9 = vcmask 719872  }
  0xb4   : > { %960 = vmatprep.subr.bf16.mxu1 %v821_v62 }
  0xb5   : > { %961 = vmatpush1.bf16.msra.mxu1 %v574_v53 }
  0xb6   : > { %v593_v63 = vpop.permute.xlu1 %592  ;;  %v597_v0 = vpop.permute.xlu0 %596 }
  0xb7   : > { %v599_v1 = vsel %vm598_vm10, %v593_v63, %v595_v59  ;;  %v600_v2 = vsel %vm598_vm10, %v595_v59, %v597_v0  ;;  %v805_v3 = vld [vmem:[#allocation2 + $0x88] sm:$0xff]  ;;  %vm748_vm10 = vcmask 433152  }
  0xb8   : > { %604 = vst.msk [vmem:[#allocation2 + $0x118] sm:$0xff] %vm206_vm0, %v600_v2  ;;  %923 = vmatprep.subr.bf16.mxu0 %v805_v3 }
  0xb9   : > { %924 = vmatpush1.bf16.msra.mxu0 %v374_v61 }
  0xba   : > { %v397_v4 = vpop.permute.xlu1 %396  ;;  %v395_v5 = vpop.permute.xlu0 %394 }
  0xbb   : > { %v400_v6 = vsel %vm398_vm11, %v395_v5, %v397_v4 }
  0xbc   : > { %404 = vst.msk [vmem:[#allocation2 + $0x98] sm:$0xff] %vm206_vm0, %v400_v6 }
  0xbe   : > { %v620_v7 = vpop.permute.xlu1 %619  ;;  %v393_v8 = vpop.permute.xlu0 %392 }
  0xbf   : > { %v399_v9 = vsel %vm398_vm11, %v393_v8, %v395_v5  ;;  %v823_v10 = vld [vmem:[#allocation2 + $0x118] sm:$0xff]  ;;  %vm548_vm11 = vcmask 605184  }
  0xc0   : > { %962 = vmatprep.subr.bf16.mxu1 %v823_v10 }
  0xc1   : > { %963 = vmatpush1.bf16.msra.mxu1 %v599_v1 }
  0xc2   : > { %v618_v11 = vpop.permute.xlu1 %617  ;;  %v622_v12 = vpop.permute.xlu0 %621 }
  0xc3   : > { %v624_v13 = vsel %vm623_vm12, %v618_v11, %v620_v7  ;;  %v625_v14 = vsel %vm623_vm12, %v620_v7, %v622_v12  ;;  %v807_v15 = vld [vmem:[#allocation2 + $0x98] sm:$0xff]  ;;  %vm773_vm12 = vcmask 424960  }
  0xc4   : > { %629 = vst.msk [vmem:[#allocation2 + $0x128] sm:$0xff] %vm206_vm0, %v625_v14  ;;  %925 = vmatprep.subr.bf16.mxu0 %v807_v15 }
  0xc5   : > { %926 = vmatpush1.bf16.msra.mxu0 %v399_v9 }
  0xc6   : > { %v422_v16 = vpop.permute.xlu1 %421  ;;  %v420_v17 = vpop.permute.xlu0 %419 }
  0xc7   : > { %v425_v18 = vsel %vm423_vm13, %v420_v17, %v422_v16 }
  0xc8   : > { %429 = vst.msk [vmem:[#allocation2 + $0xa8] sm:$0xff] %vm206_vm0, %v425_v18 }
  0xca   : > { %v645_v19 = vpop.permute.xlu1 %644  ;;  %v418_v20 = vpop.permute.xlu0 %417 }
  0xcb   : > { %v424_v21 = vsel %vm423_vm13, %v418_v20, %v420_v17  ;;  %v825_v22 = vld [vmem:[#allocation2 + $0x128] sm:$0xff] }
  0xcc   : > { %964 = vmatprep.subr.bf16.mxu1 %v825_v22 }
  0xcd   : > { %965 = vmatpush1.bf16.msra.mxu1 %v624_v13 }
  0xce   : > { %v643_v23 = vpop.permute.xlu1 %642  ;;  %v647_v24 = vpop.permute.xlu0 %646 }
  0xcf   : > { %v649_v25 = vsel %vm648_vm14, %v643_v23, %v645_v19  ;;  %v650_v26 = vsel %vm648_vm14, %v645_v19, %v647_v24  ;;  %v809_v27 = vld [vmem:[#allocation2 + $0xa8] sm:$0xff]  ;;  %v1445_v24 = vld [vmem:[%s1870_s1] ss:$16 sps:$4 sm:$0xff]   ;;  %vm1157_vm14 = vcmask 859136  }
  0xd0   : > { %654 = vst.msk [vmem:[#allocation2 + $0x138] sm:$0xff] %vm206_vm0, %v650_v26  ;;  %927 = vmatprep.subr.bf16.mxu0 %v809_v27  ;;  %v1448_v27 = vld [vmem:[%s1870_s1 + $0x8] ss:$16 sps:$4 sm:$0xff]  }
  0xd1   : > { %928 = vmatpush1.bf16.msra.mxu0 %v424_v21 }
  0xd2   : > { %v447_v28 = vpop.permute.xlu1 %446  ;;  %v445_v29 = vpop.permute.xlu0 %444 }
  0xd3   : > { %v450_v30 = vsel %vm448_vm15, %v445_v29, %v447_v28  ;;  %v1453_v28 = vld [vmem:[%s1870_s1 + $0x20] ss:$16 sps:$4 sm:$0xff]  }
  0xd4   : > { %454 = vst.msk [vmem:[#allocation2 + $0xb8] sm:$0xff] %vm206_vm0, %v450_v30  ;;  %v1456_v30 = vld [vmem:[%s1870_s1 + $0x28] ss:$16 sps:$4 sm:$0xff]  }
  0xd6   : > { %v670_v31 = vpop.permute.xlu1 %669  ;;  %v443_v32 = vpop.permute.xlu0 %442 }
  0xd7   : > { %v449_v33 = vsel %vm448_vm15, %v443_v32, %v445_v29  ;;  %v827_v34 = vld [vmem:[#allocation2 + $0x138] sm:$0xff] }
  0xd8   : > { %966 = vmatprep.subr.bf16.mxu1 %v827_v34  ;;  %v1454_v29 = vld [vmem:[%s1870_s1 + $0x2c] ss:$16 sps:$4 sm:$0xff]  }
  0xd9   : > { %967 = vmatpush1.bf16.msra.mxu1 %v649_v25  ;;  %v1451_v25 = vld [vmem:[%s1870_s1 + $0x24] ss:$16 sps:$4 sm:$0xff]  }
  0xda   : > { %v668_v35 = vpop.permute.xlu1 %667  ;;  %v672_v36 = vpop.permute.xlu0 %671 }
  0xdb   : > { %v674_v37 = vsel %vm673_vm1, %v668_v35, %v670_v31  ;;  %v675_v38 = vsel %vm673_vm1, %v670_v31, %v672_v36  ;;  %v811_v39 = vld [vmem:[#allocation2 + $0xb8] sm:$0xff] }
  0xdc   : > { %679 = vst.msk [vmem:[#allocation2 + $0x148] sm:$0xff] %vm206_vm0, %v675_v38  ;;  %929 = vmatprep.subr.bf16.mxu0 %v811_v39 }
  0xdd   : > { %930 = vmatpush1.bf16.msra.mxu0 %v449_v33 }
  0xde   : > { %v472_v40 = vpop.permute.xlu1 %471  ;;  %v470_v41 = vpop.permute.xlu0 %469 }
  0xdf   : > { %v475_v42 = vsel %vm473_vm3, %v470_v41, %v472_v40 }
  0xe0   : > { %479 = vst.msk [vmem:[#allocation2 + $0xc8] sm:$0xff] %vm206_vm0, %v475_v42 }
  0xe2   : > { %v695_v43 = vpop.permute.xlu1 %694  ;;  %v468_v44 = vpop.permute.xlu0 %467 }
  0xe3   : > { %v474_v45 = vsel %vm473_vm3, %v468_v44, %v470_v41  ;;  %v829_v46 = vld [vmem:[#allocation2 + $0x148] sm:$0xff] }
  0xe4   : > { %968 = vmatprep.subr.bf16.mxu1 %v829_v46 }
  0xe5   : > { %969 = vmatpush1.bf16.msra.mxu1 %v674_v37 }
  0xe6   : > { %v693_v47 = vpop.permute.xlu1 %692  ;;  %v697_v48 = vpop.permute.xlu0 %696 }
  0xe7   : > { %v699_v49 = vsel %vm698_vm6, %v693_v47, %v695_v43  ;;  %v700_v50 = vsel %vm698_vm6, %v695_v43, %v697_v48  ;;  %v813_v51 = vld [vmem:[#allocation2 + $0xc8] sm:$0xff] }
  0xe8   : > { %704 = vst.msk [vmem:[#allocation2 + $0x158] sm:$0xff] %vm206_vm0, %v700_v50  ;;  %931 = vmatprep.subr.bf16.mxu0 %v813_v51 }
  0xe9   : > { %932 = vmatpush1.bf16.msra.mxu0 %v474_v45 }
  0xea   : > { %v497_v52 = vpop.permute.xlu1 %496  ;;  %v495_v53 = vpop.permute.xlu0 %494 }
  0xeb   : > { %v500_v54 = vsel %vm498_vm7, %v495_v53, %v497_v52 }
  0xec   : > { %504 = vst.msk [vmem:[#allocation2 + $0xd8] sm:$0xff] %vm206_vm0, %v500_v54 }
  0xee   : > { %v720_v55 = vpop.permute.xlu1 %719  ;;  %v493_v56 = vpop.permute.xlu0 %492 }
  0xef   : > { %v499_v57 = vsel %vm498_vm7, %v493_v56, %v495_v53  ;;  %v831_v58 = vld [vmem:[#allocation2 + $0x158] sm:$0xff] }
  0xf0   : > { %970 = vmatprep.subr.bf16.mxu1 %v831_v58 }
  0xf1   : > { %971 = vmatpush1.bf16.msra.mxu1 %v699_v49 }
  0xf2   : > { %v718_v59 = vpop.permute.xlu1 %717  ;;  %v722_v60 = vpop.permute.xlu0 %721 }
  0xf3   : > { %v724_v61 = vsel %vm723_vm8, %v718_v59, %v720_v55  ;;  %v725_v62 = vsel %vm723_vm8, %v720_v55, %v722_v60  ;;  %v815_v63 = vld [vmem:[#allocation2 + $0xd8] sm:$0xff] }
  0xf4   : > { %729 = vst.msk [vmem:[#allocation2 + $0x168] sm:$0xff] %vm206_vm0, %v725_v62  ;;  %933 = vmatprep.subr.bf16.mxu0 %v815_v63 }
  0xf5   : > { %934 = vmatpush1.bf16.msra.mxu0 %v499_v57 }
  0xf6   : > { %v522_v0 = vpop.permute.xlu1 %521  ;;  %v520_v1 = vpop.permute.xlu0 %519 }
  0xf7   : > { %v525_v2 = vsel %vm523_vm9, %v520_v1, %v522_v0 }
  0xf8   : > { %529 = vst.msk [vmem:[#allocation2 + $0xe8] sm:$0xff] %vm206_vm0, %v525_v2 }
  0xfa   : > { %v745_v3 = vpop.permute.xlu1 %744  ;;  %v518_v4 = vpop.permute.xlu0 %517 }
  0xfb   : > { %v524_v5 = vsel %vm523_vm9, %v518_v4, %v520_v1  ;;  %v833_v6 = vld [vmem:[#allocation2 + $0x168] sm:$0xff] }
  0xfc   : > { %972 = vmatprep.subr.bf16.mxu1 %v833_v6 }
  0xfd   : > { %973 = vmatpush1.bf16.msra.mxu1 %v724_v61 }
  0xfe   : > { %v743_v7 = vpop.permute.xlu1 %742  ;;  %v747_v8 = vpop.permute.xlu0 %746 }
  0xff   : > { %v749_v9 = vsel %vm748_vm10, %v743_v7, %v745_v3  ;;  %v750_v10 = vsel %vm748_vm10, %v745_v3, %v747_v8  ;;  %v817_v11 = vld [vmem:[#allocation2 + $0xe8] sm:$0xff] }
 0x100   : > { %754 = vst.msk [vmem:[#allocation2 + $0x178] sm:$0xff] %vm206_vm0, %v750_v10  ;;  %935 = vmatprep.subr.bf16.mxu0 %v817_v11 }
 0x101   : > { %936 = vmatpush1.bf16.msra.mxu0 %v524_v5 }
 0x102   : > { %v547_v12 = vpop.permute.xlu1 %546  ;;  %v545_v13 = vpop.permute.xlu0 %544 }
 0x103   : > { %v550_v14 = vsel %vm548_vm11, %v545_v13, %v547_v12  ;;  %v1127_v12 = vld [vmem:[%s1872_s3] sm:$0xff] }
 0x104   : > { %554 = vst.msk [vmem:[#allocation2 + $0xf8] sm:$0xff] %vm206_vm0, %v550_v14  ;;  %v1129_v14 = vld [vmem:[%s1872_s3 + $0x10] sm:$0xff] }
 0x106   : > { %v770_v15 = vpop.permute.xlu1 %769  ;;  %v543_v16 = vpop.permute.xlu0 %542 }
 0x107   : > { %v549_v17 = vsel %vm548_vm11, %v543_v16, %v545_v13  ;;  %v835_v18 = vld [vmem:[#allocation2 + $0x178] sm:$0xff]  ;;  %v1128_v13 = vld [vmem:[%s1872_s3 + $0x8] sm:$0xff]  ;;  %v1490_v16 = vmov 0.0|0.0  }
 0x108   : > { %974 = vmatprep.subr.bf16.mxu1 %v835_v18  ;;  %v1130_v18 = vld [vmem:[%s1872_s3 + $0x18] sm:$0xff] }
 0x109   : > { %975 = vmatpush1.bf16.msra.mxu1 %v749_v9 }
 0x10a   : > { %v768_v19 = vpop.permute.xlu1 %767  ;;  %v772_v20 = vpop.permute.xlu0 %771 }
 0x10b   : > { %v774_v21 = vsel %vm773_vm12, %v768_v19, %v770_v15  ;;  %v775_v22 = vsel %vm773_vm12, %v770_v15, %v772_v20  ;;  %v819_v23 = vld [vmem:[#allocation2 + $0xf8] sm:$0xff]  ;;  %v1349_v19 = vpack.c.bf16 %v1130_v18, %v1129_v14  ;;  %v1131_v20 = vld [vmem:[%s1872_s3 + $0x20] sm:$0xff] }
 0x10c   : > { %779 = vst.msk [vmem:[#allocation2 + $0x188] sm:$0xff] %vm206_vm0, %v775_v22  ;;  %937 = vmatprep.subr.bf16.mxu0 %v819_v23 }
 0x10d   : > { %938 = vmatpush1.bf16.msra.mxu0 %v549_v17  ;;  %v1346_v17 = vpack.c.bf16 %v1128_v13, %v1127_v12 }
 0x110   : > { %940 = vmatmul.mubr.bf16.vlgmr.msra.gmra.mrb[0].mxu0 %v1445_v24  ;;  %v1133_v24 = vld [vmem:[%s1872_s3 + $0x30] sm:$0xff] }
 0x111   : > { %949 = vmatprep.mubr.bf16.mxu0 %v1451_v25  ;;  %v1134_v25 = vld [vmem:[%s1872_s3 + $0x38] sm:$0xff] }
 0x113   : > { %v837_v26 = vld [vmem:[#allocation2 + $0x188] sm:$0xff] }
 0x114   : > { %976 = vmatprep.subr.bf16.mxu1 %v837_v26 }
 0x115   : > { %977 = vmatpush1.bf16.msra.mxu1 %v774_v21  ;;  %v1132_v21 = vld [vmem:[%s1872_s3 + $0x28] sm:$0xff] }
 0x116   : > { %1345 = vmatprep.subr.bf16.mxu1 %v1490_v16  ;;  %v1352_v23 = vpack.c.bf16 %v1132_v21, %v1131_v20 }
 0x118   : > { %993 = vmatmul.mubr.bf16.vlgmr.msra.gmra.mrb[0].mxu1 %v1448_v27  ;;  %950 = vmatmul.mubr.bf16.gmra.mrb[4].mxu0 %v1453_v28  ;;  %v1355_v27 = vpack.c.bf16 %v1134_v25, %v1133_v24  ;;  %v1135_v28 = vld [vmem:[%s1872_s3 + $0x40] sm:$0xff] }
 0x119   : > { %1336 = vmatprep.mubr.msk.bf16.mxu1 %vm900_vm5, %v1454_v29  ;;  %1347 = vmatpush1.bf16.msra.mxu1 %v1346_v17  ;;  %v1136_v29 = vld [vmem:[%s1872_s3 + $0x48] sm:$0xff]  ;;  %vm1491_vm5 = vmmov 1  }
 0x11a   : > { %1348 = vmatprep.subr.bf16.mxu1 %v1490_v16 }
 0x11b   : > { %v845_v35 = vpop.permute.xlu0 %844  ;;  %v850_v38 = vpop.permute.xlu1 %849 }
 0x11d   : > { %1350 = vmatpush1.bf16.msra.mxu1 %v1349_v19 }
 0x11e   : > { %1351 = vmatprep.subr.bf16.mxu1 %v1490_v16 }
 0x11f   : > { %v855_v54 = vpop.permute.xlu1 %854  ;;  %v860_v59 = vpop.permute.xlu0 %859 }
 0x120   : > { %1003 = vmatmul.mubr.bf16.gmra.mrb[4].mxu1 %v1456_v30  ;;  %v1358_v30 = vpack.c.bf16 %v1136_v29, %v1135_v28 }
 0x121   : > { %1353 = vmatpush1.bf16.msra.mxu1 %v1352_v23 }
 0x122   : > { %1354 = vmatprep.subr.bf16.mxu1 %v1490_v16 }
 0x125   : > { %1356 = vmatpush1.bf16.msra.mxu1 %v1355_v27 }
 0x126   : > { %1357 = vmatprep.subr.bf16.mxu1 %v1490_v16 }
 0x129   : > { %1359 = vmatpush1.bf16.msra.mxu1 %v1358_v30 }
 0x12a   : > { %1360 = vmatprep.subr.bf16.mxu1 %v1490_v16 }
 0x1e3   : > { %v941_v31 = vpop.f32.mrb[0].mxu0 }
 0x1e4   : > { %v943_v32 = vpop.f32.mrb[1].mxu0  ;;  %v942_v36 = vadd.f32 %v941_v31, %v845_v35  ;;  %v1137_v31 = vld [vmem:[%s1872_s3 + $0x50] sm:$0xff] }
 0x1e5   : > { %v945_v33 = vpop.f32.mrb[2].mxu0  ;;  %v944_v37 = vadd.f32 %v943_v32, %v845_v35  ;;  %v1138_v32 = vld [vmem:[%s1872_s3 + $0x58] sm:$0xff]  ;;  %v1140_v35 = vld [vmem:[%s1872_s3 + $0x68] sm:$0xff] }
 0x1e6   : > { %v947_v34 = vpop.f32.mrb[3].mxu0  ;;  %v946_v41 = vadd.f32 %v945_v33, %v850_v38  ;;  %v1361_v33 = vpack.c.bf16 %v1138_v32, %v1137_v31 }
 0x1e7   : > { %v948_v45 = vadd.f32 %v947_v34, %v850_v38  ;;  %v1139_v34 = vld [vmem:[%s1872_s3 + $0x60] sm:$0xff]  ;;  %v1142_v38 = vld [vmem:[%s1872_s3 + $0x78] sm:$0xff] }
 0x1e8   : > { %1362 = vmatpush1.bf16.msra.mxu1 %v1361_v33 }
 0x1e9   : > { %1363 = vmatprep.subr.bf16.mxu1 %v1490_v16 }
 0x1eb   : > { %v994_v39 = vpop.f32.mrb[0].mxu1  ;;  %v951_v40 = vpop.f32.mrb[4].mxu0 }
 0x1ec   : > { %v1681_v42 = vadd.f32 %v994_v39, %v942_v36  ;;  %v996_v43 = vpop.f32.mrb[1].mxu1  ;;  %v953_v44 = vpop.f32.mrb[5].mxu0  ;;  %v952_v58 = vadd.f32 %v951_v40, %v855_v54  ;;  %v1364_v36 = vpack.c.bf16 %v1140_v35, %v1139_v34  ;;  %v1143_v40 = vld [vmem:[%s1872_s3 + $0x80] sm:$0xff] }
 0x1ed   : > { %v997_v46 = vadd.f32 %v996_v43, %v944_v37  ;;  %v998_v47 = vpop.f32.mrb[2].mxu1  ;;  %v955_v48 = vpop.f32.mrb[6].mxu0  ;;  %v954_v60 = vadd.f32 %v953_v44, %v855_v54  ;;  %v1141_v37 = vld [vmem:[%s1872_s3 + $0x70] sm:$0xff] }
 0x1ee   : > { %v1013_v49 = vmax.f32 %v1681_v42, 0.0  ;;  %v1684_v50 = vadd.f32 %v998_v47, %v946_v41  ;;  %v1000_v51 = vpop.f32.mrb[3].mxu1  ;;  %v957_v52 = vpop.f32.mrb[7].mxu0  ;;  %v956_v62 = vadd.f32 %v955_v48, %v860_v59  ;;  %1365 = vmatpush1.bf16.msra.mxu1 %v1364_v36  ;;  %v1367_v39 = vpack.c.bf16 %v1142_v38, %v1141_v37  ;;  %v1144_v41 = vld [vmem:[%s1872_s3 + $0x88] sm:$0xff]  ;;  %v1145_v44 = vld [vmem:[%s1872_s3 + $0x90] sm:$0xff]  ;;  %v1147_v47 = vld [vmem:[%s1872_s3 + $0xa0] sm:$0xff] }
 0x1ef   : > { %v1014_v53 = vmax.f32 %v997_v46, 0.0  ;;  %v1001_v55 = vadd.f32 %v1000_v51, %v948_v45  ;;  %v958_v1 = vadd.f32 %v957_v52, %v860_v59  ;;  %1366 = vmatprep.subr.bf16.mxu1 %v1490_v16  ;;  %v1370_v43 = vpack.c.bf16 %v1144_v41, %v1143_v40  ;;  %v1146_v45 = vld [vmem:[%s1872_s3 + $0x98] sm:$0xff]  ;;  %v1148_v48 = vld [vmem:[%s1872_s3 + $0xa8] sm:$0xff]  ;;  %v1149_v52 = vld [vmem:[%s1872_s3 + $0xb0] sm:$0xff] }
 0x1f0   : > { %v1015_v56 = vmax.f32 %v1684_v50, 0.0  ;;  %1045 = vrot.lane.b32.xlu1 %v1013_v49, %s1466_s22  ;;  %v1373_v46 = vpack.c.bf16 %v1146_v45, %v1145_v44  ;;  %v1376_v51 = vpack.c.bf16 %v1148_v48, %v1147_v47  ;;  %v1153_v59 = vld [vmem:[%s1872_s3 + $0xd0] sm:$0xff] }
 0x1f1   : > { %1022 = vst.msk [vmem:[#allocation3 + $0x8] sm:$0xff] %vm206_vm0, %v1014_v53  ;;  %v1016_v57 = vmax.f32 %v1001_v55, 0.0  ;;  %v1150_v53 = vld [vmem:[%s1872_s3 + $0xb8] sm:$0xff]  ;;  %v1151_v55 = vld [vmem:[%s1872_s3 + $0xc0] sm:$0xff] }
 0x1f2   : > { %1368 = vmatpush1.bf16.msra.mxu1 %v1367_v39  ;;  %v1379_v54 = vpack.c.bf16 %v1150_v53, %v1149_v52 }
 0x1f3   : > { %1024 = vst.msk [vmem:[#allocation3 + $0x18] sm:$0xff] %vm206_vm0, %v1016_v57  ;;  %v1004_v61 = vpop.f32.mrb[4].mxu1  ;;  %1369 = vmatprep.subr.bf16.mxu1 %v1490_v16  ;;  %v1152_v57 = vld [vmem:[%s1872_s3 + $0xc8] sm:$0xff] }
 0x1f4   : > { %v1692_v63 = vadd.f32 %v1004_v61, %v952_v58  ;;  %v1006_v0 = vpop.f32.mrb[5].mxu1  ;;  %1049 = vrot.lane.b32.xlu1 %v1015_v56, %s1466_s22  ;;  %v1382_v58 = vpack.c.bf16 %v1152_v57, %v1151_v55 }
 0x1f5   : > { %v1007_v2 = vadd.f32 %v1006_v0, %v954_v60  ;;  %v1008_v3 = vpop.f32.mrb[6].mxu1  ;;  %v1154_v60 = vld [vmem:[%s1872_s3 + $0xd8] sm:$0xff]  ;;  %v1156_v0 = vld [vmem:[%s1872_s3 + $0xe8] sm:$0x1] }
 0x1f6   : > { %v1017_v4 = vmax.f32 %v1692_v63, 0.0  ;;  %v1698_v5 = vadd.f32 %v1008_v3, %v956_v62  ;;  %v1010_v6 = vpop.f32.mrb[7].mxu1  ;;  %1371 = vmatpush1.bf16.msra.mxu1 %v1370_v43  ;;  %v1385_v61 = vpack.c.bf16 %v1154_v60, %v1153_v59  ;;  %v1155_v62 = vld [vmem:[%s1872_s3 + $0xe0] sm:$0xff] }
 0x1f7   : > { %v1018_v7 = vmax.f32 %v1007_v2, 0.0  ;;  %v1011_v8 = vadd.f32 %v1010_v6, %v958_v1  ;;  %1372 = vmatprep.subr.bf16.mxu1 %v1490_v16  ;;  %v1388_v1 = vpack.c.bf16 %v1156_v0, %v1155_v62 }
 0x1f8   : > { %v1019_v9 = vmax.f32 %v1698_v5, 0.0  ;;  %v1701_v10 = vld [vmem:[#allocation3 + $0x8] sm:$0xff]  ;;  %1053 = vrot.lane.b32.xlu1 %v1017_v4, %s1466_s22 }
 0x1f9   : > { %1026 = vst.msk [vmem:[#allocation3 + $0x28] sm:$0xff] %vm206_vm0, %v1018_v7  ;;  %v1020_v11 = vmax.f32 %v1011_v8, 0.0  ;;  %1047 = vrot.lane.b32.xlu0 %v1701_v10, %s1466_s22 }
 0x1fa   : > { %v1719_v15 = vld [vmem:[#allocation3 + $0x18] sm:$0xff]  ;;  %1374 = vmatpush1.bf16.msra.mxu1 %v1373_v46 }
 0x1fb   : > { %1028 = vst.msk [vmem:[#allocation3 + $0x38] sm:$0xff] %vm206_vm0, %v1020_v11  ;;  %1375 = vmatprep.subr.bf16.mxu1 %v1490_v16  ;;  %vm1170_vm0 = vcmask 1040384  }
 0x1fc   : > { %1057 = vrot.lane.b32.xlu1 %v1019_v9, %s1466_s22  ;;  %vm1389_vm13 = vmpackc.low %vm1170_vm0, %vm1491_vm5 }
 0x1fd   : > { %1051 = vrot.lane.b32.xlu0 %v1719_v15, %s1466_s22 }
 0x1fe   : > { %1377 = vmatpush1.bf16.msra.mxu1 %v1376_v51 }
 0x1ff   : > { %1378 = vmatprep.subr.bf16.mxu1 %v1490_v16 }
 0x200   : > { %v1737_v22 = vld [vmem:[#allocation3 + $0x28] sm:$0xff] }
 0x201   : > { %1055 = vrot.lane.b32.xlu0 %v1737_v22, %s1466_s22 }
 0x202   : > { %v1748_v26 = vld [vmem:[#allocation3 + $0x38] sm:$0xff]  ;;  %1380 = vmatpush1.bf16.msra.mxu1 %v1379_v54 }
 0x203   : > { %1381 = vmatprep.subr.bf16.mxu1 %v1490_v16 }
 0x205   : > { %1059 = vrot.lane.b32.xlu0 %v1748_v26, %s1466_s22 }
 0x206   : > { %1383 = vmatpush1.bf16.msra.mxu1 %v1382_v58 }
 0x207   : > { %1384 = vmatprep.subr.bf16.mxu1 %v1490_v16 }
 0x20a   : > { %1386 = vmatpush1.bf16.msra.mxu1 %v1385_v61 }
 0x20b   : > { %1387 = vmatprep.subr.bf16.mxu1 %v1490_v16 }
 0x20e   : > { %1390 = vmatpush1.bf16.msk.msra.mxu1 %vm1389_vm13, %v1388_v1 }
 0x262   : > { %v1046_v2 = vpop.permute.xlu1 %1045 }
 0x266   : > { %v1050_v6 = vpop.permute.xlu1 %1049 }
 0x26a   : > { %v1054_v17 = vpop.permute.xlu1 %1053 }
 0x26b   : > { %v1048_v3 = vpop.permute.xlu0 %1047 }
 0x26c   : > { %v1062_v7 = vsel %vm220_vm2, %v1046_v2, %v1048_v3  ;;  %v1075_v8 = vmax.f32 %v1701_v10, %v1048_v3 }
 0x26d   : > { %v1074_v11 = vmax.f32 %v1013_v49, %v1062_v7 }
 0x26e   : > { %1092 = vrot.lane.b32.xlu0 %v1075_v8, %s1469_s25  ;;  %v1058_v19 = vpop.permute.xlu1 %1057 }
 0x26f   : > { %v1052_v12 = vpop.permute.xlu0 %1051  ;;  %1090 = vrot.lane.b32.xlu1 %v1074_v11, %s1469_s25 }
 0x270   : > { %v1063_v13 = vsel %vm220_vm2, %v1050_v6, %v1052_v12  ;;  %v1077_v14 = vmax.f32 %v1719_v15, %v1052_v12 }
 0x271   : > { %v1076_v16 = vmax.f32 %v1015_v56, %v1063_v13 }
 0x272   : > { %1096 = vrot.lane.b32.xlu0 %v1077_v14, %s1469_s25 }
 0x273   : > { %v1056_v18 = vpop.permute.xlu0 %1055  ;;  %1094 = vrot.lane.b32.xlu1 %v1076_v16, %s1469_s25 }
 0x274   : > { %v1064_v42 = vsel %vm220_vm2, %v1054_v17, %v1056_v18  ;;  %v1079_v49 = vmax.f32 %v1737_v22, %v1056_v18 }
 0x275   : > { %v1078_v10 = vmax.f32 %v1017_v4, %v1064_v42 }
 0x276   : > { %1100 = vrot.lane.b32.xlu0 %v1079_v49, %s1469_s25 }
 0x277   : > { %v1060_v15 = vpop.permute.xlu0 %1059  ;;  %1098 = vrot.lane.b32.xlu1 %v1078_v10, %s1469_s25 }
 0x278   : > { %v1065_v50 = vsel %vm220_vm2, %v1058_v19, %v1060_v15  ;;  %v1081_v56 = vmax.f32 %v1748_v26, %v1060_v15  ;;  %vm1259_vm2 = vcmask 400384  }
 0x279   : > { %v1080_v20 = vmax.f32 %v1019_v9, %v1065_v50 }
 0x27a   : > { %1104 = vrot.lane.b32.xlu0 %v1081_v56, %s1469_s25 }
 0x27b   : > { %1102 = vrot.lane.b32.xlu1 %v1080_v20, %s1469_s25  ;;  %s1344_s25 = sshll.u32 %s1875_s16, 5 }
 0x27c   : > { %s197_s17 = scalar_lea.vmem %s1873_s4, %s1344_s25 }
 0x2e0   : > { %v1093_v21 = vpop.permute.xlu0 %1092 }
 0x2e1   : > { %v1120_v63 = vmax.f32 %v1075_v8, %v1093_v21  ;;  %v1091_v4 = vpop.permute.xlu1 %1090 }
 0x2e2   : > { %v1107_v22 = vsel %vm298_vm4, %v1091_v4, %v1093_v21 }
 0x2e3   : > { %v1119_v23 = vmax.f32 %v1074_v11, %v1107_v22  ;;  %1338 = vmatprep.mubr.msk.f32.mxu1 %vm1157_vm14, %v1120_v63 }
 0x2e4   : > { %v1097_v24 = vpop.permute.xlu0 %1096 }
 0x2e5   : > { %v1122_v25 = vmax.f32 %v1077_v14, %v1097_v24  ;;  %1239 = vmatmul.mubr.f32.vlgmr.msra.gmra.mrb[8].mxu1 %v1119_v23  ;;  %v1095_v26 = vpop.permute.xlu1 %1094 }
 0x2e6   : > { %v1108_v5 = vsel %vm298_vm4, %v1095_v26, %v1097_v24 }
 0x2e7   : > { %v1121_v9 = vmax.f32 %v1076_v16, %v1108_v5  ;;  %1339 = vmatprep.mubr.msk.f32.mxu1 %vm1157_vm14, %v1122_v25 }
 0x2e8   : > { %v1101_v27 = vpop.permute.xlu0 %1100 }
 0x2e9   : > { %v1124_v28 = vmax.f32 %v1079_v49, %v1101_v27  ;;  %1244 = vmatmul.mubr.f32.gmra.mrb[10].mxu1 %v1121_v9  ;;  %v1099_v29 = vpop.permute.xlu1 %1098 }
 0x2ea   : > { %v1109_v30 = vsel %vm298_vm4, %v1099_v29, %v1101_v27 }
 0x2eb   : > { %v1123_v31 = vmax.f32 %v1078_v10, %v1109_v30  ;;  %1340 = vmatprep.mubr.msk.f32.mxu1 %vm1157_vm14, %v1124_v28 }
 0x2ec   : > { %v1105_v32 = vpop.permute.xlu0 %1104 }
 0x2ed   : > { %v1126_v33 = vmax.f32 %v1081_v56, %v1105_v32  ;;  %1249 = vmatmul.mubr.f32.gmra.mrb[12].mxu1 %v1123_v31  ;;  %v1103_v34 = vpop.permute.xlu1 %1102 }
 0x2ee   : > { %v1110_v35 = vsel %vm298_vm4, %v1103_v34, %v1105_v32 }
 0x2ef   : > { %v1125_v36 = vmax.f32 %v1080_v20, %v1110_v35  ;;  %1341 = vmatprep.mubr.msk.f32.mxu1 %vm1157_vm14, %v1126_v33 }
 0x2f1   : > { %1254 = vmatmul.mubr.f32.gmra.mrb[14].mxu1 %v1125_v36 }
 0x3b8   : > { %v1240_v37 = vpop.f32.mrb[8].mxu1 }
 0x3b9   : > { %1260 = vst.msk [vmem:[%s197_s17] sm:$0xff] %vm1259_vm2, %v1240_v37  ;;  %v1242_v38 = vpop.f32.mrb[9].mxu1 }
 0x3bc   : > { %v1245_v39 = vpop.f32.mrb[10].mxu1 }
 0x3bd   : > { %1261 = vst.msk [vmem:[%s197_s17 + $0x8] sm:$0xff] %vm1259_vm2, %v1245_v39  ;;  %v1247_v40 = vpop.f32.mrb[11].mxu1 }
 0x3c0   : > { %v1250_v41 = vpop.f32.mrb[12].mxu1 }
 0x3c1   : > { %1262 = vst.msk [vmem:[%s197_s17 + $0x10] sm:$0xff] %vm1259_vm2, %v1250_v41  ;;  %v1252_v43 = vpop.f32.mrb[13].mxu1 }
 0x3c4   : > { %v1255_v44 = vpop.f32.mrb[14].mxu1 }
 0x3c5   : > { %1263 = vst.msk [vmem:[%s197_s17 + $0x18] sm:$0xff] %vm1259_vm2, %v1255_v44  ;;  %v1257_v45 = vpop.f32.mrb[15].mxu1 }
 0x3c6 PF: > { %s14_s15 = sadd.s32 1, %s1463_s15  }
 0x3c7   : > { %p11_p4 = scmp.ge.s32.totalorder %s14_s15, 4  }
 0x3c9   :  { %13 = sbr.rel (!%p11_p4) target bundleno = 1 (0x1), region = 66 }

// kernel: convnet_forward.5
= control target key start
LH: loop header
LB: loop body
LE: loop exit
PB: predicated region body
PF: predicated region fallthrough
CT: control target
= control target key end

     0   :  { %v1573_v43 = vmov 1983009808   ;;  %v242_v45 = vlaneseq  ;;  %s2332_s0 = inlined_call_operand.vmem [shape: f32[2,1568], index: 0, kind: input, shape index: {}]   ;;  %s2333_s1 = inlined_call_operand.vmem [shape: f32[1568,128], index: 1, kind: input, shape index: {}]   ;;  %s2334_s2 = inlined_call_operand.vmem [shape: f32[1,128], index: 2, kind: input, shape index: {}]   ;;  %s2335_s3 = inlined_call_operand.vmem [shape: f32[128,32], index: 3, kind: input, shape index: {}]   ;;  %s2336_s4 = inlined_call_operand.vmem [shape: f32[1,32], index: 4, kind: input, shape index: {}]   ;;  %s2337_s5 = inlined_call_operand.vmem [shape: f32[32,10], index: 5, kind: input, shape index: {}]   ;;  %s2338_s6 = inlined_call_operand.vmem [shape: f32[1,10], index: 6, kind: input, shape index: {}]   ;;  %s2339_s7 = inlined_call_operand.hbm [shape: f32[2,10], index: 7, kind: output, shape index: {}]  }
   0x1   :  { %v47_v0 = vld [vmem:[%s2333_s1 + $0x80] sm:$0xff]  ;;  %v48_v1 = vld [vmem:[%s2333_s1 + $0x88] sm:$0xff]  ;;  %v49_v11 = vld [vmem:[%s2333_s1 + $0x90] sm:$0xff]  ;;  %v240_v44 = vunpack.c.l.s4 %v1573_v43 }
   0x2   :  { %v31_v2 = vld [vmem:[%s2333_s1] sm:$0xff]  ;;  %v1309_v3 = vpack.c.bf16 %v48_v1, %v47_v0  ;;  %v32_v4 = vld [vmem:[%s2333_s1 + $0x8] sm:$0xff]  ;;  %v50_v13 = vld [vmem:[%s2333_s1 + $0x98] sm:$0xff]  ;;  %v243_v60 = vshrl.u32 %v242_v45, 7 }
   0x3   :  { %v79_v5 = vld [vmem:[%s2333_s1 + $0x180] sm:$0xff]  ;;  %v80_v6 = vld [vmem:[%s2333_s1 + $0x188] sm:$0xff]  ;;  %v1311_v7 = vpack.c.bf16 %v32_v4, %v31_v2  ;;  %v33_v14 = vld [vmem:[%s2333_s1 + $0x10] sm:$0xff]  ;;  %v1313_v16 = vpack.c.bf16 %v50_v13, %v49_v11  ;;  %v241_v59 = vunpack.c.0.s8 %v240_v44 }
   0x4   :  { %v1341_v8 = vpack.c.bf16 %v80_v6, %v79_v5  ;;  %v63_v9 = vld [vmem:[%s2333_s1 + $0x100] sm:$0xff]  ;;  %v64_v10 = vld [vmem:[%s2333_s1 + $0x108] sm:$0xff]  ;;  %1310 = vmatprep.subr.bf16.mxu0 %v1309_v3  ;;  %v34_v15 = vld [vmem:[%s2333_s1 + $0x18] sm:$0xff] }
   0x5   :  { %v1343_v12 = vpack.c.bf16 %v64_v10, %v63_v9  ;;  %1312 = vmatpush3.bf16.msra.mxu0 %v1311_v7  ;;  %v1315_v17 = vpack.c.bf16 %v34_v15, %v33_v14  ;;  %v81_v18 = vld [vmem:[%s2333_s1 + $0x190] sm:$0xff]  ;;  %v82_v19 = vld [vmem:[%s2333_s1 + $0x198] sm:$0xff]  ;;  %v51_v23 = vld [vmem:[%s2333_s1 + $0xa0] sm:$0xff]  ;;  %v1762_v10 = vsub.s32 %v241_v59, %v243_v60 }
   0x6   :  { %1342 = vmatprep.subr.bf16.mxu1 %v1341_v8  ;;  %v65_v20 = vld [vmem:[%s2333_s1 + $0x110] sm:$0xff]  ;;  %v1345_v21 = vpack.c.bf16 %v82_v19, %v81_v18  ;;  %v66_v22 = vld [vmem:[%s2333_s1 + $0x118] sm:$0xff]  ;;  %v52_v24 = vld [vmem:[%s2333_s1 + $0xa8] sm:$0xff]  ;;  %1314 = vmatprep.subr.bf16.mxu0 %v1313_v16 }
   0x7   :  { %1344 = vmatpush3.bf16.msra.mxu1 %v1343_v12  ;;  %v1347_v25 = vpack.c.bf16 %v66_v22, %v65_v20  ;;  %v1317_v26 = vpack.c.bf16 %v52_v24, %v51_v23  ;;  %v35_v27 = vld [vmem:[%s2333_s1 + $0x20] sm:$0xff]  ;;  %v36_v28 = vld [vmem:[%s2333_s1 + $0x28] sm:$0xff]  ;;  %v53_v35 = vld [vmem:[%s2333_s1 + $0xb0] sm:$0xff] }
   0x8   :  { %v83_v29 = vld [vmem:[%s2333_s1 + $0x1a0] sm:$0xff]  ;;  %1346 = vmatprep.subr.bf16.mxu1 %v1345_v21  ;;  %v84_v30 = vld [vmem:[%s2333_s1 + $0x1a8] sm:$0xff]  ;;  %v1319_v33 = vpack.c.bf16 %v36_v28, %v35_v27  ;;  %v54_v36 = vld [vmem:[%s2333_s1 + $0xb8] sm:$0xff] }
   0x9   :  { %v67_v31 = vld [vmem:[%s2333_s1 + $0x120] sm:$0xff]  ;;  %v68_v32 = vld [vmem:[%s2333_s1 + $0x128] sm:$0xff]  ;;  %1316 = vmatpush3.bf16.msra.mxu0 %v1315_v17  ;;  %v1349_v34 = vpack.c.bf16 %v84_v30, %v83_v29  ;;  %v37_v37 = vld [vmem:[%s2333_s1 + $0x30] sm:$0xff]  ;;  %v1321_v39 = vpack.c.bf16 %v54_v36, %v53_v35 }
   0xa   :  { %1318 = vmatprep.subr.bf16.mxu0 %v1317_v26  ;;  %v1351_v38 = vpack.c.bf16 %v68_v32, %v67_v31  ;;  %v38_v40 = vld [vmem:[%s2333_s1 + $0x38] sm:$0xff]  ;;  %v85_v41 = vld [vmem:[%s2333_s1 + $0x1b0] sm:$0xff]  ;;  %v55_v49 = vld [vmem:[%s2333_s1 + $0xc0] sm:$0xff] }
   0xb   :  { %1348 = vmatpush3.bf16.msra.mxu1 %v1347_v25  ;;  %v86_v42 = vld [vmem:[%s2333_s1 + $0x1b8] sm:$0xff]  ;;  %v69_v47 = vld [vmem:[%s2333_s1 + $0x130] sm:$0xff]  ;;  %v56_v50 = vld [vmem:[%s2333_s1 + $0xc8] sm:$0xff]  ;;  %v1323_v51 = vpack.c.bf16 %v38_v40, %v37_v37 }
   0xc   :  { %1350 = vmatprep.subr.bf16.mxu1 %v1349_v34  ;;  %v1353_v46 = vpack.c.bf16 %v86_v42, %v85_v41  ;;  %v70_v48 = vld [vmem:[%s2333_s1 + $0x138] sm:$0xff]  ;;  %v87_v52 = vld [vmem:[%s2333_s1 + $0x1c0] sm:$0xff]  ;;  %v88_v53 = vld [vmem:[%s2333_s1 + $0x1c8] sm:$0xff]  ;;  %v1325_v55 = vpack.c.bf16 %v56_v50, %v55_v49 }
   0xd   :  { %1320 = vmatpush3.bf16.msra.mxu0 %v1319_v33  ;;  %v1355_v54 = vpack.c.bf16 %v70_v48, %v69_v47  ;;  %v39_v56 = vld [vmem:[%s2333_s1 + $0x40] sm:$0xff]  ;;  %v40_v57 = vld [vmem:[%s2333_s1 + $0x48] sm:$0xff]  ;;  %v1357_v61 = vpack.c.bf16 %v88_v53, %v87_v52  ;;  %v57_v63 = vld [vmem:[%s2333_s1 + $0xd0] sm:$0xff] }
   0xe   :  { %1322 = vmatprep.subr.bf16.mxu0 %v1321_v39  ;;  %v71_v58 = vld [vmem:[%s2333_s1 + $0x140] sm:$0xff]  ;;  %v72_v62 = vld [vmem:[%s2333_s1 + $0x148] sm:$0xff]  ;;  %v58_v0 = vld [vmem:[%s2333_s1 + $0xd8] sm:$0xff]  ;;  %v1327_v3 = vpack.c.bf16 %v40_v57, %v39_v56 }
   0xf   :  { %1352 = vmatpush3.bf16.msra.mxu1 %v1351_v38  ;;  %v89_v1 = vld [vmem:[%s2333_s1 + $0x1d0] sm:$0xff]  ;;  %v90_v2 = vld [vmem:[%s2333_s1 + $0x1d8] sm:$0xff]  ;;  %v1359_v5 = vpack.c.bf16 %v72_v62, %v71_v58  ;;  %v1329_v6 = vpack.c.bf16 %v58_v0, %v57_v63  ;;  %v59_v12 = vld [vmem:[%s2333_s1 + $0xe0] sm:$0xff] }
  0x10   :  { %1354 = vmatprep.subr.bf16.mxu1 %v1353_v46  ;;  %v41_v4 = vld [vmem:[%s2333_s1 + $0x50] sm:$0xff]  ;;  %v42_v7 = vld [vmem:[%s2333_s1 + $0x58] sm:$0xff]  ;;  %v1361_v11 = vpack.c.bf16 %v90_v2, %v89_v1  ;;  %v60_v13 = vld [vmem:[%s2333_s1 + $0xe8] sm:$0xff] }
  0x11   :  { %1324 = vmatpush3.bf16.msra.mxu0 %v1323_v51  ;;  %v73_v8 = vld [vmem:[%s2333_s1 + $0x150] sm:$0xff]  ;;  %v74_v9 = vld [vmem:[%s2333_s1 + $0x158] sm:$0xff]  ;;  %v91_v14 = vld [vmem:[%s2333_s1 + $0x1e0] sm:$0xff]  ;;  %v1331_v16 = vpack.c.bf16 %v42_v7, %v41_v4  ;;  %v1333_v19 = vpack.c.bf16 %v60_v13, %v59_v12 }
  0x12   :  { %1326 = vmatprep.subr.bf16.mxu0 %v1325_v55  ;;  %v92_v15 = vld [vmem:[%s2333_s1 + $0x1e8] sm:$0xff]  ;;  %v1363_v17 = vpack.c.bf16 %v74_v9, %v73_v8  ;;  %v27_v18 = vld [vmem:[%s2332_s0] sm:$0xff]  ;;  %v61_v27 = vld [vmem:[%s2333_s1 + $0xf0] sm:$0xff] }
  0x13   :  { %1356 = vmatpush3.bf16.msra.mxu1 %v1355_v54  ;;  %v43_v20 = vld [vmem:[%s2333_s1 + $0x60] sm:$0xff]  ;;  %v44_v21 = vld [vmem:[%s2333_s1 + $0x68] sm:$0xff]  ;;  %v245_v23 = vrot.slane %v27_v18, %v1762_v10  ;;  %v238_v24 = vcombine.high %v27_v18, %v27_v18  ;;  %v1365_v25 = vpack.c.bf16 %v92_v15, %v91_v14  ;;  %v62_v28 = vld [vmem:[%s2333_s1 + $0xf8] sm:$0xff] }
  0x14   :  { %1358 = vmatprep.subr.bf16.mxu1 %v1357_v61  ;;  %v75_v22 = vld [vmem:[%s2333_s1 + $0x160] sm:$0xff]  ;;  %v76_v26 = vld [vmem:[%s2333_s1 + $0x168] sm:$0xff]  ;;  %v93_v29 = vld [vmem:[%s2333_s1 + $0x1f0] sm:$0xff]  ;;  %v1335_v33 = vpack.c.bf16 %v44_v21, %v43_v20  ;;  %v1337_v35 = vpack.c.bf16 %v62_v28, %v61_v27 }
  0x15   :  { %1328 = vmatpush3.bf16.msra.mxu0 %v1327_v3  ;;  %v94_v30 = vld [vmem:[%s2333_s1 + $0x1f8] sm:$0xff]  ;;  %v253_v31 = vcombine.high %v245_v23, %v245_v23  ;;  %v252_v32 = vrot.slane %v238_v24, %v1762_v10  ;;  %v1367_v34 = vpack.c.bf16 %v76_v26, %v75_v22  ;;  %v45_v36 = vld [vmem:[%s2333_s1 + $0x70] sm:$0xff]  ;;  %v111_v42 = vld [vmem:[%s2333_s1 + $0x280] sm:$0xff] }
  0x16   :  { %1330 = vmatprep.subr.bf16.mxu0 %v1329_v6  ;;  %v46_v37 = vld [vmem:[%s2333_s1 + $0x78] sm:$0xff]  ;;  %v77_v38 = vld [vmem:[%s2333_s1 + $0x170] sm:$0xff]  ;;  %v1369_v40 = vpack.c.bf16 %v94_v30, %v93_v29  ;;  %v112_v43 = vld [vmem:[%s2333_s1 + $0x288] sm:$0xff] }
  0x17   :  { %1360 = vmatpush3.bf16.msra.mxu1 %v1359_v5  ;;  %v254_v39 = vcombine.high %v252_v32, %v252_v32  ;;  %375 = vmatprep.mubr.f32.mxu0 %v253_v31  ;;  %v78_v41 = vld [vmem:[%s2333_s1 + $0x178] sm:$0xff]  ;;  %v143_v44 = vld [vmem:[%s2333_s1 + $0x380] sm:$0xff]  ;;  %v144_v45 = vld [vmem:[%s2333_s1 + $0x388] sm:$0xff]  ;;  %v1339_v46 = vpack.c.bf16 %v46_v37, %v45_v36  ;;  %v1373_v48 = vpack.c.bf16 %v112_v43, %v111_v42 }
  0x18   :  { %1362 = vmatprep.subr.bf16.mxu1 %v1361_v11  ;;  %v1371_v47 = vpack.c.bf16 %v78_v41, %v77_v38  ;;  %v95_v49 = vld [vmem:[%s2333_s1 + $0x200] sm:$0xff]  ;;  %v96_v50 = vld [vmem:[%s2333_s1 + $0x208] sm:$0xff]  ;;  %v1405_v52 = vpack.c.bf16 %v144_v45, %v143_v44  ;;  %v113_v54 = vld [vmem:[%s2333_s1 + $0x290] sm:$0xff] }
  0x19   :  { %1332 = vmatpush3.bf16.msra.mxu0 %v1331_v16  ;;  %445 = vmatprep.mubr.f32.mxu1 %v254_v39  ;;  %v127_v51 = vld [vmem:[%s2333_s1 + $0x300] sm:$0xff]  ;;  %v128_v53 = vld [vmem:[%s2333_s1 + $0x308] sm:$0xff]  ;;  %v114_v55 = vld [vmem:[%s2333_s1 + $0x298] sm:$0xff]  ;;  %v1375_v58 = vpack.c.bf16 %v96_v50, %v95_v49 }
  0x1a   :  { %1334 = vmatprep.subr.bf16.mxu0 %v1333_v19  ;;  %v145_v56 = vld [vmem:[%s2333_s1 + $0x390] sm:$0xff]  ;;  %v146_v57 = vld [vmem:[%s2333_s1 + $0x398] sm:$0xff]  ;;  %v1407_v59 = vpack.c.bf16 %v128_v53, %v127_v51  ;;  %v1377_v60 = vpack.c.bf16 %v114_v55, %v113_v54  ;;  %v115_v2 = vld [vmem:[%s2333_s1 + $0x2a0] sm:$0xff] }
  0x1b   :  { %1364 = vmatpush3.bf16.msra.mxu1 %v1363_v17  ;;  %v97_v61 = vld [vmem:[%s2333_s1 + $0x210] sm:$0xff]  ;;  %v98_v62 = vld [vmem:[%s2333_s1 + $0x218] sm:$0xff]  ;;  %v1409_v0 = vpack.c.bf16 %v146_v57, %v145_v56  ;;  %v116_v3 = vld [vmem:[%s2333_s1 + $0x2a8] sm:$0xff] }
  0x1c   :  { %1366 = vmatprep.subr.bf16.mxu1 %v1365_v25  ;;  %v129_v63 = vld [vmem:[%s2333_s1 + $0x310] sm:$0xff]  ;;  %v130_v1 = vld [vmem:[%s2333_s1 + $0x318] sm:$0xff]  ;;  %v147_v4 = vld [vmem:[%s2333_s1 + $0x3a0] sm:$0xff]  ;;  %v1379_v6 = vpack.c.bf16 %v98_v62, %v97_v61  ;;  %v1381_v8 = vpack.c.bf16 %v116_v3, %v115_v2 }
  0x1d   :  { %1336 = vmatpush3.bf16.msra.mxu0 %v1335_v33  ;;  %v148_v5 = vld [vmem:[%s2333_s1 + $0x3a8] sm:$0xff]  ;;  %v1411_v7 = vpack.c.bf16 %v130_v1, %v129_v63  ;;  %v99_v9 = vld [vmem:[%s2333_s1 + $0x220] sm:$0xff]  ;;  %v117_v15 = vld [vmem:[%s2333_s1 + $0x2b0] sm:$0xff] }
  0x1e   :  { %1338 = vmatprep.subr.bf16.mxu0 %v1337_v35  ;;  %v100_v11 = vld [vmem:[%s2333_s1 + $0x228] sm:$0xff]  ;;  %v131_v12 = vld [vmem:[%s2333_s1 + $0x320] sm:$0xff]  ;;  %v1413_v13 = vpack.c.bf16 %v148_v5, %v147_v4  ;;  %v118_v16 = vld [vmem:[%s2333_s1 + $0x2b8] sm:$0xff] }
  0x1f   :  { %1368 = vmatpush3.bf16.msra.mxu1 %v1367_v34  ;;  %v132_v14 = vld [vmem:[%s2333_s1 + $0x328] sm:$0xff]  ;;  %v149_v17 = vld [vmem:[%s2333_s1 + $0x3b0] sm:$0xff]  ;;  %v150_v18 = vld [vmem:[%s2333_s1 + $0x3b8] sm:$0xff]  ;;  %v1383_v19 = vpack.c.bf16 %v100_v11, %v99_v9  ;;  %v1385_v22 = vpack.c.bf16 %v118_v16, %v117_v15 }
  0x20   :  { %1370 = vmatprep.subr.bf16.mxu1 %v1369_v40  ;;  %v101_v20 = vld [vmem:[%s2333_s1 + $0x230] sm:$0xff]  ;;  %v1415_v21 = vpack.c.bf16 %v132_v14, %v131_v12  ;;  %v134_v25 = vld [vmem:[%s2333_s1 + $0x338] sm:$0xff]  ;;  %v1417_v26 = vpack.c.bf16 %v150_v18, %v149_v17  ;;  %v119_v27 = vld [vmem:[%s2333_s1 + $0x2c0] sm:$0xff] }
  0x21   :  { %1340 = vmatpush3.bf16.msra.mxu0 %v1339_v46  ;;  %v133_v24 = vld [vmem:[%s2333_s1 + $0x330] sm:$0xff]  ;;  %v120_v28 = vld [vmem:[%s2333_s1 + $0x2c8] sm:$0xff]  ;;  %v151_v30 = vld [vmem:[%s2333_s1 + $0x3c0] sm:$0xff] }
  0x22   :  { %1374 = vmatprep.subr.bf16.mxu0 %v1373_v48  ;;  %v28_v29 = vld [vmem:[%s2332_s0 + $0x8] sm:$0xff]  ;;  %v1419_v35 = vpack.c.bf16 %v134_v25, %v133_v24  ;;  %v1389_v36 = vpack.c.bf16 %v120_v28, %v119_v27  ;;  %v103_v37 = vld [vmem:[%s2333_s1 + $0x240] sm:$0xff]  ;;  %v121_v44 = vld [vmem:[%s2333_s1 + $0x2d0] sm:$0xff] }
  0x23   :  { %1372 = vmatpush3.bf16.msra.mxu1 %v1371_v47  ;;  %v152_v31 = vld [vmem:[%s2333_s1 + $0x3c8] sm:$0xff]  ;;  %v255_v33 = vcombine.high %v28_v29, %v28_v29  ;;  %v135_v39 = vld [vmem:[%s2333_s1 + $0x340] sm:$0xff]  ;;  %v122_v45 = vld [vmem:[%s2333_s1 + $0x2d8] sm:$0xff] }
  0x24   :  { %1406 = vmatprep.subr.bf16.mxu1 %v1405_v52  ;;  %376 = vmatmul.mubr.f32.vlgmr.msra.gmra.mrb[0].mxu0 %v245_v23  ;;  %v102_v23 = vld [vmem:[%s2333_s1 + $0x238] sm:$0xff]  ;;  %v104_v38 = vld [vmem:[%s2333_s1 + $0x248] sm:$0xff]  ;;  %v1421_v42 = vpack.c.bf16 %v152_v31, %v151_v30  ;;  %v153_v46 = vld [vmem:[%s2333_s1 + $0x3d0] sm:$0xff]  ;;  %v1393_v51 = vpack.c.bf16 %v122_v45, %v121_v44 }
  0x25   :  { %1376 = vmatpush3.bf16.msra.mxu0 %v1375_v58  ;;  %v1387_v34 = vpack.c.bf16 %v102_v23, %v101_v20  ;;  %v1943_v41 = vrot.slane %v255_v33, %v1762_v10  ;;  %v136_v43 = vld [vmem:[%s2333_s1 + $0x348] sm:$0xff]  ;;  %v154_v47 = vld [vmem:[%s2333_s1 + $0x3d8] sm:$0xff]  ;;  %v1391_v49 = vpack.c.bf16 %v104_v38, %v103_v37  ;;  %v105_v52 = vld [vmem:[%s2333_s1 + $0x250] sm:$0xff] }
  0x26   :  { %446 = vmatmul.mubr.f32.vlgmr.msra.gmra.mrb[0].mxu1 %v252_v32  ;;  %1378 = vmatprep.subr.bf16.mxu0 %v1377_v60  ;;  %v1929_v32 = vrot.slane %v28_v29, %v1762_v10  ;;  %v1423_v50 = vpack.c.bf16 %v136_v43, %v135_v39  ;;  %v106_v53 = vld [vmem:[%s2333_s1 + $0x258] sm:$0xff]  ;;  %v137_v54 = vld [vmem:[%s2333_s1 + $0x350] sm:$0xff]  ;;  %v1425_v55 = vpack.c.bf16 %v154_v47, %v153_v46  ;;  %v123_v57 = vld [vmem:[%s2333_s1 + $0x2e0] sm:$0xff] }
  0x27   :  { %1408 = vmatpush3.bf16.msra.mxu1 %v1407_v59  ;;  %v271_v48 = vcombine.high %v1943_v41, %v1943_v41  ;;  %v138_v56 = vld [vmem:[%s2333_s1 + $0x358] sm:$0xff]  ;;  %v124_v58 = vld [vmem:[%s2333_s1 + $0x2e8] sm:$0xff]  ;;  %v155_v59 = vld [vmem:[%s2333_s1 + $0x3e0] sm:$0xff]  ;;  %v1395_v61 = vpack.c.bf16 %v106_v53, %v105_v52 }
  0x28   :  { %1410 = vmatprep.subr.bf16.mxu1 %v1409_v0  ;;  %v270_v40 = vcombine.high %v1929_v32, %v1929_v32  ;;  %v156_v60 = vld [vmem:[%s2333_s1 + $0x3e8] sm:$0xff]  ;;  %v1427_v62 = vpack.c.bf16 %v138_v56, %v137_v54  ;;  %v1397_v63 = vpack.c.bf16 %v124_v58, %v123_v57  ;;  %v107_v0 = vld [vmem:[%s2333_s1 + $0x260] sm:$0xff]  ;;  %v125_v5 = vld [vmem:[%s2333_s1 + $0x2f0] sm:$0xff] }
  0x29   :  { %1380 = vmatpush3.bf16.msra.mxu0 %v1379_v6  ;;  %585 = vmatprep.mubr.f32.mxu1 %v271_v48  ;;  %v108_v1 = vld [vmem:[%s2333_s1 + $0x268] sm:$0xff]  ;;  %v139_v2 = vld [vmem:[%s2333_s1 + $0x360] sm:$0xff]  ;;  %v1429_v3 = vpack.c.bf16 %v156_v60, %v155_v59  ;;  %v126_v6 = vld [vmem:[%s2333_s1 + $0x2f8] sm:$0xff] }
  0x2a   :  { %1382 = vmatprep.subr.bf16.mxu0 %v1381_v8  ;;  %515 = vmatprep.mubr.f32.mxu0 %v270_v40  ;;  %v140_v4 = vld [vmem:[%s2333_s1 + $0x368] sm:$0xff]  ;;  %v158_v8 = vld [vmem:[%s2333_s1 + $0x3f8] sm:$0xff]  ;;  %v1399_v9 = vpack.c.bf16 %v108_v1, %v107_v0  ;;  %v1401_v12 = vpack.c.bf16 %v126_v6, %v125_v5  ;;  %v141_v15 = vld [vmem:[%s2333_s1 + $0x370] sm:$0xff] }
  0x2b   :  { %1412 = vmatpush3.bf16.msra.mxu1 %v1411_v7  ;;  %v157_v7 = vld [vmem:[%s2333_s1 + $0x3f0] sm:$0xff]  ;;  %v1431_v11 = vpack.c.bf16 %v140_v4, %v139_v2  ;;  %v110_v14 = vld [vmem:[%s2333_s1 + $0x278] sm:$0xff]  ;;  %v175_v18 = vld [vmem:[%s2333_s1 + $0x480] sm:$0xff] }
  0x2c   :  { %1414 = vmatprep.subr.bf16.mxu1 %v1413_v13  ;;  %v109_v13 = vld [vmem:[%s2333_s1 + $0x270] sm:$0xff]  ;;  %v1433_v16 = vpack.c.bf16 %v158_v8, %v157_v7  ;;  %v142_v17 = vld [vmem:[%s2333_s1 + $0x378] sm:$0xff]  ;;  %v207_v20 = vld [vmem:[%s2333_s1 + $0x580] sm:$0xff] }
  0x2d   :  { %1384 = vmatpush3.bf16.msra.mxu0 %v1383_v19  ;;  %v176_v19 = vld [vmem:[%s2333_s1 + $0x488] sm:$0xff]  ;;  %v159_v23 = vld [vmem:[%s2333_s1 + $0x400] sm:$0xff]  ;;  %v1435_v24 = vpack.c.bf16 %v142_v17, %v141_v15  ;;  %v177_v30 = vld [vmem:[%s2333_s1 + $0x490] sm:$0xff] }
  0x2e   :  { %1386 = vmatprep.subr.bf16.mxu0 %v1385_v22  ;;  %v1403_v22 = vpack.c.bf16 %v110_v14, %v109_v13  ;;  %v1437_v25 = vpack.c.bf16 %v176_v19, %v175_v18  ;;  %v191_v27 = vld [vmem:[%s2333_s1 + $0x500] sm:$0xff]  ;;  %v192_v28 = vld [vmem:[%s2333_s1 + $0x508] sm:$0xff]  ;;  %v178_v31 = vld [vmem:[%s2333_s1 + $0x498] sm:$0xff] }
  0x2f   :  { %1416 = vmatpush3.bf16.msra.mxu1 %v1415_v21  ;;  %v208_v21 = vld [vmem:[%s2333_s1 + $0x588] sm:$0xff]  ;;  %v209_v33 = vld [vmem:[%s2333_s1 + $0x590] sm:$0xff]  ;;  %v1441_v38 = vpack.c.bf16 %v178_v31, %v177_v30  ;;  %v162_v40 = vld [vmem:[%s2333_s1 + $0x418] sm:$0xff] }
  0x30   :  { %1418 = vmatprep.subr.bf16.mxu1 %v1417_v26  ;;  %v160_v26 = vld [vmem:[%s2333_s1 + $0x408] sm:$0xff]  ;;  %v1469_v29 = vpack.c.bf16 %v208_v21, %v207_v20  ;;  %v29_v37 = vld [vmem:[%s2332_s0 + $0x10] sm:$0xff]  ;;  %v194_v46 = vld [vmem:[%s2333_s1 + $0x518] sm:$0xff] }
  0x31   :  { %1388 = vmatpush3.bf16.msra.mxu0 %v1387_v34  ;;  %v210_v34 = vld [vmem:[%s2333_s1 + $0x598] sm:$0xff]  ;;  %v161_v39 = vld [vmem:[%s2333_s1 + $0x410] sm:$0xff]  ;;  %v2071_v43 = vrot.slane %v29_v37, %v1762_v10  ;;  %v272_v44 = vcombine.high %v29_v37, %v29_v37  ;;  %v179_v47 = vld [vmem:[%s2333_s1 + $0x4a0] sm:$0xff] }
  0x32   :  { %1390 = vmatprep.subr.bf16.mxu0 %v1389_v36  ;;  %v1471_v36 = vpack.c.bf16 %v192_v28, %v191_v27  ;;  %v1473_v45 = vpack.c.bf16 %v210_v34, %v209_v33  ;;  %v180_v48 = vld [vmem:[%s2333_s1 + $0x4a8] sm:$0xff] }
  0x33   :  { %1420 = vmatpush3.bf16.msra.mxu1 %v1419_v35  ;;  %v1439_v35 = vpack.c.bf16 %v160_v26, %v159_v23  ;;  %v2092_v52 = vrot.slane %v272_v44, %v1762_v10 }
  0x34   :  { %1422 = vmatprep.subr.bf16.mxu1 %v1421_v42  ;;  %v193_v42 = vld [vmem:[%s2333_s1 + $0x510] sm:$0xff] }
  0x35   :  { %1392 = vmatpush3.bf16.msra.mxu0 %v1391_v49  ;;  %v211_v49 = vld [vmem:[%s2333_s1 + $0x5a0] sm:$0xff] }
  0x36   :  { %1394 = vmatprep.subr.bf16.mxu0 %v1393_v51  ;;  %v287_v51 = vcombine.high %v2071_v43, %v2071_v43 }
  0x37   :  { %1424 = vmatpush3.bf16.msra.mxu1 %v1423_v50  ;;  %v212_v50 = vld [vmem:[%s2333_s1 + $0x5a8] sm:$0xff] }
  0x38   :  { %1426 = vmatprep.subr.bf16.mxu1 %v1425_v55 }
  0x39   :  { %1396 = vmatpush3.bf16.msra.mxu0 %v1395_v61 }
  0x3a   :  { %1398 = vmatprep.subr.bf16.mxu0 %v1397_v63 }
  0x3b   :  { %1428 = vmatpush3.bf16.msra.mxu1 %v1427_v62 }
  0x3c   :  { %1430 = vmatprep.subr.bf16.mxu1 %v1429_v3 }
  0x3d   :  { %1400 = vmatpush3.bf16.msra.mxu0 %v1399_v9 }
  0x3e   :  { %1402 = vmatprep.subr.bf16.mxu0 %v1401_v12 }
  0x3f   :  { %1432 = vmatpush3.bf16.msra.mxu1 %v1431_v11 }
  0x40   :  { %1434 = vmatprep.subr.bf16.mxu1 %v1433_v16 }
  0x41   :  { %1404 = vmatpush3.bf16.msra.mxu0 %v1403_v22 }
  0x42   :  { %1438 = vmatprep.subr.bf16.mxu0 %v1437_v25 }
  0x43   :  { %1436 = vmatpush3.bf16.msra.mxu1 %v1435_v24 }
  0x44   :  { %1470 = vmatprep.subr.bf16.mxu1 %v1469_v29  ;;  %516 = vmatmul.mubr.f32.vlgmr.msra.gmra.mrb[2].mxu0 %v1929_v32 }
  0x45   :  { %12 = vsyncpa [#allocation3], 0  ;;  %1440 = vmatpush3.bf16.msra.mxu0 %v1439_v35  ;;  %v1443_v53 = vpack.c.bf16 %v162_v40, %v161_v39  ;;  %v1475_v32 = vpack.c.bf16 %v194_v46, %v193_v42  ;;  %v1445_v54 = vpack.c.bf16 %v180_v48, %v179_v47  ;;  %v163_v55 = vld [vmem:[%s2333_s1 + $0x420] sm:$0xff]  ;;  %v164_v56 = vld [vmem:[%s2333_s1 + $0x428] sm:$0xff]  ;;  %v1477_v57 = vpack.c.bf16 %v212_v50, %v211_v49 }
  0x46   :  { %586 = vmatmul.mubr.f32.vlgmr.msra.gmra.mrb[2].mxu1 %v1943_v41  ;;  %1442 = vmatprep.subr.bf16.mxu0 %v1441_v38  ;;  %v195_v10 = vld [vmem:[%s2333_s1 + $0x520] sm:$0xff]  ;;  %v288_v41 = vcombine.high %v2092_v52, %v2092_v52  ;;  %v196_v58 = vld [vmem:[%s2333_s1 + $0x528] sm:$0xff]  ;;  %v181_v59 = vld [vmem:[%s2333_s1 + $0x4b0] sm:$0xff]  ;;  %v1447_v63 = vpack.c.bf16 %v164_v56, %v163_v55  ;;  %vm1575_vm0 = vmmov 0   ;;  %vm308_vm1 = vcmask 261120  }
  0x47   :  { %1472 = vmatpush3.bf16.msra.mxu1 %v1471_v36  ;;  %v182_v60 = vld [vmem:[%s2333_s1 + $0x4b8] sm:$0xff]  ;;  %655 = vmatprep.mubr.f32.mxu0 %v287_v51  ;;  %v213_v61 = vld [vmem:[%s2333_s1 + $0x5b0] sm:$0xff]  ;;  %v1479_v0 = vpack.c.bf16 %v196_v58, %v195_v10  ;;  %v183_v7 = vld [vmem:[%s2333_s1 + $0x4c0] sm:$0xff]  ;;  %vm980_vm2 = vcmask 74752  }
  0x48   :  { %1474 = vmatprep.subr.bf16.mxu1 %v1473_v45  ;;  %v214_v62 = vld [vmem:[%s2333_s1 + $0x5b8] sm:$0xff]  ;;  %725 = vmatprep.mubr.f32.mxu1 %v288_v41  ;;  %v1449_v1 = vpack.c.bf16 %v182_v60, %v181_v59  ;;  %v165_v2 = vld [vmem:[%s2333_s1 + $0x430] sm:$0xff]  ;;  %v184_v8 = vld [vmem:[%s2333_s1 + $0x4c8] sm:$0xff] }
  0x49   :  { %1444 = vmatpush3.bf16.msra.mxu0 %v1443_v53  ;;  %v166_v3 = vld [vmem:[%s2333_s1 + $0x438] sm:$0xff]  ;;  %v197_v4 = vld [vmem:[%s2333_s1 + $0x530] sm:$0xff]  ;;  %v1481_v5 = vpack.c.bf16 %v214_v62, %v213_v61  ;;  %v215_v9 = vld [vmem:[%s2333_s1 + $0x5c0] sm:$0xff]  ;;  %v1453_v14 = vpack.c.bf16 %v184_v8, %v183_v7  ;;  %v1574_v62 = vmov 0.0|0.0  }
  0x4a   :  { %1446 = vmatprep.subr.bf16.mxu0 %v1445_v54  ;;  %v198_v6 = vld [vmem:[%s2333_s1 + $0x538] sm:$0xff]  ;;  %v216_v11 = vld [vmem:[%s2333_s1 + $0x5c8] sm:$0xff]  ;;  %v1451_v12 = vpack.c.bf16 %v166_v3, %v165_v2  ;;  %v167_v15 = vld [vmem:[%s2333_s1 + $0x440] sm:$0xff]  ;;  %v1576_v2 = vmov 0.0  }
  0x4b   :  { %1476 = vmatpush3.bf16.msra.mxu1 %v1475_v32  ;;  %v1483_v13 = vpack.c.bf16 %v198_v6, %v197_v4  ;;  %v168_v16 = vld [vmem:[%s2333_s1 + $0x448] sm:$0xff]  ;;  %v199_v17 = vld [vmem:[%s2333_s1 + $0x540] sm:$0xff]  ;;  %v1485_v18 = vpack.c.bf16 %v216_v11, %v215_v9  ;;  %v185_v20 = vld [vmem:[%s2333_s1 + $0x4d0] sm:$0xff] }
  0x4c   :  { %1478 = vmatprep.subr.bf16.mxu1 %v1477_v57  ;;  %v200_v19 = vld [vmem:[%s2333_s1 + $0x548] sm:$0xff]  ;;  %v186_v21 = vld [vmem:[%s2333_s1 + $0x4d8] sm:$0xff]  ;;  %v217_v22 = vld [vmem:[%s2333_s1 + $0x5d0] sm:$0xff]  ;;  %v1455_v24 = vpack.c.bf16 %v168_v16, %v167_v15 }
  0x4d   :  { %1448 = vmatpush3.bf16.msra.mxu0 %v1447_v63  ;;  %v218_v23 = vld [vmem:[%s2333_s1 + $0x5d8] sm:$0xff]  ;;  %v1487_v25 = vpack.c.bf16 %v200_v19, %v199_v17  ;;  %v1457_v26 = vpack.c.bf16 %v186_v21, %v185_v20  ;;  %v169_v27 = vld [vmem:[%s2333_s1 + $0x450] sm:$0xff]  ;;  %v187_v33 = vld [vmem:[%s2333_s1 + $0x4e0] sm:$0xff] }
  0x4e   :  { %1450 = vmatprep.subr.bf16.mxu0 %v1449_v1  ;;  %v170_v28 = vld [vmem:[%s2333_s1 + $0x458] sm:$0xff]  ;;  %v201_v29 = vld [vmem:[%s2333_s1 + $0x550] sm:$0xff]  ;;  %v1489_v30 = vpack.c.bf16 %v218_v23, %v217_v22  ;;  %v188_v34 = vld [vmem:[%s2333_s1 + $0x4e8] sm:$0xff] }
  0x4f   :  { %1480 = vmatpush3.bf16.msra.mxu1 %v1479_v0  ;;  %v202_v31 = vld [vmem:[%s2333_s1 + $0x558] sm:$0xff]  ;;  %v219_v35 = vld [vmem:[%s2333_s1 + $0x5e0] sm:$0xff]  ;;  %v220_v36 = vld [vmem:[%s2333_s1 + $0x5e8] sm:$0xff]  ;;  %v1459_v37 = vpack.c.bf16 %v170_v28, %v169_v27  ;;  %v1461_v39 = vpack.c.bf16 %v188_v34, %v187_v33 }
  0x50   :  { %1482 = vmatprep.subr.bf16.mxu1 %v1481_v5  ;;  %v1491_v38 = vpack.c.bf16 %v202_v31, %v201_v29  ;;  %v171_v40 = vld [vmem:[%s2333_s1 + $0x460] sm:$0xff]  ;;  %v172_v42 = vld [vmem:[%s2333_s1 + $0x468] sm:$0xff]  ;;  %v1493_v45 = vpack.c.bf16 %v220_v36, %v219_v35  ;;  %v189_v47 = vld [vmem:[%s2333_s1 + $0x4f0] sm:$0xff] }
  0x51   :  { %1452 = vmatpush3.bf16.msra.mxu0 %v1451_v12  ;;  %v203_v44 = vld [vmem:[%s2333_s1 + $0x560] sm:$0xff]  ;;  %v204_v46 = vld [vmem:[%s2333_s1 + $0x568] sm:$0xff]  ;;  %v190_v48 = vld [vmem:[%s2333_s1 + $0x4f8] sm:$0xff]  ;;  %v1463_v51 = vpack.c.bf16 %v172_v42, %v171_v40 }
  0x52   :  { %1454 = vmatprep.subr.bf16.mxu0 %v1453_v14  ;;  %v221_v49 = vld [vmem:[%s2333_s1 + $0x5f0] sm:$0xff]  ;;  %v222_v50 = vld [vmem:[%s2333_s1 + $0x5f8] sm:$0xff]  ;;  %v1495_v53 = vpack.c.bf16 %v204_v46, %v203_v44  ;;  %v1465_v32 = vpack.c.bf16 %v190_v48, %v189_v47  ;;  %v223_v59 = vld [vmem:[%s2333_s1 + $0x600] sm:$0xff] }
  0x53   :  { %1484 = vmatpush3.bf16.msra.mxu1 %v1483_v13  ;;  %v173_v54 = vld [vmem:[%s2333_s1 + $0x470] sm:$0xff]  ;;  %v174_v55 = vld [vmem:[%s2333_s1 + $0x478] sm:$0xff]  ;;  %v1497_v56 = vpack.c.bf16 %v222_v50, %v221_v49  ;;  %v224_v60 = vld [vmem:[%s2333_s1 + $0x608] sm:$0xff] }
  0x54   :  { %1486 = vmatprep.subr.bf16.mxu1 %v1485_v18  ;;  %v205_v10 = vld [vmem:[%s2333_s1 + $0x570] sm:$0xff]  ;;  %v206_v41 = vld [vmem:[%s2333_s1 + $0x578] sm:$0xff]  ;;  %v1467_v57 = vpack.c.bf16 %v174_v55, %v173_v54  ;;  %v1502_v61 = vpack.c.bf16 %v224_v60, %v223_v59  ;;  %v806_v8 = vld [vmem:[%s2335_s3 + $0x20] sm:$0xff] }
  0x55   :  { %1456 = vmatpush3.bf16.msra.mxu0 %v1455_v24  ;;  %v1499_v58 = vpack.c.bf16 %v206_v41, %v205_v10  ;;  %v225_v63 = vld [vmem:[%s2333_s1 + $0x610] sm:$0xff]  ;;  %v226_v0 = vld [vmem:[%s2333_s1 + $0x618] sm:$0xff]  ;;  %v807_v9 = vld [vmem:[%s2335_s3 + $0x28] sm:$0xff] }
  0x56   :  { %1458 = vmatprep.subr.bf16.mxu0 %v1457_v26  ;;  %v1505_v1 = vpack.c.bf16 %v226_v0, %v225_v63  ;;  %v1010_v3 = vld.sshfl [vmem:[%s2332_s0 + $0x18] sm:$0x3 pattern:$0x76325410]  ;;  %v804_v4 = vld [vmem:[%s2335_s3 + $0x10] sm:$0xff]  ;;  %v1514_v11 = vpack.c.bf16 %v807_v9, %v806_v8  ;;  %v810_v15 = vld [vmem:[%s2335_s3 + $0x40] sm:$0xff] }
  0x57   :  { %1488 = vmatpush3.bf16.msra.mxu1 %v1487_v25  ;;  %v805_v6 = vld [vmem:[%s2335_s3 + $0x18] sm:$0xff]  ;;  %v808_v12 = vld [vmem:[%s2335_s3 + $0x30] sm:$0xff]  ;;  %v811_v16 = vld [vmem:[%s2335_s3 + $0x48] sm:$0xff] }
  0x58   :  { %1490 = vmatprep.subr.bf16.mxu1 %v1489_v30  ;;  %v1511_v7 = vpack.c.bf16 %v805_v6, %v804_v4  ;;  %v809_v13 = vld [vmem:[%s2335_s3 + $0x38] sm:$0xff]  ;;  %v1520_v17 = vpack.c.bf16 %v811_v16, %v810_v15  ;;  %v812_v18 = vld [vmem:[%s2335_s3 + $0x50] sm:$0xff]  ;;  %v814_v21 = vld [vmem:[%s2335_s3 + $0x60] sm:$0xff] }
  0x59   :  { %1460 = vmatpush3.bf16.msra.mxu0 %v1459_v37  ;;  %v1517_v14 = vpack.c.bf16 %v809_v13, %v808_v12  ;;  %v813_v19 = vld [vmem:[%s2335_s3 + $0x58] sm:$0xff]  ;;  %v815_v22 = vld [vmem:[%s2335_s3 + $0x68] sm:$0xff]  ;;  %v816_v24 = vld [vmem:[%s2335_s3 + $0x70] sm:$0xff] }
  0x5a   :  { %1462 = vmatprep.subr.bf16.mxu0 %v1461_v39  ;;  %v1523_v20 = vpack.c.bf16 %v813_v19, %v812_v18  ;;  %v1526_v23 = vpack.c.bf16 %v815_v22, %v814_v21  ;;  %v817_v25 = vld [vmem:[%s2335_s3 + $0x78] sm:$0xff]  ;;  %v896_v27 = vld [vmem:[%s2337_s5] sm:$0xff]  ;;  %v897_v28 = vld [vmem:[%s2337_s5 + $0x8] sm:$0xff] }
  0x5b   :  { %1492 = vmatpush3.bf16.msra.mxu1 %v1491_v38  ;;  %v1529_v26 = vpack.c.bf16 %v817_v25, %v816_v24  ;;  %v1532_v29 = vpack.c.bf16 %v897_v28, %v896_v27  ;;  %v1009_v31 = vld [vmem:[%s2334_s2] ss:$0 sm:$0xff]  ;;  %v898_v60 = vld [vmem:[%s2337_s5 + $0x10] sm:$0xff] }
  0x5c   :  { %1494 = vmatprep.subr.bf16.mxu1 %v1493_v45  ;;  %v1012_v63 = vld [vmem:[%s2336_s4] ss:$0 sm:$0xff]  ;;  %s1577_s4 = smov [#allocation2]  }
  0x5d   :  { %1464 = vmatpush3.bf16.msra.mxu0 %v1463_v51 }
  0x5e   :  { %1466 = vmatprep.subr.bf16.mxu0 %v1465_v32 }
  0x5f   :  { %1496 = vmatpush3.bf16.msra.mxu1 %v1495_v53 }
  0x60   :  { %1498 = vmatprep.subr.bf16.mxu1 %v1497_v56 }
  0x61   :  { %1468 = vmatpush3.bf16.msra.mxu0 %v1467_v57 }
  0x62   :  { %1501 = vmatprep.subr.bf16.mxu0 %v1574_v62 }
  0x63   :  { %1500 = vmatpush3.bf16.msra.mxu1 %v1499_v58 }
  0x64   :  { %1507 = vmatprep.subr.bf16.mxu1 %v1574_v62  ;;  %656 = vmatmul.mubr.f32.vlgmr.msra.gmra.mrb[4].mxu0 %v2071_v43  ;;  %v802_v43 = vld [vmem:[%s2335_s3] sm:$0xff] }
  0x65   :  { %1503 = vmatpush3.bf16.msra.mxu0 %v1502_v61  ;;  %1260 = vmatprep.mubr.msk.f32.mxu0 %vm1575_vm0, %v1576_v2  ;;  %v899_v61 = vld [vmem:[%s2337_s5 + $0x18] sm:$0xff]  ;;  %s1001_s5 = sshll.u32 %s1577_s4, 4  ;;  %s1002_s5 = int_to_ptr.vmem [resolvable:$true] %s1001_s5 }
  0x66   :  { %726 = vmatmul.mubr.f32.vlgmr.msra.gmra.mrb[4].mxu1 %v2092_v52  ;;  %1504 = vmatprep.subr.bf16.mxu0 %v1574_v62  ;;  %v803_v52 = vld [vmem:[%s2335_s3 + $0x8] sm:$0xff]  ;;  %p1554_p1 = scmp.lt.s32.totalorder %s1002_s5, %s1002_s5 }
  0x67   :  { %1295 = vmatprep.mubr.msk.f32.mxu1 %vm1575_vm0, %v1576_v2  ;;  %v1508_v5 = vpack.c.bf16 %v803_v52, %v802_v43  ;;  %v1013_v43 = vld [vmem:[%s2338_s6] ss:$0 sm:$0xff]  ;;  %s1549_s6 = scalar_lea.vmem %s1002_s5, 32 }
  0x68   :  { %p1550_p0 = scmp.ne.s32.totalorder %s1002_s5, %s1549_s6  ;;  %p1555_p2 = scmp.lt.s32.totalorder %s1549_s6, %s1549_s6 }
  0x69   :  { %1506 = vmatpush3.bf16.msra.mxu0 %v1505_v1  ;;  %1509 = vmatpush3.bf16.msra.mxu1 %v1508_v5 }
  0x6a   :  { %1531 = vmatprep.subr.bf16.mxu0 %v1574_v62  ;;  %1510 = vmatprep.subr.bf16.mxu1 %v1574_v62  ;;  %p1556_p3 = por %p1555_p2, %p1554_p1 }
  0x6c   :  { %1261 = vmatmul.mubr.msk.f32.vlgmr.msra.gmra.mrb[6].mxu0 %vm308_vm1, %v1010_v3  ;;  %p1557_p4 = pnand %p1556_p3, %p1550_p0 }
  0x6d   :  { %1306 = vmatprep.mubr.msk.f32.mxu0 %vm1575_vm0, %v1576_v2  ;;  %1512 = vmatpush3.bf16.msra.mxu1 %v1511_v7 }
  0x6e   :  { %1513 = vmatprep.subr.bf16.mxu1 %v1574_v62  ;;  %1533 = vmatpush3.bf16.msra.mxu0 %v1532_v29 }
  0x6f   :  { %1534 = vmatprep.subr.bf16.mxu0 %v1574_v62 }
  0x71   :  { %1515 = vmatpush3.bf16.msra.mxu1 %v1514_v11 }
  0x72   :  { %1516 = vmatprep.subr.bf16.mxu1 %v1574_v62 }
  0x75   :  { %1518 = vmatpush3.bf16.msra.mxu1 %v1517_v14 }
  0x76   :  { %1519 = vmatprep.subr.bf16.mxu1 %v1574_v62 }
  0x79   :  { %1521 = vmatpush3.bf16.msra.mxu1 %v1520_v17 }
  0x7a   :  { %1522 = vmatprep.subr.bf16.mxu1 %v1574_v62 }
  0x7d   :  { %1524 = vmatpush3.bf16.msra.mxu1 %v1523_v20 }
  0x7e   :  { %1525 = vmatprep.subr.bf16.mxu1 %v1574_v62 }
  0x81   :  { %1527 = vmatpush3.bf16.msra.mxu1 %v1526_v23 }
  0x82   :  { %1528 = vmatprep.subr.bf16.mxu1 %v1574_v62  ;;  %v1535_v62 = vpack.c.bf16 %v899_v61, %v898_v60 }
  0x84   :  { %1536 = vmatpush3.bf16.msra.mxu0 %v1535_v62 }
  0x85   :  { %1530 = vmatpush3.bf16.msra.mxu1 %v1529_v26 }
  0xf7   :  { %v1047_v30 = vpop.f32.mrb[0].mxu0 }
  0xf8   :  { %v1048_v33 = vpop.f32.mrb[1].mxu0 }
  0xf9   :  { %v1082_v34 = vpop.f32.mrb[0].mxu1  ;;  %v1049_v35 = vadd.f32 %v1048_v33, %v1047_v30 }
  0xfa   :  { %v1083_v36 = vpop.f32.mrb[1].mxu1 }
  0xfb   :  { %v1084_v37 = vadd.f32 %v1083_v36, %v1082_v34  ;;  %v378_v38 = vadd.f32 %v1049_v35, %v1009_v31 }
  0xfd   :  { %v448_v39 = vadd.f32 %v1084_v37, %v378_v38 }
 0x117   :  { %v1117_v40 = vpop.f32.mrb[2].mxu0 }
 0x118   :  { %v1118_v42 = vpop.f32.mrb[3].mxu0 }
 0x119   :  { %v1152_v44 = vpop.f32.mrb[2].mxu1  ;;  %v1119_v45 = vadd.f32 %v1118_v42, %v1117_v40 }
 0x11a   :  { %v1153_v46 = vpop.f32.mrb[3].mxu1 }
 0x11b   :  { %v1154_v47 = vadd.f32 %v1153_v46, %v1152_v44  ;;  %v518_v48 = vadd.f32 %v1119_v45, %v448_v39 }
 0x11d   :  { %v588_v49 = vadd.f32 %v1154_v47, %v518_v48 }
 0x137   :  { %v1187_v50 = vpop.f32.mrb[4].mxu0 }
 0x138   :  { %v1188_v51 = vpop.f32.mrb[5].mxu0 }
 0x139   :  { %v1222_v53 = vpop.f32.mrb[4].mxu1  ;;  %v1189_v32 = vadd.f32 %v1188_v51, %v1187_v50 }
 0x13a   :  { %v1223_v54 = vpop.f32.mrb[5].mxu1 }
 0x13b   :  { %v1224_v55 = vadd.f32 %v1223_v54, %v1222_v53  ;;  %v658_v56 = vadd.f32 %v1189_v32, %v588_v49 }
 0x13d   :  { %v728_v10 = vadd.f32 %v1224_v55, %v658_v56 }
 0x13f   :  { %v797_v41 = vpop.f32.mrb[6].mxu0 }
 0x140   :  { %v798_v57 = vadd.f32 %v797_v41, %v728_v10  ;;  %v1262_v58 = vpop.f32.mrb[7].mxu0 }
 0x142   :  { %v801_v59 = vmax.f32 %v798_v57, 0.0 }
 0x144   :  { %1296 = vmatmul.mubr.f32.vlgmr.msra.gmra.mrb[6].mxu1 %v801_v59 }
 0x217   :  { %v891_v0 = vpop.f32.mrb[6].mxu1 }
 0x218   :  { %v892_v1 = vadd.f32 %v1012_v63, %v891_v0  ;;  %v1297_v2 = vpop.f32.mrb[7].mxu1 }
 0x21a   :  { %v895_v3 = vmax.f32 %v892_v1, 0.0 }
 0x21c   :  { %1307 = vmatmul.mubr.msk.f32.vlgmr.msra.gmra.mrb[8].mxu0 %vm308_vm1, %v895_v3 }
 0x2ef   :  { %v976_v52 = vpop.f32.mrb[8].mxu0 }
 0x2f0   :  { %v977_v4 = vadd.f32 %v1013_v43, %v976_v52  ;;  %v1308_v5 = vpop.f32.mrb[9].mxu0 }
 0x2f2   :  { %v981_v6 = vsel %vm980_vm2, %v977_v4, -inf }
 0x2f3   :  { %982 = vmax.xlane.f32.xlu0 %v981_v6 }
 0x380   :  { %v983_v7 = vpop.xlane.xlu0 %982 }
 0x381   :  { %v984_v8 = vsub.f32 %v977_v4, %v983_v7 }
 0x383   :  { %v985_v9 = vmul.f32 1.442695, %v984_v8 }
 0x385   :  { %1545 = vpow2.f32 %v985_v9 }
 0x38f   :  { %v1546_v11 = vpop.eup %1545 }
 0x390   :  { %v987_v12 = vsel %vm980_vm2, %v1546_v11, 0.0 }
 0x391   :  { %988 = vadd.xlane.f32.xlu0 %v987_v12 }
 0x41e   :  { %v989_v13 = vpop.xlane.xlu0 %988 }
 0x41f   :  { %1547 = vlog2.f32 %v989_v13 }
 0x429   :  { %v1548_v14 = vpop.eup %1547 }
 0x42a   :  { %v991_v15 = vmul.f32 0.6931472, %v1548_v14 }
 0x42c   :  { %v992_v16 = vadd.f32 %v991_v15, %v983_v7 }
 0x42e   :  { %v993_v17 = vsub.f32 %v977_v4, %v992_v16 }
 0x430   :  { %994 = vst.msk [vmem:[#allocation2] sm:$0x3] %vm980_vm2, %v993_v17 }
 0x431   :  { %1560 = shalt.err (!%p1557_p4)
}
 0x432   :  { %s1561_s29 = scalar_lea.hbm %s2339_s7, 32 }
 0x433   :  { %p1562_p5 = scmp.ne.s32.totalorder %s2339_s7, %s1561_s29  ;;  %p1565_p6 = scmp.lt.u32.totalorder %s1561_s29, %s2339_s7 }
 0x435   :  { %p1567_p7 = pnand %p1565_p6, %p1562_p5 }
 0x437   :  { %1570 = shalt.err (!%p1567_p7)
}
 0x438   :  { %1004 = dma.vmem_to_hbm [thread:$0]  %s1002_s5, 32, %s2339_s7, [#allocation3]  }
 0x439   :  { %1571 = dma.done.wait [#allocation3], 32  }
 0x43a   :  { %1572 = vsyncadd [#allocation3], 4294967264 }
 0x43b   :  { %1008 = vsyncpa [#allocation3], 1 }

</bundles_post_ra>
